<compile_context>
chip_gen: v6e
topology: v6e:2x2x1
jax: 0.10.0
libtpu: 0.0.40
codegen_flags: <defaults>
</compile_context>

<pallas_src>
import math

import jax
import jax.numpy as jnp
from jax.experimental import pallas as pl
from jax.experimental.pallas import tpu as pltpu

# ---- scaled-down ViT-B/16 configuration (same topology, small dims) ----
IMG = 32             # (vit_b_16 uses 224)
PATCH = 16
IN_CH = 3
HIDDEN = 64          # (768 in vit_b_16)
NUM_LAYERS = 2       # (12 in vit_b_16)
NUM_HEADS = 4        # (12 in vit_b_16)
MLP_DIM = 128        # (3072 in vit_b_16)
HEAD_DIM = HIDDEN // NUM_HEADS
GRID_N = (IMG // PATCH) ** 2           # patches per image
SEQ = GRID_N + 1                       # + class token
PATCH_DIM = IN_CH * PATCH * PATCH      # flattened patch pixels, (C, ph, pw) order

BACKBONE_OUT = 1000  # torchvision vit_b_16 classifier output (feeds the fc head)
BACKBONE_PAD = 1024  # lane-aligned (128-multiple) padding of the 1000-wide head
FC_HIDDEN = 512
NUM_CLASSES = 10
LN_EPS = 1e-6        # torchvision ViT LayerNorm eps
BN_EPS = 1e-5        # nn.BatchNorm1d default eps
LEAKY_SLOPE = 0.2


# ----------------------------- in-kernel helpers -----------------------------

def _erf_poly(x):
    # Abramowitz & Stegun 7.1.26 polynomial erf, |error| <= 1.5e-7 (exact-GELU to f32
    # noise) — built only from exp/mul/add/div so it lowers on every TPU generation.
    a1, a2, a3, a4, a5 = 0.254829592, -0.284496736, 1.421413741, -1.453152027, 1.061405429
    pc = 0.3275911
    sgn = jnp.where(x >= 0.0, 1.0, -1.0)
    ax = jnp.abs(x)
    t = 1.0 / (1.0 + pc * ax)
    poly = ((((a5 * t + a4) * t + a3) * t + a2) * t + a1) * t
    return sgn * (1.0 - poly * jnp.exp(-ax * ax))


def _gelu_exact(x):
    # TODO(synk): exact-erf GELU is evaluated via an A&S polynomial erf (~1.5e-7 abs
    # error) instead of lax.erf to guarantee Mosaic lowering on all jax versions.
    return 0.5 * x * (1.0 + _erf_poly(x * (1.0 / math.sqrt(2.0))))


def _layernorm(x, g, b):
    mu = jnp.mean(x, axis=-1, keepdims=True)
    xc = x - mu
    var = jnp.mean(xc * xc, axis=-1, keepdims=True)
    return xc * jax.lax.rsqrt(var + LN_EPS) * g + b


# ----------------------------- the fused forward kernel -----------------------------

def _vit_forward_kernel(
    patches_ref,                       # (N, PATCH_DIM)       f32
    conv_w_ref, conv_b_ref,            # (PATCH_DIM, D) bf16, (1, D) f32
    cls_ref, pos_ref,                  # (1, D) f32, (S, D) f32
    ln1_g_ref, ln1_b_ref,              # (L, 1, D) f32
    wq_ref, wk_ref, wv_ref,            # (L, H, D, dh) bf16
    bq_ref, bk_ref, bv_ref,            # (L, H, 1, dh) f32
    wo_ref, bo_ref,                    # (L, H, dh, D) bf16, (L, 1, D) f32
    ln2_g_ref, ln2_b_ref,              # (L, 1, D) f32
    w1_ref, b1_ref,                    # (L, D, MLP) bf16, (L, 1, MLP) f32
    w2_ref, b2_ref,                    # (L, MLP, D) bf16, (L, 1, D) f32
    lnf_g_ref, lnf_b_ref,              # (1, D) f32
    head_w_ref, head_b_ref,            # (D, 1024) bf16, (1, 1024) f32
    fc_w1_ref, fc_b1_ref,              # (1024, 512) bf16, (1, 512) f32
    bn_scale_ref, bn_shift_ref,        # (1, 512) f32 (BatchNorm1d eval folded)
    fc_w2_ref, fc_b2_ref,              # (512, C) bf16, (1, C) f32
    out_ref,                           # (1, C) f32
):
    f32 = jnp.float32
    bf16 = jnp.bfloat16
    scale = 1.0 / math.sqrt(HEAD_DIM)

    # ---- patch embedding (Conv2d k=stride=16 as matmul) + class token + pos embed ----
    patches = patches_ref[...].astype(bf16)                               # (N, CPP)
    tok = jnp.dot(patches, conv_w_ref[...],
                  preferred_element_type=f32) + conv_b_ref[...]           # (N, D)
    z = jnp.concatenate([cls_ref[...], tok], axis=0) + pos_ref[...]       # (S, D) f32

    # ---- encoder layers: pre-LN MHA + residual, pre-LN MLP + residual ----
    for l in range(NUM_LAYERS):
        h = _layernorm(z, ln1_g_ref[l], ln1_b_ref[l])
        hb = h.astype(bf16)
        attn = jnp.zeros_like(z)                                          # (S, D) f32
        for hd in range(NUM_HEADS):
            q = jnp.dot(hb, wq_ref[l, hd], preferred_element_type=f32) + bq_ref[l, hd]
            k = jnp.dot(hb, wk_ref[l, hd], preferred_element_type=f32) + bk_ref[l, hd]
            v = jnp.dot(hb, wv_ref[l, hd], preferred_element_type=f32) + bv_ref[l, hd]
            # scores = q @ k^T (contract the head dim of both)
            s = jax.lax.dot_general(
                q.astype(bf16), k.astype(bf16),
                dimension_numbers=(((1,), (1,)), ((), ())),
                preferred_element_type=f32) * scale                        # (S, S)
            s = s - jnp.max(s, axis=-1, keepdims=True)
            p = jnp.exp(s)
            p = p * pl.reciprocal(jnp.sum(p, axis=-1, keepdims=True), approx=True)
            oh = jnp.dot(p.astype(bf16), v.astype(bf16),
                         preferred_element_type=f32)                       # (S, dh)
            attn = attn + jnp.dot(oh.astype(bf16), wo_ref[l, hd],
                                  preferred_element_type=f32)              # (S, D)
        z = z + attn + bo_ref[l]          # attention/residual dropout: identity (eval)

        y = _layernorm(z, ln2_g_ref[l], ln2_b_ref[l])
        h1 = jnp.dot(y.astype(bf16), w1_ref[l], preferred_element_type=f32) + b1_ref[l]
        h1 = _gelu_exact(h1)
        h2 = jnp.dot(h1.astype(bf16), w2_ref[l], preferred_element_type=f32) + b2_ref[l]
        z = z + h2                        # MLP dropout: identity (eval)

    # ---- final LayerNorm on the class token only, backbone head, fc classifier ----
    cls_tok = _layernorm(z[0:1, :], lnf_g_ref[...], lnf_b_ref[...])       # (1, D)
    feats = jnp.dot(cls_tok.astype(bf16), head_w_ref[...],
                    preferred_element_type=f32) + head_b_ref[...]         # (1, 1024)
    g = jnp.dot(feats.astype(bf16), fc_w1_ref[...],
                preferred_element_type=f32) + fc_b1_ref[...]              # (1, 512)
    g = g * bn_scale_ref[...] + bn_shift_ref[...]                          # BatchNorm1d eval
    g = jnp.where(g >= 0.0, g, LEAKY_SLOPE * g)                            # LeakyReLU(0.2)
    # Dropout(p=0.2): identity in eval mode
    out_ref[...] = jnp.dot(g.astype(bf16), fc_w2_ref[...],
                           preferred_element_type=f32) + fc_b2_ref[...]   # (1, C)


# --------------------------- parameter / input preparation ---------------------------

def _prep_inputs_and_specs(x, p):
    """Flatten patches, pre-split per-head weights, fold BN, pad the 1000-wide head,
    cast matmul weights to bf16, and build matching BlockSpecs (grid over batch)."""
    bf16 = jnp.bfloat16
    B = x.shape[0]

    args, specs = [], []

    def add_const(a):
        nd = a.ndim
        args.append(a)
        specs.append(pl.BlockSpec(a.shape, lambda b, _nd=nd: (0,) * _nd))

    # 1) patches: Conv2d(k=stride=PATCH) flatten — (C, ph, pw) within a patch,
    #    row-major over the patch grid (matches torchvision conv_proj + flatten).
    gh = gw = IMG // PATCH
    patches = x.reshape(B, IN_CH, gh, PATCH, gw, PATCH)
    patches = patches.transpose(0, 2, 4, 1, 3, 5).reshape(B, GRID_N, PATCH_DIM)
    args.append(patches)
    specs.append(pl.BlockSpec((None, GRID_N, PATCH_DIM), lambda b: (b, 0, 0)))

    # 2) patch-embed weights / cls token / positional embedding
    add_const(p["conv_w"].reshape(HIDDEN, PATCH_DIM).T.astype(bf16))      # (CPP, D)
    add_const(p["conv_b"].reshape(1, HIDDEN))
    add_const(p["cls_token"].reshape(1, HIDDEN))
    add_const(p["pos_embed"].reshape(SEQ, HIDDEN))

    # 3) encoder layers, stacked along a leading L axis, heads pre-split
    def stack(name):
        return jnp.stack([lp[name] for lp in p["layers"]], axis=0)

    ln1_g = stack("ln1_g").reshape(NUM_LAYERS, 1, HIDDEN)
    ln1_b = stack("ln1_b").reshape(NUM_LAYERS, 1, HIDDEN)
    ln2_g = stack("ln2_g").reshape(NUM_LAYERS, 1, HIDDEN)
    ln2_b = stack("ln2_b").reshape(NUM_LAYERS, 1, HIDDEN)

    w_qkv = stack("w_qkv")                                                # (L, D, 3D)
    b_qkv = stack("b_qkv")                                                # (L, 3D)

    def qkv_split(i):
        w = w_qkv[:, :, i * HIDDEN:(i + 1) * HIDDEN]                      # (L, D, D)
        w = w.reshape(NUM_LAYERS, HIDDEN, NUM_HEADS, HEAD_DIM).transpose(0, 2, 1, 3)
        b = b_qkv[:, i * HIDDEN:(i + 1) * HIDDEN].reshape(
            NUM_LAYERS, NUM_HEADS, 1, HEAD_DIM)
        return w.astype(bf16), b

    wq, bq = qkv_split(0)
    wk, bk = qkv_split(1)
    wv, bv = qkv_split(2)
    wo = stack("w_out").reshape(NUM_LAYERS, NUM_HEADS, HEAD_DIM, HIDDEN).astype(bf16)
    bo = stack("b_out").reshape(NUM_LAYERS, 1, HIDDEN)

    add_const(ln1_g); add_const(ln1_b)
    add_const(wq); add_const(wk); add_const(wv)
    add_const(bq); add_const(bk); add_const(bv)
    add_const(wo); add_const(bo)
    add_const(ln2_g); add_const(ln2_b)
    add_const(stack("w_mlp1").astype(bf16))                               # (L, D, MLP)
    add_const(stack("b_mlp1").reshape(NUM_LAYERS, 1, MLP_DIM))
    add_const(stack("w_mlp2").astype(bf16))                               # (L, MLP, D)
    add_const(stack("b_mlp2").reshape(NUM_LAYERS, 1, HIDDEN))

    # 4) final LN + backbone head (zero-padded 1000 -> 1024) + fc head
    add_const(p["lnf_g"].reshape(1, HIDDEN))
    add_const(p["lnf_b"].reshape(1, HIDDEN))

    pad = BACKBONE_PAD - BACKBONE_OUT
    add_const(jnp.pad(p["head_w"], ((0, 0), (0, pad))).astype(bf16))      # (D, 1024)
    add_const(jnp.pad(p["head_b"], (0, pad)).reshape(1, BACKBONE_PAD))
    add_const(jnp.pad(p["fc_w1"], ((0, pad), (0, 0))).astype(bf16))       # (1024, 512)
    add_const(p["fc_b1"].reshape(1, FC_HIDDEN))

    bn_scale = p["bn_gamma"] * jax.lax.rsqrt(p["bn_var"] + BN_EPS)
    bn_shift = p["bn_beta"] - p["bn_mean"] * bn_scale
    add_const(bn_scale.reshape(1, FC_HIDDEN))
    add_const(bn_shift.reshape(1, FC_HIDDEN))

    add_const(p["fc_w2"].astype(bf16))                                    # (512, C)
    add_const(p["fc_b2"].reshape(1, NUM_CLASSES))

    return args, specs


# --------------------------- model ---------------------------

def init_params(key):
    keys = iter(jax.random.split(key, 64))

    def nrm(shape, std=0.02):
        return (std * jax.random.normal(next(keys), shape)).astype(jnp.float32)

    num_patches = GRID_N
    p = {
        "conv_w": nrm((HIDDEN, IN_CH, PATCH, PATCH)),     # Conv2d(3, D, 16, 16)
        "conv_b": jnp.zeros((HIDDEN,), jnp.float32),
        "cls_token": nrm((1, 1, HIDDEN)),
        "pos_embed": nrm((1, num_patches + 1, HIDDEN)),
        "lnf_g": jnp.ones((HIDDEN,), jnp.float32),
        "lnf_b": jnp.zeros((HIDDEN,), jnp.float32),
        "head_w": nrm((HIDDEN, BACKBONE_OUT)),            # heads.head: Linear(D, 1000)
        "head_b": jnp.zeros((BACKBONE_OUT,), jnp.float32),
        "fc_w1": nrm((BACKBONE_OUT, FC_HIDDEN)),          # Linear(1000, 512)
        "fc_b1": jnp.zeros((FC_HIDDEN,), jnp.float32),
        "bn_gamma": jnp.ones((FC_HIDDEN,), jnp.float32),
        "bn_beta": jnp.zeros((FC_HIDDEN,), jnp.float32),
        "bn_mean": jnp.zeros((FC_HIDDEN,), jnp.float32),
        "bn_var": jnp.ones((FC_HIDDEN,), jnp.float32),
        "fc_w2": nrm((FC_HIDDEN, NUM_CLASSES)),           # Linear(512, num_classes)
        "fc_b2": jnp.zeros((NUM_CLASSES,), jnp.float32),
    }
    layers = []
    for _ in range(NUM_LAYERS):
        layers.append({
            "ln1_g": jnp.ones((HIDDEN,), jnp.float32),
            "ln1_b": jnp.zeros((HIDDEN,), jnp.float32),
            "w_qkv": nrm((HIDDEN, 3 * HIDDEN)),           # MHA in_proj (x @ W layout)
            "b_qkv": jnp.zeros((3 * HIDDEN,), jnp.float32),
            "w_out": nrm((HIDDEN, HIDDEN)),               # MHA out_proj
            "b_out": jnp.zeros((HIDDEN,), jnp.float32),
            "ln2_g": jnp.ones((HIDDEN,), jnp.float32),
            "ln2_b": jnp.zeros((HIDDEN,), jnp.float32),
            "w_mlp1": nrm((HIDDEN, MLP_DIM)),
            "b_mlp1": jnp.zeros((MLP_DIM,), jnp.float32),
            "w_mlp2": nrm((MLP_DIM, HIDDEN)),
            "b_mlp2": jnp.zeros((HIDDEN,), jnp.float32),
        })
    p["layers"] = layers
    return p


def vit_backbone_forward(x, p):
    B = x.shape[0]
    args, in_specs = _prep_inputs_and_specs(x, p)
    out = pl.pallas_call(
        _vit_forward_kernel,
        out_shape=jax.ShapeDtypeStruct((B, 1, NUM_CLASSES), jnp.float32),
        grid=(B,),
        in_specs=in_specs,
        out_specs=pl.BlockSpec((None, 1, NUM_CLASSES), lambda b: (b, 0, 0)),
        compiler_params=pltpu.CompilerParams(
            dimension_semantics=("parallel",)),            # both TCs on v7x
    )(*args)
    return out.reshape(B, NUM_CLASSES)


if __name__ == "__main__":
    key = jax.random.PRNGKey(0)
    pkey, xkey = jax.random.split(key)
    params = init_params(pkey)
    x = jax.random.normal(xkey, (2, IN_CH, IMG, IMG), dtype=jnp.float32)

    out = jax.jit(vit_backbone_forward)(x, params)
    out = jax.block_until_ready(out)
    assert out.shape == (2, NUM_CLASSES)
    assert bool(jnp.all(jnp.isfinite(out)))
    print("KERNEL_OK")
</pallas_src>

<mosaic_0001>
module attributes {stable_mosaic.version = 11 : i64} {
  func.func @_vit_forward_kernel(%arg0: i32, %arg1: memref<1x4x768xf32, #tpu.memory_space<vmem>>, %arg2: memref<768x64xbf16, #tpu.memory_space<vmem>>, %arg3: memref<1x64xf32, #tpu.memory_space<vmem>>, %arg4: memref<1x64xf32, #tpu.memory_space<vmem>>, %arg5: memref<5x64xf32, #tpu.memory_space<vmem>>, %arg6: memref<2x1x64xf32, #tpu.memory_space<vmem>>, %arg7: memref<2x1x64xf32, #tpu.memory_space<vmem>>, %arg8: memref<2x4x64x16xbf16, #tpu.memory_space<vmem>>, %arg9: memref<2x4x64x16xbf16, #tpu.memory_space<vmem>>, %arg10: memref<2x4x64x16xbf16, #tpu.memory_space<vmem>>, %arg11: memref<2x4x1x16xf32, #tpu.memory_space<vmem>>, %arg12: memref<2x4x1x16xf32, #tpu.memory_space<vmem>>, %arg13: memref<2x4x1x16xf32, #tpu.memory_space<vmem>>, %arg14: memref<2x4x16x64xbf16, #tpu.memory_space<vmem>>, %arg15: memref<2x1x64xf32, #tpu.memory_space<vmem>>, %arg16: memref<2x1x64xf32, #tpu.memory_space<vmem>>, %arg17: memref<2x1x64xf32, #tpu.memory_space<vmem>>, %arg18: memref<2x64x128xbf16, #tpu.memory_space<vmem>>, %arg19: memref<2x1x128xf32, #tpu.memory_space<vmem>>, %arg20: memref<2x128x64xbf16, #tpu.memory_space<vmem>>, %arg21: memref<2x1x64xf32, #tpu.memory_space<vmem>>, %arg22: memref<1x64xf32, #tpu.memory_space<vmem>>, %arg23: memref<1x64xf32, #tpu.memory_space<vmem>>, %arg24: memref<64x1024xbf16, #tpu.memory_space<vmem>>, %arg25: memref<1x1024xf32, #tpu.memory_space<vmem>>, %arg26: memref<1024x512xbf16, #tpu.memory_space<vmem>>, %arg27: memref<1x512xf32, #tpu.memory_space<vmem>>, %arg28: memref<1x512xf32, #tpu.memory_space<vmem>>, %arg29: memref<1x512xf32, #tpu.memory_space<vmem>>, %arg30: memref<512x10xbf16, #tpu.memory_space<vmem>>, %arg31: memref<1x10xf32, #tpu.memory_space<vmem>>, %arg32: memref<1x1x10xf32, #tpu.memory_space<vmem>>) attributes {dimension_semantics = [#tpu.dimension_semantics<parallel>], iteration_bounds = array<i64: 2>, scalar_prefetch = 0 : i64, scratch_operands = 0 : i64, tpu.core_type = #tpu.core_type<tc>, window_params = [{transform_indices = @transform_0, window_bounds = array<i64: 1, 4, 768>}, {pipeline_mode = #tpu.pipeline_mode<synchronous>, transform_indices = @transform_1, window_bounds = array<i64: 768, 64>}, {pipeline_mode = #tpu.pipeline_mode<synchronous>, transform_indices = @transform_2, window_bounds = array<i64: 1, 64>}, {pipeline_mode = #tpu.pipeline_mode<synchronous>, transform_indices = @transform_3, window_bounds = array<i64: 1, 64>}, {pipeline_mode = #tpu.pipeline_mode<synchronous>, transform_indices = @transform_4, window_bounds = array<i64: 5, 64>}, {pipeline_mode = #tpu.pipeline_mode<synchronous>, transform_indices = @transform_5, window_bounds = array<i64: 2, 1, 64>}, {pipeline_mode = #tpu.pipeline_mode<synchronous>, transform_indices = @transform_6, window_bounds = array<i64: 2, 1, 64>}, {pipeline_mode = #tpu.pipeline_mode<synchronous>, transform_indices = @transform_7, window_bounds = array<i64: 2, 4, 64, 16>}, {pipeline_mode = #tpu.pipeline_mode<synchronous>, transform_indices = @transform_8, window_bounds = array<i64: 2, 4, 64, 16>}, {pipeline_mode = #tpu.pipeline_mode<synchronous>, transform_indices = @transform_9, window_bounds = array<i64: 2, 4, 64, 16>}, {pipeline_mode = #tpu.pipeline_mode<synchronous>, transform_indices = @transform_10, window_bounds = array<i64: 2, 4, 1, 16>}, {pipeline_mode = #tpu.pipeline_mode<synchronous>, transform_indices = @transform_11, window_bounds = array<i64: 2, 4, 1, 16>}, {pipeline_mode = #tpu.pipeline_mode<synchronous>, transform_indices = @transform_12, window_bounds = array<i64: 2, 4, 1, 16>}, {pipeline_mode = #tpu.pipeline_mode<synchronous>, transform_indices = @transform_13, window_bounds = array<i64: 2, 4, 16, 64>}, {pipeline_mode = #tpu.pipeline_mode<synchronous>, transform_indices = @transform_14, window_bounds = array<i64: 2, 1, 64>}, {pipeline_mode = #tpu.pipeline_mode<synchronous>, transform_indices = @transform_15, window_bounds = array<i64: 2, 1, 64>}, {pipeline_mode = #tpu.pipeline_mode<synchronous>, transform_indices = @transform_16, window_bounds = array<i64: 2, 1, 64>}, {pipeline_mode = #tpu.pipeline_mode<synchronous>, transform_indices = @transform_17, window_bounds = array<i64: 2, 64, 128>}, {pipeline_mode = #tpu.pipeline_mode<synchronous>, transform_indices = @transform_18, window_bounds = array<i64: 2, 1, 128>}, {pipeline_mode = #tpu.pipeline_mode<synchronous>, transform_indices = @transform_19, window_bounds = array<i64: 2, 128, 64>}, {pipeline_mode = #tpu.pipeline_mode<synchronous>, transform_indices = @transform_20, window_bounds = array<i64: 2, 1, 64>}, {pipeline_mode = #tpu.pipeline_mode<synchronous>, transform_indices = @transform_21, window_bounds = array<i64: 1, 64>}, {pipeline_mode = #tpu.pipeline_mode<synchronous>, transform_indices = @transform_22, window_bounds = array<i64: 1, 64>}, {pipeline_mode = #tpu.pipeline_mode<synchronous>, transform_indices = @transform_23, window_bounds = array<i64: 64, 1024>}, {pipeline_mode = #tpu.pipeline_mode<synchronous>, transform_indices = @transform_24, window_bounds = array<i64: 1, 1024>}, {pipeline_mode = #tpu.pipeline_mode<synchronous>, transform_indices = @transform_25, window_bounds = array<i64: 1024, 512>}, {pipeline_mode = #tpu.pipeline_mode<synchronous>, transform_indices = @transform_26, window_bounds = array<i64: 1, 512>}, {pipeline_mode = #tpu.pipeline_mode<synchronous>, transform_indices = @transform_27, window_bounds = array<i64: 1, 512>}, {pipeline_mode = #tpu.pipeline_mode<synchronous>, transform_indices = @transform_28, window_bounds = array<i64: 1, 512>}, {pipeline_mode = #tpu.pipeline_mode<synchronous>, transform_indices = @transform_29, window_bounds = array<i64: 512, 10>}, {pipeline_mode = #tpu.pipeline_mode<synchronous>, transform_indices = @transform_30, window_bounds = array<i64: 1, 10>}, {transform_indices = @transform_31, window_bounds = array<i64: 1, 1, 10>}]} {
    %c0 = arith.constant 0 : index
    %c0_0 = arith.constant 0 : index
    %c0_1 = arith.constant 0 : index
    %0 = vector.load %arg1[%c0, %c0_0, %c0_1] : memref<1x4x768xf32, #tpu.memory_space<vmem>>, vector<1x4x768xf32>
    %1 = vector.shape_cast %0 : vector<1x4x768xf32> to vector<4x768xf32>
    %2 = arith.truncf %1 : vector<4x768xf32> to vector<4x768xbf16>
    %c0_2 = arith.constant 0 : index
    %c0_3 = arith.constant 0 : index
    %3 = vector.load %arg2[%c0_2, %c0_3] : memref<768x64xbf16, #tpu.memory_space<vmem>>, vector<768x64xbf16>
    %cst = arith.constant dense<0.000000e+00> : vector<4x64xf32>
    %4 = tpu.matmul %2, %3, %cst {dimension_numbers = #tpu.dot_dimension_numbers<[1], [0], [0], [1], [0, 0, 1, 1], [], []>} : vector<4x768xbf16>, vector<768x64xbf16>, vector<4x64xf32> -> vector<4x64xf32>
    %c0_4 = arith.constant 0 : index
    %c0_5 = arith.constant 0 : index
    %5 = vector.load %arg3[%c0_4, %c0_5] : memref<1x64xf32, #tpu.memory_space<vmem>>, vector<1x64xf32>
    %6 = vector.broadcast %5 : vector<1x64xf32> to vector<4x64xf32>
    %7 = arith.addf %4, %6 : vector<4x64xf32>
    %c0_6 = arith.constant 0 : index
    %c0_7 = arith.constant 0 : index
    %8 = vector.load %arg4[%c0_6, %c0_7] : memref<1x64xf32, #tpu.memory_space<vmem>>, vector<1x64xf32>
    %9 = tpu.concatenate %8, %7 in 0 : vector<1x64xf32>, vector<4x64xf32> -> vector<5x64xf32>
    %c0_8 = arith.constant 0 : index
    %c0_9 = arith.constant 0 : index
    %10 = vector.load %arg5[%c0_8, %c0_9] : memref<5x64xf32, #tpu.memory_space<vmem>>, vector<5x64xf32>
    %11 = arith.addf %9, %10 : vector<5x64xf32>
    %c0_10 = arith.constant 0 : index
    %c0_11 = arith.constant 0 : index
    %c0_12 = arith.constant 0 : index
    %12 = vector.load %arg6[%c0_10, %c0_11, %c0_12] : memref<2x1x64xf32, #tpu.memory_space<vmem>>, vector<1x1x64xf32>
    %13 = vector.shape_cast %12 : vector<1x1x64xf32> to vector<1x64xf32>
    %c0_13 = arith.constant 0 : index
    %c0_14 = arith.constant 0 : index
    %c0_15 = arith.constant 0 : index
    %14 = vector.load %arg7[%c0_13, %c0_14, %c0_15] : memref<2x1x64xf32, #tpu.memory_space<vmem>>, vector<1x1x64xf32>
    %15 = vector.shape_cast %14 : vector<1x1x64xf32> to vector<1x64xf32>
    %cst_16 = arith.constant dense<0.000000e+00> : vector<5xf32>
    %16 = vector.multi_reduction <add>, %11, %cst_16 [1] : vector<5x64xf32> to vector<5xf32>
    %17 = vector.shape_cast %16 : vector<5xf32> to vector<5x1xf32>
    %cst_17 = arith.constant 6.400000e+01 : f32
    %18 = vector.broadcast %cst_17 : f32 to vector<5x1xf32>
    %19 = arith.divf %17, %18 : vector<5x1xf32>
    %20 = vector.broadcast %19 : vector<5x1xf32> to vector<5x64xf32>
    %21 = arith.subf %11, %20 : vector<5x64xf32>
    %22 = arith.mulf %21, %21 : vector<5x64xf32>
    %cst_18 = arith.constant dense<0.000000e+00> : vector<5xf32>
    %23 = vector.multi_reduction <add>, %22, %cst_18 [1] : vector<5x64xf32> to vector<5xf32>
    %24 = vector.shape_cast %23 : vector<5xf32> to vector<5x1xf32>
    %cst_19 = arith.constant 6.400000e+01 : f32
    %25 = vector.broadcast %cst_19 : f32 to vector<5x1xf32>
    %26 = arith.divf %24, %25 : vector<5x1xf32>
    %cst_20 = arith.constant 9.99999997E-7 : f32
    %27 = vector.broadcast %cst_20 : f32 to vector<5x1xf32>
    %28 = arith.addf %26, %27 : vector<5x1xf32>
    %29 = math.rsqrt %28 : vector<5x1xf32>
    %30 = vector.broadcast %29 : vector<5x1xf32> to vector<5x64xf32>
    %31 = arith.mulf %21, %30 : vector<5x64xf32>
    %32 = vector.broadcast %13 : vector<1x64xf32> to vector<5x64xf32>
    %33 = arith.mulf %31, %32 : vector<5x64xf32>
    %34 = vector.broadcast %15 : vector<1x64xf32> to vector<5x64xf32>
    %35 = arith.addf %33, %34 : vector<5x64xf32>
    %36 = arith.truncf %35 : vector<5x64xf32> to vector<5x64xbf16>
    %cst_21 = arith.constant 0.000000e+00 : f32
    %37 = vector.broadcast %cst_21 : f32 to vector<5x64xf32>
    %c0_22 = arith.constant 0 : index
    %c0_23 = arith.constant 0 : index
    %c0_24 = arith.constant 0 : index
    %c0_25 = arith.constant 0 : index
    %38 = vector.load %arg8[%c0_22, %c0_23, %c0_24, %c0_25] : memref<2x4x64x16xbf16, #tpu.memory_space<vmem>>, vector<1x1x64x16xbf16>
    %39 = vector.shape_cast %38 : vector<1x1x64x16xbf16> to vector<64x16xbf16>
    %cst_26 = arith.constant dense<0.000000e+00> : vector<5x16xf32>
    %40 = tpu.matmul %36, %39, %cst_26 {dimension_numbers = #tpu.dot_dimension_numbers<[1], [0], [0], [1], [0, 0, 1, 1], [], []>} : vector<5x64xbf16>, vector<64x16xbf16>, vector<5x16xf32> -> vector<5x16xf32>
    %c0_27 = arith.constant 0 : index
    %c0_28 = arith.constant 0 : index
    %c0_29 = arith.constant 0 : index
    %c0_30 = arith.constant 0 : index
    %41 = vector.load %arg11[%c0_27, %c0_28, %c0_29, %c0_30] : memref<2x4x1x16xf32, #tpu.memory_space<vmem>>, vector<1x1x1x16xf32>
    %42 = vector.shape_cast %41 : vector<1x1x1x16xf32> to vector<1x16xf32>
    %43 = vector.broadcast %42 : vector<1x16xf32> to vector<5x16xf32>
    %44 = arith.addf %40, %43 : vector<5x16xf32>
    %c0_31 = arith.constant 0 : index
    %c0_32 = arith.constant 0 : index
    %c0_33 = arith.constant 0 : index
    %c0_34 = arith.constant 0 : index
    %45 = vector.load %arg9[%c0_31, %c0_32, %c0_33, %c0_34] : memref<2x4x64x16xbf16, #tpu.memory_space<vmem>>, vector<1x1x64x16xbf16>
    %46 = vector.shape_cast %45 : vector<1x1x64x16xbf16> to vector<64x16xbf16>
    %cst_35 = arith.constant dense<0.000000e+00> : vector<5x16xf32>
    %47 = tpu.matmul %36, %46, %cst_35 {dimension_numbers = #tpu.dot_dimension_numbers<[1], [0], [0], [1], [0, 0, 1, 1], [], []>} : vector<5x64xbf16>, vector<64x16xbf16>, vector<5x16xf32> -> vector<5x16xf32>
    %c0_36 = arith.constant 0 : index
    %c0_37 = arith.constant 0 : index
    %c0_38 = arith.constant 0 : index
    %c0_39 = arith.constant 0 : index
    %48 = vector.load %arg12[%c0_36, %c0_37, %c0_38, %c0_39] : memref<2x4x1x16xf32, #tpu.memory_space<vmem>>, vector<1x1x1x16xf32>
    %49 = vector.shape_cast %48 : vector<1x1x1x16xf32> to vector<1x16xf32>
    %50 = vector.broadcast %49 : vector<1x16xf32> to vector<5x16xf32>
    %51 = arith.addf %47, %50 : vector<5x16xf32>
    %c0_40 = arith.constant 0 : index
    %c0_41 = arith.constant 0 : index
    %c0_42 = arith.constant 0 : index
    %c0_43 = arith.constant 0 : index
    %52 = vector.load %arg10[%c0_40, %c0_41, %c0_42, %c0_43] : memref<2x4x64x16xbf16, #tpu.memory_space<vmem>>, vector<1x1x64x16xbf16>
    %53 = vector.shape_cast %52 : vector<1x1x64x16xbf16> to vector<64x16xbf16>
    %cst_44 = arith.constant dense<0.000000e+00> : vector<5x16xf32>
    %54 = tpu.matmul %36, %53, %cst_44 {dimension_numbers = #tpu.dot_dimension_numbers<[1], [0], [0], [1], [0, 0, 1, 1], [], []>} : vector<5x64xbf16>, vector<64x16xbf16>, vector<5x16xf32> -> vector<5x16xf32>
    %c0_45 = arith.constant 0 : index
    %c0_46 = arith.constant 0 : index
    %c0_47 = arith.constant 0 : index
    %c0_48 = arith.constant 0 : index
    %55 = vector.load %arg13[%c0_45, %c0_46, %c0_47, %c0_48] : memref<2x4x1x16xf32, #tpu.memory_space<vmem>>, vector<1x1x1x16xf32>
    %56 = vector.shape_cast %55 : vector<1x1x1x16xf32> to vector<1x16xf32>
    %57 = vector.broadcast %56 : vector<1x16xf32> to vector<5x16xf32>
    %58 = arith.addf %54, %57 : vector<5x16xf32>
    %59 = arith.truncf %44 : vector<5x16xf32> to vector<5x16xbf16>
    %60 = arith.truncf %51 : vector<5x16xf32> to vector<5x16xbf16>
    %cst_49 = arith.constant dense<0.000000e+00> : vector<5x5xf32>
    %61 = tpu.matmul %59, %60, %cst_49 {dimension_numbers = #tpu.dot_dimension_numbers<[1], [1], [0], [0], [0, 0, 1, 0], [], []>} : vector<5x16xbf16>, vector<5x16xbf16>, vector<5x5xf32> -> vector<5x5xf32>
    %cst_50 = arith.constant 2.500000e-01 : f32
    %62 = vector.broadcast %cst_50 : f32 to vector<5x5xf32>
    %63 = arith.mulf %61, %62 : vector<5x5xf32>
    %cst_51 = arith.constant dense<0xFF800000> : vector<5xf32>
    %64 = vector.multi_reduction <maximumf>, %63, %cst_51 [1] : vector<5x5xf32> to vector<5xf32>
    %65 = vector.shape_cast %64 : vector<5xf32> to vector<5x1xf32>
    %66 = vector.broadcast %65 : vector<5x1xf32> to vector<5x5xf32>
    %67 = arith.subf %63, %66 : vector<5x5xf32>
    %68 = math.exp %67 : vector<5x5xf32>
    %cst_52 = arith.constant dense<0.000000e+00> : vector<5xf32>
    %69 = vector.multi_reduction <add>, %68, %cst_52 [1] : vector<5x5xf32> to vector<5xf32>
    %70 = vector.shape_cast %69 : vector<5xf32> to vector<5x1xf32>
    %71 = tpu.reciprocal %70 {approx = true} : vector<5x1xf32> -> vector<5x1xf32>
    %72 = vector.broadcast %71 : vector<5x1xf32> to vector<5x5xf32>
    %73 = arith.mulf %68, %72 : vector<5x5xf32>
    %74 = arith.truncf %73 : vector<5x5xf32> to vector<5x5xbf16>
    %75 = arith.truncf %58 : vector<5x16xf32> to vector<5x16xbf16>
    %cst_53 = arith.constant dense<0.000000e+00> : vector<5x16xf32>
    %76 = tpu.matmul %74, %75, %cst_53 {dimension_numbers = #tpu.dot_dimension_numbers<[1], [0], [0], [1], [0, 0, 1, 1], [], []>} : vector<5x5xbf16>, vector<5x16xbf16>, vector<5x16xf32> -> vector<5x16xf32>
    %77 = arith.truncf %76 : vector<5x16xf32> to vector<5x16xbf16>
    %c0_54 = arith.constant 0 : index
    %c0_55 = arith.constant 0 : index
    %c0_56 = arith.constant 0 : index
    %c0_57 = arith.constant 0 : index
    %78 = vector.load %arg14[%c0_54, %c0_55, %c0_56, %c0_57] : memref<2x4x16x64xbf16, #tpu.memory_space<vmem>>, vector<1x1x16x64xbf16>
    %79 = vector.shape_cast %78 : vector<1x1x16x64xbf16> to vector<16x64xbf16>
    %cst_58 = arith.constant dense<0.000000e+00> : vector<5x64xf32>
    %80 = tpu.matmul %77, %79, %cst_58 {dimension_numbers = #tpu.dot_dimension_numbers<[1], [0], [0], [1], [0, 0, 1, 1], [], []>} : vector<5x16xbf16>, vector<16x64xbf16>, vector<5x64xf32> -> vector<5x64xf32>
    %81 = arith.addf %37, %80 : vector<5x64xf32>
    %c0_59 = arith.constant 0 : index
    %c1 = arith.constant 1 : index
    %c0_60 = arith.constant 0 : index
    %c0_61 = arith.constant 0 : index
    %82 = vector.load %arg8[%c0_59, %c1, %c0_60, %c0_61] : memref<2x4x64x16xbf16, #tpu.memory_space<vmem>>, vector<1x1x64x16xbf16>
    %83 = vector.shape_cast %82 : vector<1x1x64x16xbf16> to vector<64x16xbf16>
    %cst_62 = arith.constant dense<0.000000e+00> : vector<5x16xf32>
    %84 = tpu.matmul %36, %83, %cst_62 {dimension_numbers = #tpu.dot_dimension_numbers<[1], [0], [0], [1], [0, 0, 1, 1], [], []>} : vector<5x64xbf16>, vector<64x16xbf16>, vector<5x16xf32> -> vector<5x16xf32>
    %c0_63 = arith.constant 0 : index
    %c1_64 = arith.constant 1 : index
    %c0_65 = arith.constant 0 : index
    %c0_66 = arith.constant 0 : index
    %85 = vector.load %arg11[%c0_63, %c1_64, %c0_65, %c0_66] : memref<2x4x1x16xf32, #tpu.memory_space<vmem>>, vector<1x1x1x16xf32>
    %86 = vector.shape_cast %85 : vector<1x1x1x16xf32> to vector<1x16xf32>
    %87 = vector.broadcast %86 : vector<1x16xf32> to vector<5x16xf32>
    %88 = arith.addf %84, %87 : vector<5x16xf32>
    %c0_67 = arith.constant 0 : index
    %c1_68 = arith.constant 1 : index
    %c0_69 = arith.constant 0 : index
    %c0_70 = arith.constant 0 : index
    %89 = vector.load %arg9[%c0_67, %c1_68, %c0_69, %c0_70] : memref<2x4x64x16xbf16, #tpu.memory_space<vmem>>, vector<1x1x64x16xbf16>
    %90 = vector.shape_cast %89 : vector<1x1x64x16xbf16> to vector<64x16xbf16>
    %cst_71 = arith.constant dense<0.000000e+00> : vector<5x16xf32>
    %91 = tpu.matmul %36, %90, %cst_71 {dimension_numbers = #tpu.dot_dimension_numbers<[1], [0], [0], [1], [0, 0, 1, 1], [], []>} : vector<5x64xbf16>, vector<64x16xbf16>, vector<5x16xf32> -> vector<5x16xf32>
    %c0_72 = arith.constant 0 : index
    %c1_73 = arith.constant 1 : index
    %c0_74 = arith.constant 0 : index
    %c0_75 = arith.constant 0 : index
    %92 = vector.load %arg12[%c0_72, %c1_73, %c0_74, %c0_75] : memref<2x4x1x16xf32, #tpu.memory_space<vmem>>, vector<1x1x1x16xf32>
    %93 = vector.shape_cast %92 : vector<1x1x1x16xf32> to vector<1x16xf32>
    %94 = vector.broadcast %93 : vector<1x16xf32> to vector<5x16xf32>
    %95 = arith.addf %91, %94 : vector<5x16xf32>
    %c0_76 = arith.constant 0 : index
    %c1_77 = arith.constant 1 : index
    %c0_78 = arith.constant 0 : index
    %c0_79 = arith.constant 0 : index
    %96 = vector.load %arg10[%c0_76, %c1_77, %c0_78, %c0_79] : memref<2x4x64x16xbf16, #tpu.memory_space<vmem>>, vector<1x1x64x16xbf16>
    %97 = vector.shape_cast %96 : vector<1x1x64x16xbf16> to vector<64x16xbf16>
    %cst_80 = arith.constant dense<0.000000e+00> : vector<5x16xf32>
    %98 = tpu.matmul %36, %97, %cst_80 {dimension_numbers = #tpu.dot_dimension_numbers<[1], [0], [0], [1], [0, 0, 1, 1], [], []>} : vector<5x64xbf16>, vector<64x16xbf16>, vector<5x16xf32> -> vector<5x16xf32>
    %c0_81 = arith.constant 0 : index
    %c1_82 = arith.constant 1 : index
    %c0_83 = arith.constant 0 : index
    %c0_84 = arith.constant 0 : index
    %99 = vector.load %arg13[%c0_81, %c1_82, %c0_83, %c0_84] : memref<2x4x1x16xf32, #tpu.memory_space<vmem>>, vector<1x1x1x16xf32>
    %100 = vector.shape_cast %99 : vector<1x1x1x16xf32> to vector<1x16xf32>
    %101 = vector.broadcast %100 : vector<1x16xf32> to vector<5x16xf32>
    %102 = arith.addf %98, %101 : vector<5x16xf32>
    %103 = arith.truncf %88 : vector<5x16xf32> to vector<5x16xbf16>
    %104 = arith.truncf %95 : vector<5x16xf32> to vector<5x16xbf16>
    %cst_85 = arith.constant dense<0.000000e+00> : vector<5x5xf32>
    %105 = tpu.matmul %103, %104, %cst_85 {dimension_numbers = #tpu.dot_dimension_numbers<[1], [1], [0], [0], [0, 0, 1, 0], [], []>} : vector<5x16xbf16>, vector<5x16xbf16>, vector<5x5xf32> -> vector<5x5xf32>
    %cst_86 = arith.constant 2.500000e-01 : f32
    %106 = vector.broadcast %cst_86 : f32 to vector<5x5xf32>
    %107 = arith.mulf %105, %106 : vector<5x5xf32>
    %cst_87 = arith.constant dense<0xFF800000> : vector<5xf32>
    %108 = vector.multi_reduction <maximumf>, %107, %cst_87 [1] : vector<5x5xf32> to vector<5xf32>
    %109 = vector.shape_cast %108 : vector<5xf32> to vector<5x1xf32>
    %110 = vector.broadcast %109 : vector<5x1xf32> to vector<5x5xf32>
    %111 = arith.subf %107, %110 : vector<5x5xf32>
    %112 = math.exp %111 : vector<5x5xf32>
    %cst_88 = arith.constant dense<0.000000e+00> : vector<5xf32>
    %113 = vector.multi_reduction <add>, %112, %cst_88 [1] : vector<5x5xf32> to vector<5xf32>
    %114 = vector.shape_cast %113 : vector<5xf32> to vector<5x1xf32>
    %115 = tpu.reciprocal %114 {approx = true} : vector<5x1xf32> -> vector<5x1xf32>
    %116 = vector.broadcast %115 : vector<5x1xf32> to vector<5x5xf32>
    %117 = arith.mulf %112, %116 : vector<5x5xf32>
    %118 = arith.truncf %117 : vector<5x5xf32> to vector<5x5xbf16>
    %119 = arith.truncf %102 : vector<5x16xf32> to vector<5x16xbf16>
    %cst_89 = arith.constant dense<0.000000e+00> : vector<5x16xf32>
    %120 = tpu.matmul %118, %119, %cst_89 {dimension_numbers = #tpu.dot_dimension_numbers<[1], [0], [0], [1], [0, 0, 1, 1], [], []>} : vector<5x5xbf16>, vector<5x16xbf16>, vector<5x16xf32> -> vector<5x16xf32>
    %121 = arith.truncf %120 : vector<5x16xf32> to vector<5x16xbf16>
    %c0_90 = arith.constant 0 : index
    %c1_91 = arith.constant 1 : index
    %c0_92 = arith.constant 0 : index
    %c0_93 = arith.constant 0 : index
    %122 = vector.load %arg14[%c0_90, %c1_91, %c0_92, %c0_93] : memref<2x4x16x64xbf16, #tpu.memory_space<vmem>>, vector<1x1x16x64xbf16>
    %123 = vector.shape_cast %122 : vector<1x1x16x64xbf16> to vector<16x64xbf16>
    %cst_94 = arith.constant dense<0.000000e+00> : vector<5x64xf32>
    %124 = tpu.matmul %121, %123, %cst_94 {dimension_numbers = #tpu.dot_dimension_numbers<[1], [0], [0], [1], [0, 0, 1, 1], [], []>} : vector<5x16xbf16>, vector<16x64xbf16>, vector<5x64xf32> -> vector<5x64xf32>
    %125 = arith.addf %81, %124 : vector<5x64xf32>
    %c0_95 = arith.constant 0 : index
    %c2 = arith.constant 2 : index
    %c0_96 = arith.constant 0 : index
    %c0_97 = arith.constant 0 : index
    %126 = vector.load %arg8[%c0_95, %c2, %c0_96, %c0_97] : memref<2x4x64x16xbf16, #tpu.memory_space<vmem>>, vector<1x1x64x16xbf16>
    %127 = vector.shape_cast %126 : vector<1x1x64x16xbf16> to vector<64x16xbf16>
    %cst_98 = arith.constant dense<0.000000e+00> : vector<5x16xf32>
    %128 = tpu.matmul %36, %127, %cst_98 {dimension_numbers = #tpu.dot_dimension_numbers<[1], [0], [0], [1], [0, 0, 1, 1], [], []>} : vector<5x64xbf16>, vector<64x16xbf16>, vector<5x16xf32> -> vector<5x16xf32>
    %c0_99 = arith.constant 0 : index
    %c2_100 = arith.constant 2 : index
    %c0_101 = arith.constant 0 : index
    %c0_102 = arith.constant 0 : index
    %129 = vector.load %arg11[%c0_99, %c2_100, %c0_101, %c0_102] : memref<2x4x1x16xf32, #tpu.memory_space<vmem>>, vector<1x1x1x16xf32>
    %130 = vector.shape_cast %129 : vector<1x1x1x16xf32> to vector<1x16xf32>
    %131 = vector.broadcast %130 : vector<1x16xf32> to vector<5x16xf32>
    %132 = arith.addf %128, %131 : vector<5x16xf32>
    %c0_103 = arith.constant 0 : index
    %c2_104 = arith.constant 2 : index
    %c0_105 = arith.constant 0 : index
    %c0_106 = arith.constant 0 : index
    %133 = vector.load %arg9[%c0_103, %c2_104, %c0_105, %c0_106] : memref<2x4x64x16xbf16, #tpu.memory_space<vmem>>, vector<1x1x64x16xbf16>
    %134 = vector.shape_cast %133 : vector<1x1x64x16xbf16> to vector<64x16xbf16>
    %cst_107 = arith.constant dense<0.000000e+00> : vector<5x16xf32>
    %135 = tpu.matmul %36, %134, %cst_107 {dimension_numbers = #tpu.dot_dimension_numbers<[1], [0], [0], [1], [0, 0, 1, 1], [], []>} : vector<5x64xbf16>, vector<64x16xbf16>, vector<5x16xf32> -> vector<5x16xf32>
    %c0_108 = arith.constant 0 : index
    %c2_109 = arith.constant 2 : index
    %c0_110 = arith.constant 0 : index
    %c0_111 = arith.constant 0 : index
    %136 = vector.load %arg12[%c0_108, %c2_109, %c0_110, %c0_111] : memref<2x4x1x16xf32, #tpu.memory_space<vmem>>, vector<1x1x1x16xf32>
    %137 = vector.shape_cast %136 : vector<1x1x1x16xf32> to vector<1x16xf32>
    %138 = vector.broadcast %137 : vector<1x16xf32> to vector<5x16xf32>
    %139 = arith.addf %135, %138 : vector<5x16xf32>
    %c0_112 = arith.constant 0 : index
    %c2_113 = arith.constant 2 : index
    %c0_114 = arith.constant 0 : index
    %c0_115 = arith.constant 0 : index
    %140 = vector.load %arg10[%c0_112, %c2_113, %c0_114, %c0_115] : memref<2x4x64x16xbf16, #tpu.memory_space<vmem>>, vector<1x1x64x16xbf16>
    %141 = vector.shape_cast %140 : vector<1x1x64x16xbf16> to vector<64x16xbf16>
    %cst_116 = arith.constant dense<0.000000e+00> : vector<5x16xf32>
    %142 = tpu.matmul %36, %141, %cst_116 {dimension_numbers = #tpu.dot_dimension_numbers<[1], [0], [0], [1], [0, 0, 1, 1], [], []>} : vector<5x64xbf16>, vector<64x16xbf16>, vector<5x16xf32> -> vector<5x16xf32>
    %c0_117 = arith.constant 0 : index
    %c2_118 = arith.constant 2 : index
    %c0_119 = arith.constant 0 : index
    %c0_120 = arith.constant 0 : index
    %143 = vector.load %arg13[%c0_117, %c2_118, %c0_119, %c0_120] : memref<2x4x1x16xf32, #tpu.memory_space<vmem>>, vector<1x1x1x16xf32>
    %144 = vector.shape_cast %143 : vector<1x1x1x16xf32> to vector<1x16xf32>
    %145 = vector.broadcast %144 : vector<1x16xf32> to vector<5x16xf32>
    %146 = arith.addf %142, %145 : vector<5x16xf32>
    %147 = arith.truncf %132 : vector<5x16xf32> to vector<5x16xbf16>
    %148 = arith.truncf %139 : vector<5x16xf32> to vector<5x16xbf16>
    %cst_121 = arith.constant dense<0.000000e+00> : vector<5x5xf32>
    %149 = tpu.matmul %147, %148, %cst_121 {dimension_numbers = #tpu.dot_dimension_numbers<[1], [1], [0], [0], [0, 0, 1, 0], [], []>} : vector<5x16xbf16>, vector<5x16xbf16>, vector<5x5xf32> -> vector<5x5xf32>
    %cst_122 = arith.constant 2.500000e-01 : f32
    %150 = vector.broadcast %cst_122 : f32 to vector<5x5xf32>
    %151 = arith.mulf %149, %150 : vector<5x5xf32>
    %cst_123 = arith.constant dense<0xFF800000> : vector<5xf32>
    %152 = vector.multi_reduction <maximumf>, %151, %cst_123 [1] : vector<5x5xf32> to vector<5xf32>
    %153 = vector.shape_cast %152 : vector<5xf32> to vector<5x1xf32>
    %154 = vector.broadcast %153 : vector<5x1xf32> to vector<5x5xf32>
    %155 = arith.subf %151, %154 : vector<5x5xf32>
    %156 = math.exp %155 : vector<5x5xf32>
    %cst_124 = arith.constant dense<0.000000e+00> : vector<5xf32>
    %157 = vector.multi_reduction <add>, %156, %cst_124 [1] : vector<5x5xf32> to vector<5xf32>
    %158 = vector.shape_cast %157 : vector<5xf32> to vector<5x1xf32>
    %159 = tpu.reciprocal %158 {approx = true} : vector<5x1xf32> -> vector<5x1xf32>
    %160 = vector.broadcast %159 : vector<5x1xf32> to vector<5x5xf32>
    %161 = arith.mulf %156, %160 : vector<5x5xf32>
    %162 = arith.truncf %161 : vector<5x5xf32> to vector<5x5xbf16>
    %163 = arith.truncf %146 : vector<5x16xf32> to vector<5x16xbf16>
    %cst_125 = arith.constant dense<0.000000e+00> : vector<5x16xf32>
    %164 = tpu.matmul %162, %163, %cst_125 {dimension_numbers = #tpu.dot_dimension_numbers<[1], [0], [0], [1], [0, 0, 1, 1], [], []>} : vector<5x5xbf16>, vector<5x16xbf16>, vector<5x16xf32> -> vector<5x16xf32>
    %165 = arith.truncf %164 : vector<5x16xf32> to vector<5x16xbf16>
    %c0_126 = arith.constant 0 : index
    %c2_127 = arith.constant 2 : index
    %c0_128 = arith.constant 0 : index
    %c0_129 = arith.constant 0 : index
    %166 = vector.load %arg14[%c0_126, %c2_127, %c0_128, %c0_129] : memref<2x4x16x64xbf16, #tpu.memory_space<vmem>>, vector<1x1x16x64xbf16>
    %167 = vector.shape_cast %166 : vector<1x1x16x64xbf16> to vector<16x64xbf16>
    %cst_130 = arith.constant dense<0.000000e+00> : vector<5x64xf32>
    %168 = tpu.matmul %165, %167, %cst_130 {dimension_numbers = #tpu.dot_dimension_numbers<[1], [0], [0], [1], [0, 0, 1, 1], [], []>} : vector<5x16xbf16>, vector<16x64xbf16>, vector<5x64xf32> -> vector<5x64xf32>
    %169 = arith.addf %125, %168 : vector<5x64xf32>
    %c0_131 = arith.constant 0 : index
    %c3 = arith.constant 3 : index
    %c0_132 = arith.constant 0 : index
    %c0_133 = arith.constant 0 : index
    %170 = vector.load %arg8[%c0_131, %c3, %c0_132, %c0_133] : memref<2x4x64x16xbf16, #tpu.memory_space<vmem>>, vector<1x1x64x16xbf16>
    %171 = vector.shape_cast %170 : vector<1x1x64x16xbf16> to vector<64x16xbf16>
    %cst_134 = arith.constant dense<0.000000e+00> : vector<5x16xf32>
    %172 = tpu.matmul %36, %171, %cst_134 {dimension_numbers = #tpu.dot_dimension_numbers<[1], [0], [0], [1], [0, 0, 1, 1], [], []>} : vector<5x64xbf16>, vector<64x16xbf16>, vector<5x16xf32> -> vector<5x16xf32>
    %c0_135 = arith.constant 0 : index
    %c3_136 = arith.constant 3 : index
    %c0_137 = arith.constant 0 : index
    %c0_138 = arith.constant 0 : index
    %173 = vector.load %arg11[%c0_135, %c3_136, %c0_137, %c0_138] : memref<2x4x1x16xf32, #tpu.memory_space<vmem>>, vector<1x1x1x16xf32>
    %174 = vector.shape_cast %173 : vector<1x1x1x16xf32> to vector<1x16xf32>
    %175 = vector.broadcast %174 : vector<1x16xf32> to vector<5x16xf32>
    %176 = arith.addf %172, %175 : vector<5x16xf32>
    %c0_139 = arith.constant 0 : index
    %c3_140 = arith.constant 3 : index
    %c0_141 = arith.constant 0 : index
    %c0_142 = arith.constant 0 : index
    %177 = vector.load %arg9[%c0_139, %c3_140, %c0_141, %c0_142] : memref<2x4x64x16xbf16, #tpu.memory_space<vmem>>, vector<1x1x64x16xbf16>
    %178 = vector.shape_cast %177 : vector<1x1x64x16xbf16> to vector<64x16xbf16>
    %cst_143 = arith.constant dense<0.000000e+00> : vector<5x16xf32>
    %179 = tpu.matmul %36, %178, %cst_143 {dimension_numbers = #tpu.dot_dimension_numbers<[1], [0], [0], [1], [0, 0, 1, 1], [], []>} : vector<5x64xbf16>, vector<64x16xbf16>, vector<5x16xf32> -> vector<5x16xf32>
    %c0_144 = arith.constant 0 : index
    %c3_145 = arith.constant 3 : index
    %c0_146 = arith.constant 0 : index
    %c0_147 = arith.constant 0 : index
    %180 = vector.load %arg12[%c0_144, %c3_145, %c0_146, %c0_147] : memref<2x4x1x16xf32, #tpu.memory_space<vmem>>, vector<1x1x1x16xf32>
    %181 = vector.shape_cast %180 : vector<1x1x1x16xf32> to vector<1x16xf32>
    %182 = vector.broadcast %181 : vector<1x16xf32> to vector<5x16xf32>
    %183 = arith.addf %179, %182 : vector<5x16xf32>
    %c0_148 = arith.constant 0 : index
    %c3_149 = arith.constant 3 : index
    %c0_150 = arith.constant 0 : index
    %c0_151 = arith.constant 0 : index
    %184 = vector.load %arg10[%c0_148, %c3_149, %c0_150, %c0_151] : memref<2x4x64x16xbf16, #tpu.memory_space<vmem>>, vector<1x1x64x16xbf16>
    %185 = vector.shape_cast %184 : vector<1x1x64x16xbf16> to vector<64x16xbf16>
    %cst_152 = arith.constant dense<0.000000e+00> : vector<5x16xf32>
    %186 = tpu.matmul %36, %185, %cst_152 {dimension_numbers = #tpu.dot_dimension_numbers<[1], [0], [0], [1], [0, 0, 1, 1], [], []>} : vector<5x64xbf16>, vector<64x16xbf16>, vector<5x16xf32> -> vector<5x16xf32>
    %c0_153 = arith.constant 0 : index
    %c3_154 = arith.constant 3 : index
    %c0_155 = arith.constant 0 : index
    %c0_156 = arith.constant 0 : index
    %187 = vector.load %arg13[%c0_153, %c3_154, %c0_155, %c0_156] : memref<2x4x1x16xf32, #tpu.memory_space<vmem>>, vector<1x1x1x16xf32>
    %188 = vector.shape_cast %187 : vector<1x1x1x16xf32> to vector<1x16xf32>
    %189 = vector.broadcast %188 : vector<1x16xf32> to vector<5x16xf32>
    %190 = arith.addf %186, %189 : vector<5x16xf32>
    %191 = arith.truncf %176 : vector<5x16xf32> to vector<5x16xbf16>
    %192 = arith.truncf %183 : vector<5x16xf32> to vector<5x16xbf16>
    %cst_157 = arith.constant dense<0.000000e+00> : vector<5x5xf32>
    %193 = tpu.matmul %191, %192, %cst_157 {dimension_numbers = #tpu.dot_dimension_numbers<[1], [1], [0], [0], [0, 0, 1, 0], [], []>} : vector<5x16xbf16>, vector<5x16xbf16>, vector<5x5xf32> -> vector<5x5xf32>
    %cst_158 = arith.constant 2.500000e-01 : f32
    %194 = vector.broadcast %cst_158 : f32 to vector<5x5xf32>
    %195 = arith.mulf %193, %194 : vector<5x5xf32>
    %cst_159 = arith.constant dense<0xFF800000> : vector<5xf32>
    %196 = vector.multi_reduction <maximumf>, %195, %cst_159 [1] : vector<5x5xf32> to vector<5xf32>
    %197 = vector.shape_cast %196 : vector<5xf32> to vector<5x1xf32>
    %198 = vector.broadcast %197 : vector<5x1xf32> to vector<5x5xf32>
    %199 = arith.subf %195, %198 : vector<5x5xf32>
    %200 = math.exp %199 : vector<5x5xf32>
    %cst_160 = arith.constant dense<0.000000e+00> : vector<5xf32>
    %201 = vector.multi_reduction <add>, %200, %cst_160 [1] : vector<5x5xf32> to vector<5xf32>
    %202 = vector.shape_cast %201 : vector<5xf32> to vector<5x1xf32>
    %203 = tpu.reciprocal %202 {approx = true} : vector<5x1xf32> -> vector<5x1xf32>
    %204 = vector.broadcast %203 : vector<5x1xf32> to vector<5x5xf32>
    %205 = arith.mulf %200, %204 : vector<5x5xf32>
    %206 = arith.truncf %205 : vector<5x5xf32> to vector<5x5xbf16>
    %207 = arith.truncf %190 : vector<5x16xf32> to vector<5x16xbf16>
    %cst_161 = arith.constant dense<0.000000e+00> : vector<5x16xf32>
    %208 = tpu.matmul %206, %207, %cst_161 {dimension_numbers = #tpu.dot_dimension_numbers<[1], [0], [0], [1], [0, 0, 1, 1], [], []>} : vector<5x5xbf16>, vector<5x16xbf16>, vector<5x16xf32> -> vector<5x16xf32>
    %209 = arith.truncf %208 : vector<5x16xf32> to vector<5x16xbf16>
    %c0_162 = arith.constant 0 : index
    %c3_163 = arith.constant 3 : index
    %c0_164 = arith.constant 0 : index
    %c0_165 = arith.constant 0 : index
    %210 = vector.load %arg14[%c0_162, %c3_163, %c0_164, %c0_165] : memref<2x4x16x64xbf16, #tpu.memory_space<vmem>>, vector<1x1x16x64xbf16>
    %211 = vector.shape_cast %210 : vector<1x1x16x64xbf16> to vector<16x64xbf16>
    %cst_166 = arith.constant dense<0.000000e+00> : vector<5x64xf32>
    %212 = tpu.matmul %209, %211, %cst_166 {dimension_numbers = #tpu.dot_dimension_numbers<[1], [0], [0], [1], [0, 0, 1, 1], [], []>} : vector<5x16xbf16>, vector<16x64xbf16>, vector<5x64xf32> -> vector<5x64xf32>
    %213 = arith.addf %169, %212 : vector<5x64xf32>
    %214 = arith.addf %11, %213 : vector<5x64xf32>
    %c0_167 = arith.constant 0 : index
    %c0_168 = arith.constant 0 : index
    %c0_169 = arith.constant 0 : index
    %215 = vector.load %arg15[%c0_167, %c0_168, %c0_169] : memref<2x1x64xf32, #tpu.memory_space<vmem>>, vector<1x1x64xf32>
    %216 = vector.shape_cast %215 : vector<1x1x64xf32> to vector<1x64xf32>
    %217 = vector.broadcast %216 : vector<1x64xf32> to vector<5x64xf32>
    %218 = arith.addf %214, %217 : vector<5x64xf32>
    %c0_170 = arith.constant 0 : index
    %c0_171 = arith.constant 0 : index
    %c0_172 = arith.constant 0 : index
    %219 = vector.load %arg16[%c0_170, %c0_171, %c0_172] : memref<2x1x64xf32, #tpu.memory_space<vmem>>, vector<1x1x64xf32>
    %220 = vector.shape_cast %219 : vector<1x1x64xf32> to vector<1x64xf32>
    %c0_173 = arith.constant 0 : index
    %c0_174 = arith.constant 0 : index
    %c0_175 = arith.constant 0 : index
    %221 = vector.load %arg17[%c0_173, %c0_174, %c0_175] : memref<2x1x64xf32, #tpu.memory_space<vmem>>, vector<1x1x64xf32>
    %222 = vector.shape_cast %221 : vector<1x1x64xf32> to vector<1x64xf32>
    %cst_176 = arith.constant dense<0.000000e+00> : vector<5xf32>
    %223 = vector.multi_reduction <add>, %218, %cst_176 [1] : vector<5x64xf32> to vector<5xf32>
    %224 = vector.shape_cast %223 : vector<5xf32> to vector<5x1xf32>
    %cst_177 = arith.constant 6.400000e+01 : f32
    %225 = vector.broadcast %cst_177 : f32 to vector<5x1xf32>
    %226 = arith.divf %224, %225 : vector<5x1xf32>
    %227 = vector.broadcast %226 : vector<5x1xf32> to vector<5x64xf32>
    %228 = arith.subf %218, %227 : vector<5x64xf32>
    %229 = arith.mulf %228, %228 : vector<5x64xf32>
    %cst_178 = arith.constant dense<0.000000e+00> : vector<5xf32>
    %230 = vector.multi_reduction <add>, %229, %cst_178 [1] : vector<5x64xf32> to vector<5xf32>
    %231 = vector.shape_cast %230 : vector<5xf32> to vector<5x1xf32>
    %cst_179 = arith.constant 6.400000e+01 : f32
    %232 = vector.broadcast %cst_179 : f32 to vector<5x1xf32>
    %233 = arith.divf %231, %232 : vector<5x1xf32>
    %cst_180 = arith.constant 9.99999997E-7 : f32
    %234 = vector.broadcast %cst_180 : f32 to vector<5x1xf32>
    %235 = arith.addf %233, %234 : vector<5x1xf32>
    %236 = math.rsqrt %235 : vector<5x1xf32>
    %237 = vector.broadcast %236 : vector<5x1xf32> to vector<5x64xf32>
    %238 = arith.mulf %228, %237 : vector<5x64xf32>
    %239 = vector.broadcast %220 : vector<1x64xf32> to vector<5x64xf32>
    %240 = arith.mulf %238, %239 : vector<5x64xf32>
    %241 = vector.broadcast %222 : vector<1x64xf32> to vector<5x64xf32>
    %242 = arith.addf %240, %241 : vector<5x64xf32>
    %243 = arith.truncf %242 : vector<5x64xf32> to vector<5x64xbf16>
    %c0_181 = arith.constant 0 : index
    %c0_182 = arith.constant 0 : index
    %c0_183 = arith.constant 0 : index
    %244 = vector.load %arg18[%c0_181, %c0_182, %c0_183] : memref<2x64x128xbf16, #tpu.memory_space<vmem>>, vector<1x64x128xbf16>
    %245 = vector.shape_cast %244 : vector<1x64x128xbf16> to vector<64x128xbf16>
    %cst_184 = arith.constant dense<0.000000e+00> : vector<5x128xf32>
    %246 = tpu.matmul %243, %245, %cst_184 {dimension_numbers = #tpu.dot_dimension_numbers<[1], [0], [0], [1], [0, 0, 1, 1], [], []>} : vector<5x64xbf16>, vector<64x128xbf16>, vector<5x128xf32> -> vector<5x128xf32>
    %c0_185 = arith.constant 0 : index
    %c0_186 = arith.constant 0 : index
    %c0_187 = arith.constant 0 : index
    %247 = vector.load %arg19[%c0_185, %c0_186, %c0_187] : memref<2x1x128xf32, #tpu.memory_space<vmem>>, vector<1x1x128xf32>
    %248 = vector.shape_cast %247 : vector<1x1x128xf32> to vector<1x128xf32>
    %249 = vector.broadcast %248 : vector<1x128xf32> to vector<5x128xf32>
    %250 = arith.addf %246, %249 : vector<5x128xf32>
    %cst_188 = arith.constant 5.000000e-01 : f32
    %251 = vector.broadcast %cst_188 : f32 to vector<5x128xf32>
    %252 = arith.mulf %251, %250 : vector<5x128xf32>
    %cst_189 = arith.constant 0.707106769 : f32
    %253 = vector.broadcast %cst_189 : f32 to vector<5x128xf32>
    %254 = arith.mulf %250, %253 : vector<5x128xf32>
    %cst_190 = arith.constant 0.000000e+00 : f32
    %255 = vector.broadcast %cst_190 : f32 to vector<5x128xf32>
    %256 = arith.cmpf oge, %254, %255 : vector<5x128xf32>
    %cst_191 = arith.constant 1.000000e+00 : f32
    %cst_192 = arith.constant -1.000000e+00 : f32
    %257 = vector.broadcast %cst_191 : f32 to vector<5x128xf32>
    %258 = vector.broadcast %cst_192 : f32 to vector<5x128xf32>
    %259 = arith.select %256, %257, %258 : vector<5x128xi1>, vector<5x128xf32>
    %260 = math.absf %254 : vector<5x128xf32>
    %cst_193 = arith.constant 0.327591091 : f32
    %261 = vector.broadcast %cst_193 : f32 to vector<5x128xf32>
    %262 = arith.mulf %261, %260 : vector<5x128xf32>
    %cst_194 = arith.constant 1.000000e+00 : f32
    %263 = vector.broadcast %cst_194 : f32 to vector<5x128xf32>
    %264 = arith.addf %263, %262 : vector<5x128xf32>
    %cst_195 = arith.constant 1.000000e+00 : f32
    %265 = vector.broadcast %cst_195 : f32 to vector<5x128xf32>
    %266 = arith.divf %265, %264 : vector<5x128xf32>
    %cst_196 = arith.constant 1.06140542 : f32
    %267 = vector.broadcast %cst_196 : f32 to vector<5x128xf32>
    %268 = arith.mulf %267, %266 : vector<5x128xf32>
    %cst_197 = arith.constant -1.45315206 : f32
    %269 = vector.broadcast %cst_197 : f32 to vector<5x128xf32>
    %270 = arith.addf %268, %269 : vector<5x128xf32>
    %271 = arith.mulf %270, %266 : vector<5x128xf32>
    %cst_198 = arith.constant 1.42141378 : f32
    %272 = vector.broadcast %cst_198 : f32 to vector<5x128xf32>
    %273 = arith.addf %271, %272 : vector<5x128xf32>
    %274 = arith.mulf %273, %266 : vector<5x128xf32>
    %cst_199 = arith.constant -0.284496725 : f32
    %275 = vector.broadcast %cst_199 : f32 to vector<5x128xf32>
    %276 = arith.addf %274, %275 : vector<5x128xf32>
    %277 = arith.mulf %276, %266 : vector<5x128xf32>
    %cst_200 = arith.constant 0.254829586 : f32
    %278 = vector.broadcast %cst_200 : f32 to vector<5x128xf32>
    %279 = arith.addf %277, %278 : vector<5x128xf32>
    %280 = arith.mulf %279, %266 : vector<5x128xf32>
    %cst_201 = arith.constant 0.000000e+00 : f32
    %281 = vector.broadcast %cst_201 : f32 to vector<5x128xf32>
    %282 = arith.subf %281, %260 : vector<5x128xf32>
    %283 = arith.mulf %282, %260 : vector<5x128xf32>
    %284 = math.exp %283 : vector<5x128xf32>
    %285 = arith.mulf %280, %284 : vector<5x128xf32>
    %cst_202 = arith.constant 1.000000e+00 : f32
    %286 = vector.broadcast %cst_202 : f32 to vector<5x128xf32>
    %287 = arith.subf %286, %285 : vector<5x128xf32>
    %288 = arith.mulf %259, %287 : vector<5x128xf32>
    %cst_203 = arith.constant 1.000000e+00 : f32
    %289 = vector.broadcast %cst_203 : f32 to vector<5x128xf32>
    %290 = arith.addf %289, %288 : vector<5x128xf32>
    %291 = arith.mulf %252, %290 : vector<5x128xf32>
    %292 = arith.truncf %291 : vector<5x128xf32> to vector<5x128xbf16>
    %c0_204 = arith.constant 0 : index
    %c0_205 = arith.constant 0 : index
    %c0_206 = arith.constant 0 : index
    %293 = vector.load %arg20[%c0_204, %c0_205, %c0_206] : memref<2x128x64xbf16, #tpu.memory_space<vmem>>, vector<1x128x64xbf16>
    %294 = vector.shape_cast %293 : vector<1x128x64xbf16> to vector<128x64xbf16>
    %cst_207 = arith.constant dense<0.000000e+00> : vector<5x64xf32>
    %295 = tpu.matmul %292, %294, %cst_207 {dimension_numbers = #tpu.dot_dimension_numbers<[1], [0], [0], [1], [0, 0, 1, 1], [], []>} : vector<5x128xbf16>, vector<128x64xbf16>, vector<5x64xf32> -> vector<5x64xf32>
    %c0_208 = arith.constant 0 : index
    %c0_209 = arith.constant 0 : index
    %c0_210 = arith.constant 0 : index
    %296 = vector.load %arg21[%c0_208, %c0_209, %c0_210] : memref<2x1x64xf32, #tpu.memory_space<vmem>>, vector<1x1x64xf32>
    %297 = vector.shape_cast %296 : vector<1x1x64xf32> to vector<1x64xf32>
    %298 = vector.broadcast %297 : vector<1x64xf32> to vector<5x64xf32>
    %299 = arith.addf %295, %298 : vector<5x64xf32>
    %300 = arith.addf %218, %299 : vector<5x64xf32>
    %c1_211 = arith.constant 1 : index
    %c0_212 = arith.constant 0 : index
    %c0_213 = arith.constant 0 : index
    %301 = vector.load %arg6[%c1_211, %c0_212, %c0_213] : memref<2x1x64xf32, #tpu.memory_space<vmem>>, vector<1x1x64xf32>
    %302 = vector.shape_cast %301 : vector<1x1x64xf32> to vector<1x64xf32>
    %c1_214 = arith.constant 1 : index
    %c0_215 = arith.constant 0 : index
    %c0_216 = arith.constant 0 : index
    %303 = vector.load %arg7[%c1_214, %c0_215, %c0_216] : memref<2x1x64xf32, #tpu.memory_space<vmem>>, vector<1x1x64xf32>
    %304 = vector.shape_cast %303 : vector<1x1x64xf32> to vector<1x64xf32>
    %cst_217 = arith.constant dense<0.000000e+00> : vector<5xf32>
    %305 = vector.multi_reduction <add>, %300, %cst_217 [1] : vector<5x64xf32> to vector<5xf32>
    %306 = vector.shape_cast %305 : vector<5xf32> to vector<5x1xf32>
    %cst_218 = arith.constant 6.400000e+01 : f32
    %307 = vector.broadcast %cst_218 : f32 to vector<5x1xf32>
    %308 = arith.divf %306, %307 : vector<5x1xf32>
    %309 = vector.broadcast %308 : vector<5x1xf32> to vector<5x64xf32>
    %310 = arith.subf %300, %309 : vector<5x64xf32>
    %311 = arith.mulf %310, %310 : vector<5x64xf32>
    %cst_219 = arith.constant dense<0.000000e+00> : vector<5xf32>
    %312 = vector.multi_reduction <add>, %311, %cst_219 [1] : vector<5x64xf32> to vector<5xf32>
    %313 = vector.shape_cast %312 : vector<5xf32> to vector<5x1xf32>
    %cst_220 = arith.constant 6.400000e+01 : f32
    %314 = vector.broadcast %cst_220 : f32 to vector<5x1xf32>
    %315 = arith.divf %313, %314 : vector<5x1xf32>
    %cst_221 = arith.constant 9.99999997E-7 : f32
    %316 = vector.broadcast %cst_221 : f32 to vector<5x1xf32>
    %317 = arith.addf %315, %316 : vector<5x1xf32>
    %318 = math.rsqrt %317 : vector<5x1xf32>
    %319 = vector.broadcast %318 : vector<5x1xf32> to vector<5x64xf32>
    %320 = arith.mulf %310, %319 : vector<5x64xf32>
    %321 = vector.broadcast %302 : vector<1x64xf32> to vector<5x64xf32>
    %322 = arith.mulf %320, %321 : vector<5x64xf32>
    %323 = vector.broadcast %304 : vector<1x64xf32> to vector<5x64xf32>
    %324 = arith.addf %322, %323 : vector<5x64xf32>
    %325 = arith.truncf %324 : vector<5x64xf32> to vector<5x64xbf16>
    %cst_222 = arith.constant 0.000000e+00 : f32
    %326 = vector.broadcast %cst_222 : f32 to vector<5x64xf32>
    %c1_223 = arith.constant 1 : index
    %c0_224 = arith.constant 0 : index
    %c0_225 = arith.constant 0 : index
    %c0_226 = arith.constant 0 : index
    %327 = vector.load %arg8[%c1_223, %c0_224, %c0_225, %c0_226] : memref<2x4x64x16xbf16, #tpu.memory_space<vmem>>, vector<1x1x64x16xbf16>
    %328 = vector.shape_cast %327 : vector<1x1x64x16xbf16> to vector<64x16xbf16>
    %cst_227 = arith.constant dense<0.000000e+00> : vector<5x16xf32>
    %329 = tpu.matmul %325, %328, %cst_227 {dimension_numbers = #tpu.dot_dimension_numbers<[1], [0], [0], [1], [0, 0, 1, 1], [], []>} : vector<5x64xbf16>, vector<64x16xbf16>, vector<5x16xf32> -> vector<5x16xf32>
    %c1_228 = arith.constant 1 : index
    %c0_229 = arith.constant 0 : index
    %c0_230 = arith.constant 0 : index
    %c0_231 = arith.constant 0 : index
    %330 = vector.load %arg11[%c1_228, %c0_229, %c0_230, %c0_231] : memref<2x4x1x16xf32, #tpu.memory_space<vmem>>, vector<1x1x1x16xf32>
    %331 = vector.shape_cast %330 : vector<1x1x1x16xf32> to vector<1x16xf32>
    %332 = vector.broadcast %331 : vector<1x16xf32> to vector<5x16xf32>
    %333 = arith.addf %329, %332 : vector<5x16xf32>
    %c1_232 = arith.constant 1 : index
    %c0_233 = arith.constant 0 : index
    %c0_234 = arith.constant 0 : index
    %c0_235 = arith.constant 0 : index
    %334 = vector.load %arg9[%c1_232, %c0_233, %c0_234, %c0_235] : memref<2x4x64x16xbf16, #tpu.memory_space<vmem>>, vector<1x1x64x16xbf16>
    %335 = vector.shape_cast %334 : vector<1x1x64x16xbf16> to vector<64x16xbf16>
    %cst_236 = arith.constant dense<0.000000e+00> : vector<5x16xf32>
    %336 = tpu.matmul %325, %335, %cst_236 {dimension_numbers = #tpu.dot_dimension_numbers<[1], [0], [0], [1], [0, 0, 1, 1], [], []>} : vector<5x64xbf16>, vector<64x16xbf16>, vector<5x16xf32> -> vector<5x16xf32>
    %c1_237 = arith.constant 1 : index
    %c0_238 = arith.constant 0 : index
    %c0_239 = arith.constant 0 : index
    %c0_240 = arith.constant 0 : index
    %337 = vector.load %arg12[%c1_237, %c0_238, %c0_239, %c0_240] : memref<2x4x1x16xf32, #tpu.memory_space<vmem>>, vector<1x1x1x16xf32>
    %338 = vector.shape_cast %337 : vector<1x1x1x16xf32> to vector<1x16xf32>
    %339 = vector.broadcast %338 : vector<1x16xf32> to vector<5x16xf32>
    %340 = arith.addf %336, %339 : vector<5x16xf32>
    %c1_241 = arith.constant 1 : index
    %c0_242 = arith.constant 0 : index
    %c0_243 = arith.constant 0 : index
    %c0_244 = arith.constant 0 : index
    %341 = vector.load %arg10[%c1_241, %c0_242, %c0_243, %c0_244] : memref<2x4x64x16xbf16, #tpu.memory_space<vmem>>, vector<1x1x64x16xbf16>
    %342 = vector.shape_cast %341 : vector<1x1x64x16xbf16> to vector<64x16xbf16>
    %cst_245 = arith.constant dense<0.000000e+00> : vector<5x16xf32>
    %343 = tpu.matmul %325, %342, %cst_245 {dimension_numbers = #tpu.dot_dimension_numbers<[1], [0], [0], [1], [0, 0, 1, 1], [], []>} : vector<5x64xbf16>, vector<64x16xbf16>, vector<5x16xf32> -> vector<5x16xf32>
    %c1_246 = arith.constant 1 : index
    %c0_247 = arith.constant 0 : index
    %c0_248 = arith.constant 0 : index
    %c0_249 = arith.constant 0 : index
    %344 = vector.load %arg13[%c1_246, %c0_247, %c0_248, %c0_249] : memref<2x4x1x16xf32, #tpu.memory_space<vmem>>, vector<1x1x1x16xf32>
    %345 = vector.shape_cast %344 : vector<1x1x1x16xf32> to vector<1x16xf32>
    %346 = vector.broadcast %345 : vector<1x16xf32> to vector<5x16xf32>
    %347 = arith.addf %343, %346 : vector<5x16xf32>
    %348 = arith.truncf %333 : vector<5x16xf32> to vector<5x16xbf16>
    %349 = arith.truncf %340 : vector<5x16xf32> to vector<5x16xbf16>
    %cst_250 = arith.constant dense<0.000000e+00> : vector<5x5xf32>
    %350 = tpu.matmul %348, %349, %cst_250 {dimension_numbers = #tpu.dot_dimension_numbers<[1], [1], [0], [0], [0, 0, 1, 0], [], []>} : vector<5x16xbf16>, vector<5x16xbf16>, vector<5x5xf32> -> vector<5x5xf32>
    %cst_251 = arith.constant 2.500000e-01 : f32
    %351 = vector.broadcast %cst_251 : f32 to vector<5x5xf32>
    %352 = arith.mulf %350, %351 : vector<5x5xf32>
    %cst_252 = arith.constant dense<0xFF800000> : vector<5xf32>
    %353 = vector.multi_reduction <maximumf>, %352, %cst_252 [1] : vector<5x5xf32> to vector<5xf32>
    %354 = vector.shape_cast %353 : vector<5xf32> to vector<5x1xf32>
    %355 = vector.broadcast %354 : vector<5x1xf32> to vector<5x5xf32>
    %356 = arith.subf %352, %355 : vector<5x5xf32>
    %357 = math.exp %356 : vector<5x5xf32>
    %cst_253 = arith.constant dense<0.000000e+00> : vector<5xf32>
    %358 = vector.multi_reduction <add>, %357, %cst_253 [1] : vector<5x5xf32> to vector<5xf32>
    %359 = vector.shape_cast %358 : vector<5xf32> to vector<5x1xf32>
    %360 = tpu.reciprocal %359 {approx = true} : vector<5x1xf32> -> vector<5x1xf32>
    %361 = vector.broadcast %360 : vector<5x1xf32> to vector<5x5xf32>
    %362 = arith.mulf %357, %361 : vector<5x5xf32>
    %363 = arith.truncf %362 : vector<5x5xf32> to vector<5x5xbf16>
    %364 = arith.truncf %347 : vector<5x16xf32> to vector<5x16xbf16>
    %cst_254 = arith.constant dense<0.000000e+00> : vector<5x16xf32>
    %365 = tpu.matmul %363, %364, %cst_254 {dimension_numbers = #tpu.dot_dimension_numbers<[1], [0], [0], [1], [0, 0, 1, 1], [], []>} : vector<5x5xbf16>, vector<5x16xbf16>, vector<5x16xf32> -> vector<5x16xf32>
    %366 = arith.truncf %365 : vector<5x16xf32> to vector<5x16xbf16>
    %c1_255 = arith.constant 1 : index
    %c0_256 = arith.constant 0 : index
    %c0_257 = arith.constant 0 : index
    %c0_258 = arith.constant 0 : index
    %367 = vector.load %arg14[%c1_255, %c0_256, %c0_257, %c0_258] : memref<2x4x16x64xbf16, #tpu.memory_space<vmem>>, vector<1x1x16x64xbf16>
    %368 = vector.shape_cast %367 : vector<1x1x16x64xbf16> to vector<16x64xbf16>
    %cst_259 = arith.constant dense<0.000000e+00> : vector<5x64xf32>
    %369 = tpu.matmul %366, %368, %cst_259 {dimension_numbers = #tpu.dot_dimension_numbers<[1], [0], [0], [1], [0, 0, 1, 1], [], []>} : vector<5x16xbf16>, vector<16x64xbf16>, vector<5x64xf32> -> vector<5x64xf32>
    %370 = arith.addf %326, %369 : vector<5x64xf32>
    %c1_260 = arith.constant 1 : index
    %c1_261 = arith.constant 1 : index
    %c0_262 = arith.constant 0 : index
    %c0_263 = arith.constant 0 : index
    %371 = vector.load %arg8[%c1_260, %c1_261, %c0_262, %c0_263] : memref<2x4x64x16xbf16, #tpu.memory_space<vmem>>, vector<1x1x64x16xbf16>
    %372 = vector.shape_cast %371 : vector<1x1x64x16xbf16> to vector<64x16xbf16>
    %cst_264 = arith.constant dense<0.000000e+00> : vector<5x16xf32>
    %373 = tpu.matmul %325, %372, %cst_264 {dimension_numbers = #tpu.dot_dimension_numbers<[1], [0], [0], [1], [0, 0, 1, 1], [], []>} : vector<5x64xbf16>, vector<64x16xbf16>, vector<5x16xf32> -> vector<5x16xf32>
    %c1_265 = arith.constant 1 : index
    %c1_266 = arith.constant 1 : index
    %c0_267 = arith.constant 0 : index
    %c0_268 = arith.constant 0 : index
    %374 = vector.load %arg11[%c1_265, %c1_266, %c0_267, %c0_268] : memref<2x4x1x16xf32, #tpu.memory_space<vmem>>, vector<1x1x1x16xf32>
    %375 = vector.shape_cast %374 : vector<1x1x1x16xf32> to vector<1x16xf32>
    %376 = vector.broadcast %375 : vector<1x16xf32> to vector<5x16xf32>
    %377 = arith.addf %373, %376 : vector<5x16xf32>
    %c1_269 = arith.constant 1 : index
    %c1_270 = arith.constant 1 : index
    %c0_271 = arith.constant 0 : index
    %c0_272 = arith.constant 0 : index
    %378 = vector.load %arg9[%c1_269, %c1_270, %c0_271, %c0_272] : memref<2x4x64x16xbf16, #tpu.memory_space<vmem>>, vector<1x1x64x16xbf16>
    %379 = vector.shape_cast %378 : vector<1x1x64x16xbf16> to vector<64x16xbf16>
    %cst_273 = arith.constant dense<0.000000e+00> : vector<5x16xf32>
    %380 = tpu.matmul %325, %379, %cst_273 {dimension_numbers = #tpu.dot_dimension_numbers<[1], [0], [0], [1], [0, 0, 1, 1], [], []>} : vector<5x64xbf16>, vector<64x16xbf16>, vector<5x16xf32> -> vector<5x16xf32>
    %c1_274 = arith.constant 1 : index
    %c1_275 = arith.constant 1 : index
    %c0_276 = arith.constant 0 : index
    %c0_277 = arith.constant 0 : index
    %381 = vector.load %arg12[%c1_274, %c1_275, %c0_276, %c0_277] : memref<2x4x1x16xf32, #tpu.memory_space<vmem>>, vector<1x1x1x16xf32>
    %382 = vector.shape_cast %381 : vector<1x1x1x16xf32> to vector<1x16xf32>
    %383 = vector.broadcast %382 : vector<1x16xf32> to vector<5x16xf32>
    %384 = arith.addf %380, %383 : vector<5x16xf32>
    %c1_278 = arith.constant 1 : index
    %c1_279 = arith.constant 1 : index
    %c0_280 = arith.constant 0 : index
    %c0_281 = arith.constant 0 : index
    %385 = vector.load %arg10[%c1_278, %c1_279, %c0_280, %c0_281] : memref<2x4x64x16xbf16, #tpu.memory_space<vmem>>, vector<1x1x64x16xbf16>
    %386 = vector.shape_cast %385 : vector<1x1x64x16xbf16> to vector<64x16xbf16>
    %cst_282 = arith.constant dense<0.000000e+00> : vector<5x16xf32>
    %387 = tpu.matmul %325, %386, %cst_282 {dimension_numbers = #tpu.dot_dimension_numbers<[1], [0], [0], [1], [0, 0, 1, 1], [], []>} : vector<5x64xbf16>, vector<64x16xbf16>, vector<5x16xf32> -> vector<5x16xf32>
    %c1_283 = arith.constant 1 : index
    %c1_284 = arith.constant 1 : index
    %c0_285 = arith.constant 0 : index
    %c0_286 = arith.constant 0 : index
    %388 = vector.load %arg13[%c1_283, %c1_284, %c0_285, %c0_286] : memref<2x4x1x16xf32, #tpu.memory_space<vmem>>, vector<1x1x1x16xf32>
    %389 = vector.shape_cast %388 : vector<1x1x1x16xf32> to vector<1x16xf32>
    %390 = vector.broadcast %389 : vector<1x16xf32> to vector<5x16xf32>
    %391 = arith.addf %387, %390 : vector<5x16xf32>
    %392 = arith.truncf %377 : vector<5x16xf32> to vector<5x16xbf16>
    %393 = arith.truncf %384 : vector<5x16xf32> to vector<5x16xbf16>
    %cst_287 = arith.constant dense<0.000000e+00> : vector<5x5xf32>
    %394 = tpu.matmul %392, %393, %cst_287 {dimension_numbers = #tpu.dot_dimension_numbers<[1], [1], [0], [0], [0, 0, 1, 0], [], []>} : vector<5x16xbf16>, vector<5x16xbf16>, vector<5x5xf32> -> vector<5x5xf32>
    %cst_288 = arith.constant 2.500000e-01 : f32
    %395 = vector.broadcast %cst_288 : f32 to vector<5x5xf32>
    %396 = arith.mulf %394, %395 : vector<5x5xf32>
    %cst_289 = arith.constant dense<0xFF800000> : vector<5xf32>
    %397 = vector.multi_reduction <maximumf>, %396, %cst_289 [1] : vector<5x5xf32> to vector<5xf32>
    %398 = vector.shape_cast %397 : vector<5xf32> to vector<5x1xf32>
    %399 = vector.broadcast %398 : vector<5x1xf32> to vector<5x5xf32>
    %400 = arith.subf %396, %399 : vector<5x5xf32>
    %401 = math.exp %400 : vector<5x5xf32>
    %cst_290 = arith.constant dense<0.000000e+00> : vector<5xf32>
    %402 = vector.multi_reduction <add>, %401, %cst_290 [1] : vector<5x5xf32> to vector<5xf32>
    %403 = vector.shape_cast %402 : vector<5xf32> to vector<5x1xf32>
    %404 = tpu.reciprocal %403 {approx = true} : vector<5x1xf32> -> vector<5x1xf32>
    %405 = vector.broadcast %404 : vector<5x1xf32> to vector<5x5xf32>
    %406 = arith.mulf %401, %405 : vector<5x5xf32>
    %407 = arith.truncf %406 : vector<5x5xf32> to vector<5x5xbf16>
    %408 = arith.truncf %391 : vector<5x16xf32> to vector<5x16xbf16>
    %cst_291 = arith.constant dense<0.000000e+00> : vector<5x16xf32>
    %409 = tpu.matmul %407, %408, %cst_291 {dimension_numbers = #tpu.dot_dimension_numbers<[1], [0], [0], [1], [0, 0, 1, 1], [], []>} : vector<5x5xbf16>, vector<5x16xbf16>, vector<5x16xf32> -> vector<5x16xf32>
    %410 = arith.truncf %409 : vector<5x16xf32> to vector<5x16xbf16>
    %c1_292 = arith.constant 1 : index
    %c1_293 = arith.constant 1 : index
    %c0_294 = arith.constant 0 : index
    %c0_295 = arith.constant 0 : index
    %411 = vector.load %arg14[%c1_292, %c1_293, %c0_294, %c0_295] : memref<2x4x16x64xbf16, #tpu.memory_space<vmem>>, vector<1x1x16x64xbf16>
    %412 = vector.shape_cast %411 : vector<1x1x16x64xbf16> to vector<16x64xbf16>
    %cst_296 = arith.constant dense<0.000000e+00> : vector<5x64xf32>
    %413 = tpu.matmul %410, %412, %cst_296 {dimension_numbers = #tpu.dot_dimension_numbers<[1], [0], [0], [1], [0, 0, 1, 1], [], []>} : vector<5x16xbf16>, vector<16x64xbf16>, vector<5x64xf32> -> vector<5x64xf32>
    %414 = arith.addf %370, %413 : vector<5x64xf32>
    %c1_297 = arith.constant 1 : index
    %c2_298 = arith.constant 2 : index
    %c0_299 = arith.constant 0 : index
    %c0_300 = arith.constant 0 : index
    %415 = vector.load %arg8[%c1_297, %c2_298, %c0_299, %c0_300] : memref<2x4x64x16xbf16, #tpu.memory_space<vmem>>, vector<1x1x64x16xbf16>
    %416 = vector.shape_cast %415 : vector<1x1x64x16xbf16> to vector<64x16xbf16>
    %cst_301 = arith.constant dense<0.000000e+00> : vector<5x16xf32>
    %417 = tpu.matmul %325, %416, %cst_301 {dimension_numbers = #tpu.dot_dimension_numbers<[1], [0], [0], [1], [0, 0, 1, 1], [], []>} : vector<5x64xbf16>, vector<64x16xbf16>, vector<5x16xf32> -> vector<5x16xf32>
    %c1_302 = arith.constant 1 : index
    %c2_303 = arith.constant 2 : index
    %c0_304 = arith.constant 0 : index
    %c0_305 = arith.constant 0 : index
    %418 = vector.load %arg11[%c1_302, %c2_303, %c0_304, %c0_305] : memref<2x4x1x16xf32, #tpu.memory_space<vmem>>, vector<1x1x1x16xf32>
    %419 = vector.shape_cast %418 : vector<1x1x1x16xf32> to vector<1x16xf32>
    %420 = vector.broadcast %419 : vector<1x16xf32> to vector<5x16xf32>
    %421 = arith.addf %417, %420 : vector<5x16xf32>
    %c1_306 = arith.constant 1 : index
    %c2_307 = arith.constant 2 : index
    %c0_308 = arith.constant 0 : index
    %c0_309 = arith.constant 0 : index
    %422 = vector.load %arg9[%c1_306, %c2_307, %c0_308, %c0_309] : memref<2x4x64x16xbf16, #tpu.memory_space<vmem>>, vector<1x1x64x16xbf16>
    %423 = vector.shape_cast %422 : vector<1x1x64x16xbf16> to vector<64x16xbf16>
    %cst_310 = arith.constant dense<0.000000e+00> : vector<5x16xf32>
    %424 = tpu.matmul %325, %423, %cst_310 {dimension_numbers = #tpu.dot_dimension_numbers<[1], [0], [0], [1], [0, 0, 1, 1], [], []>} : vector<5x64xbf16>, vector<64x16xbf16>, vector<5x16xf32> -> vector<5x16xf32>
    %c1_311 = arith.constant 1 : index
    %c2_312 = arith.constant 2 : index
    %c0_313 = arith.constant 0 : index
    %c0_314 = arith.constant 0 : index
    %425 = vector.load %arg12[%c1_311, %c2_312, %c0_313, %c0_314] : memref<2x4x1x16xf32, #tpu.memory_space<vmem>>, vector<1x1x1x16xf32>
    %426 = vector.shape_cast %425 : vector<1x1x1x16xf32> to vector<1x16xf32>
    %427 = vector.broadcast %426 : vector<1x16xf32> to vector<5x16xf32>
    %428 = arith.addf %424, %427 : vector<5x16xf32>
    %c1_315 = arith.constant 1 : index
    %c2_316 = arith.constant 2 : index
    %c0_317 = arith.constant 0 : index
    %c0_318 = arith.constant 0 : index
    %429 = vector.load %arg10[%c1_315, %c2_316, %c0_317, %c0_318] : memref<2x4x64x16xbf16, #tpu.memory_space<vmem>>, vector<1x1x64x16xbf16>
    %430 = vector.shape_cast %429 : vector<1x1x64x16xbf16> to vector<64x16xbf16>
    %cst_319 = arith.constant dense<0.000000e+00> : vector<5x16xf32>
    %431 = tpu.matmul %325, %430, %cst_319 {dimension_numbers = #tpu.dot_dimension_numbers<[1], [0], [0], [1], [0, 0, 1, 1], [], []>} : vector<5x64xbf16>, vector<64x16xbf16>, vector<5x16xf32> -> vector<5x16xf32>
    %c1_320 = arith.constant 1 : index
    %c2_321 = arith.constant 2 : index
    %c0_322 = arith.constant 0 : index
    %c0_323 = arith.constant 0 : index
    %432 = vector.load %arg13[%c1_320, %c2_321, %c0_322, %c0_323] : memref<2x4x1x16xf32, #tpu.memory_space<vmem>>, vector<1x1x1x16xf32>
    %433 = vector.shape_cast %432 : vector<1x1x1x16xf32> to vector<1x16xf32>
    %434 = vector.broadcast %433 : vector<1x16xf32> to vector<5x16xf32>
    %435 = arith.addf %431, %434 : vector<5x16xf32>
    %436 = arith.truncf %421 : vector<5x16xf32> to vector<5x16xbf16>
    %437 = arith.truncf %428 : vector<5x16xf32> to vector<5x16xbf16>
    %cst_324 = arith.constant dense<0.000000e+00> : vector<5x5xf32>
    %438 = tpu.matmul %436, %437, %cst_324 {dimension_numbers = #tpu.dot_dimension_numbers<[1], [1], [0], [0], [0, 0, 1, 0], [], []>} : vector<5x16xbf16>, vector<5x16xbf16>, vector<5x5xf32> -> vector<5x5xf32>
    %cst_325 = arith.constant 2.500000e-01 : f32
    %439 = vector.broadcast %cst_325 : f32 to vector<5x5xf32>
    %440 = arith.mulf %438, %439 : vector<5x5xf32>
    %cst_326 = arith.constant dense<0xFF800000> : vector<5xf32>
    %441 = vector.multi_reduction <maximumf>, %440, %cst_326 [1] : vector<5x5xf32> to vector<5xf32>
    %442 = vector.shape_cast %441 : vector<5xf32> to vector<5x1xf32>
    %443 = vector.broadcast %442 : vector<5x1xf32> to vector<5x5xf32>
    %444 = arith.subf %440, %443 : vector<5x5xf32>
    %445 = math.exp %444 : vector<5x5xf32>
    %cst_327 = arith.constant dense<0.000000e+00> : vector<5xf32>
    %446 = vector.multi_reduction <add>, %445, %cst_327 [1] : vector<5x5xf32> to vector<5xf32>
    %447 = vector.shape_cast %446 : vector<5xf32> to vector<5x1xf32>
    %448 = tpu.reciprocal %447 {approx = true} : vector<5x1xf32> -> vector<5x1xf32>
    %449 = vector.broadcast %448 : vector<5x1xf32> to vector<5x5xf32>
    %450 = arith.mulf %445, %449 : vector<5x5xf32>
    %451 = arith.truncf %450 : vector<5x5xf32> to vector<5x5xbf16>
    %452 = arith.truncf %435 : vector<5x16xf32> to vector<5x16xbf16>
    %cst_328 = arith.constant dense<0.000000e+00> : vector<5x16xf32>
    %453 = tpu.matmul %451, %452, %cst_328 {dimension_numbers = #tpu.dot_dimension_numbers<[1], [0], [0], [1], [0, 0, 1, 1], [], []>} : vector<5x5xbf16>, vector<5x16xbf16>, vector<5x16xf32> -> vector<5x16xf32>
    %454 = arith.truncf %453 : vector<5x16xf32> to vector<5x16xbf16>
    %c1_329 = arith.constant 1 : index
    %c2_330 = arith.constant 2 : index
    %c0_331 = arith.constant 0 : index
    %c0_332 = arith.constant 0 : index
    %455 = vector.load %arg14[%c1_329, %c2_330, %c0_331, %c0_332] : memref<2x4x16x64xbf16, #tpu.memory_space<vmem>>, vector<1x1x16x64xbf16>
    %456 = vector.shape_cast %455 : vector<1x1x16x64xbf16> to vector<16x64xbf16>
    %cst_333 = arith.constant dense<0.000000e+00> : vector<5x64xf32>
    %457 = tpu.matmul %454, %456, %cst_333 {dimension_numbers = #tpu.dot_dimension_numbers<[1], [0], [0], [1], [0, 0, 1, 1], [], []>} : vector<5x16xbf16>, vector<16x64xbf16>, vector<5x64xf32> -> vector<5x64xf32>
    %458 = arith.addf %414, %457 : vector<5x64xf32>
    %c1_334 = arith.constant 1 : index
    %c3_335 = arith.constant 3 : index
    %c0_336 = arith.constant 0 : index
    %c0_337 = arith.constant 0 : index
    %459 = vector.load %arg8[%c1_334, %c3_335, %c0_336, %c0_337] : memref<2x4x64x16xbf16, #tpu.memory_space<vmem>>, vector<1x1x64x16xbf16>
    %460 = vector.shape_cast %459 : vector<1x1x64x16xbf16> to vector<64x16xbf16>
    %cst_338 = arith.constant dense<0.000000e+00> : vector<5x16xf32>
    %461 = tpu.matmul %325, %460, %cst_338 {dimension_numbers = #tpu.dot_dimension_numbers<[1], [0], [0], [1], [0, 0, 1, 1], [], []>} : vector<5x64xbf16>, vector<64x16xbf16>, vector<5x16xf32> -> vector<5x16xf32>
    %c1_339 = arith.constant 1 : index
    %c3_340 = arith.constant 3 : index
    %c0_341 = arith.constant 0 : index
    %c0_342 = arith.constant 0 : index
    %462 = vector.load %arg11[%c1_339, %c3_340, %c0_341, %c0_342] : memref<2x4x1x16xf32, #tpu.memory_space<vmem>>, vector<1x1x1x16xf32>
    %463 = vector.shape_cast %462 : vector<1x1x1x16xf32> to vector<1x16xf32>
    %464 = vector.broadcast %463 : vector<1x16xf32> to vector<5x16xf32>
    %465 = arith.addf %461, %464 : vector<5x16xf32>
    %c1_343 = arith.constant 1 : index
    %c3_344 = arith.constant 3 : index
    %c0_345 = arith.constant 0 : index
    %c0_346 = arith.constant 0 : index
    %466 = vector.load %arg9[%c1_343, %c3_344, %c0_345, %c0_346] : memref<2x4x64x16xbf16, #tpu.memory_space<vmem>>, vector<1x1x64x16xbf16>
    %467 = vector.shape_cast %466 : vector<1x1x64x16xbf16> to vector<64x16xbf16>
    %cst_347 = arith.constant dense<0.000000e+00> : vector<5x16xf32>
    %468 = tpu.matmul %325, %467, %cst_347 {dimension_numbers = #tpu.dot_dimension_numbers<[1], [0], [0], [1], [0, 0, 1, 1], [], []>} : vector<5x64xbf16>, vector<64x16xbf16>, vector<5x16xf32> -> vector<5x16xf32>
    %c1_348 = arith.constant 1 : index
    %c3_349 = arith.constant 3 : index
    %c0_350 = arith.constant 0 : index
    %c0_351 = arith.constant 0 : index
    %469 = vector.load %arg12[%c1_348, %c3_349, %c0_350, %c0_351] : memref<2x4x1x16xf32, #tpu.memory_space<vmem>>, vector<1x1x1x16xf32>
    %470 = vector.shape_cast %469 : vector<1x1x1x16xf32> to vector<1x16xf32>
    %471 = vector.broadcast %470 : vector<1x16xf32> to vector<5x16xf32>
    %472 = arith.addf %468, %471 : vector<5x16xf32>
    %c1_352 = arith.constant 1 : index
    %c3_353 = arith.constant 3 : index
    %c0_354 = arith.constant 0 : index
    %c0_355 = arith.constant 0 : index
    %473 = vector.load %arg10[%c1_352, %c3_353, %c0_354, %c0_355] : memref<2x4x64x16xbf16, #tpu.memory_space<vmem>>, vector<1x1x64x16xbf16>
    %474 = vector.shape_cast %473 : vector<1x1x64x16xbf16> to vector<64x16xbf16>
    %cst_356 = arith.constant dense<0.000000e+00> : vector<5x16xf32>
    %475 = tpu.matmul %325, %474, %cst_356 {dimension_numbers = #tpu.dot_dimension_numbers<[1], [0], [0], [1], [0, 0, 1, 1], [], []>} : vector<5x64xbf16>, vector<64x16xbf16>, vector<5x16xf32> -> vector<5x16xf32>
    %c1_357 = arith.constant 1 : index
    %c3_358 = arith.constant 3 : index
    %c0_359 = arith.constant 0 : index
    %c0_360 = arith.constant 0 : index
    %476 = vector.load %arg13[%c1_357, %c3_358, %c0_359, %c0_360] : memref<2x4x1x16xf32, #tpu.memory_space<vmem>>, vector<1x1x1x16xf32>
    %477 = vector.shape_cast %476 : vector<1x1x1x16xf32> to vector<1x16xf32>
    %478 = vector.broadcast %477 : vector<1x16xf32> to vector<5x16xf32>
    %479 = arith.addf %475, %478 : vector<5x16xf32>
    %480 = arith.truncf %465 : vector<5x16xf32> to vector<5x16xbf16>
    %481 = arith.truncf %472 : vector<5x16xf32> to vector<5x16xbf16>
    %cst_361 = arith.constant dense<0.000000e+00> : vector<5x5xf32>
    %482 = tpu.matmul %480, %481, %cst_361 {dimension_numbers = #tpu.dot_dimension_numbers<[1], [1], [0], [0], [0, 0, 1, 0], [], []>} : vector<5x16xbf16>, vector<5x16xbf16>, vector<5x5xf32> -> vector<5x5xf32>
    %cst_362 = arith.constant 2.500000e-01 : f32
    %483 = vector.broadcast %cst_362 : f32 to vector<5x5xf32>
    %484 = arith.mulf %482, %483 : vector<5x5xf32>
    %cst_363 = arith.constant dense<0xFF800000> : vector<5xf32>
    %485 = vector.multi_reduction <maximumf>, %484, %cst_363 [1] : vector<5x5xf32> to vector<5xf32>
    %486 = vector.shape_cast %485 : vector<5xf32> to vector<5x1xf32>
    %487 = vector.broadcast %486 : vector<5x1xf32> to vector<5x5xf32>
    %488 = arith.subf %484, %487 : vector<5x5xf32>
    %489 = math.exp %488 : vector<5x5xf32>
    %cst_364 = arith.constant dense<0.000000e+00> : vector<5xf32>
    %490 = vector.multi_reduction <add>, %489, %cst_364 [1] : vector<5x5xf32> to vector<5xf32>
    %491 = vector.shape_cast %490 : vector<5xf32> to vector<5x1xf32>
    %492 = tpu.reciprocal %491 {approx = true} : vector<5x1xf32> -> vector<5x1xf32>
    %493 = vector.broadcast %492 : vector<5x1xf32> to vector<5x5xf32>
    %494 = arith.mulf %489, %493 : vector<5x5xf32>
    %495 = arith.truncf %494 : vector<5x5xf32> to vector<5x5xbf16>
    %496 = arith.truncf %479 : vector<5x16xf32> to vector<5x16xbf16>
    %cst_365 = arith.constant dense<0.000000e+00> : vector<5x16xf32>
    %497 = tpu.matmul %495, %496, %cst_365 {dimension_numbers = #tpu.dot_dimension_numbers<[1], [0], [0], [1], [0, 0, 1, 1], [], []>} : vector<5x5xbf16>, vector<5x16xbf16>, vector<5x16xf32> -> vector<5x16xf32>
    %498 = arith.truncf %497 : vector<5x16xf32> to vector<5x16xbf16>
    %c1_366 = arith.constant 1 : index
    %c3_367 = arith.constant 3 : index
    %c0_368 = arith.constant 0 : index
    %c0_369 = arith.constant 0 : index
    %499 = vector.load %arg14[%c1_366, %c3_367, %c0_368, %c0_369] : memref<2x4x16x64xbf16, #tpu.memory_space<vmem>>, vector<1x1x16x64xbf16>
    %500 = vector.shape_cast %499 : vector<1x1x16x64xbf16> to vector<16x64xbf16>
    %cst_370 = arith.constant dense<0.000000e+00> : vector<5x64xf32>
    %501 = tpu.matmul %498, %500, %cst_370 {dimension_numbers = #tpu.dot_dimension_numbers<[1], [0], [0], [1], [0, 0, 1, 1], [], []>} : vector<5x16xbf16>, vector<16x64xbf16>, vector<5x64xf32> -> vector<5x64xf32>
    %502 = arith.addf %458, %501 : vector<5x64xf32>
    %503 = arith.addf %300, %502 : vector<5x64xf32>
    %c1_371 = arith.constant 1 : index
    %c0_372 = arith.constant 0 : index
    %c0_373 = arith.constant 0 : index
    %504 = vector.load %arg15[%c1_371, %c0_372, %c0_373] : memref<2x1x64xf32, #tpu.memory_space<vmem>>, vector<1x1x64xf32>
    %505 = vector.shape_cast %504 : vector<1x1x64xf32> to vector<1x64xf32>
    %506 = vector.broadcast %505 : vector<1x64xf32> to vector<5x64xf32>
    %507 = arith.addf %503, %506 : vector<5x64xf32>
    %c1_374 = arith.constant 1 : index
    %c0_375 = arith.constant 0 : index
    %c0_376 = arith.constant 0 : index
    %508 = vector.load %arg16[%c1_374, %c0_375, %c0_376] : memref<2x1x64xf32, #tpu.memory_space<vmem>>, vector<1x1x64xf32>
    %509 = vector.shape_cast %508 : vector<1x1x64xf32> to vector<1x64xf32>
    %c1_377 = arith.constant 1 : index
    %c0_378 = arith.constant 0 : index
    %c0_379 = arith.constant 0 : index
    %510 = vector.load %arg17[%c1_377, %c0_378, %c0_379] : memref<2x1x64xf32, #tpu.memory_space<vmem>>, vector<1x1x64xf32>
    %511 = vector.shape_cast %510 : vector<1x1x64xf32> to vector<1x64xf32>
    %cst_380 = arith.constant dense<0.000000e+00> : vector<5xf32>
    %512 = vector.multi_reduction <add>, %507, %cst_380 [1] : vector<5x64xf32> to vector<5xf32>
    %513 = vector.shape_cast %512 : vector<5xf32> to vector<5x1xf32>
    %cst_381 = arith.constant 6.400000e+01 : f32
    %514 = vector.broadcast %cst_381 : f32 to vector<5x1xf32>
    %515 = arith.divf %513, %514 : vector<5x1xf32>
    %516 = vector.broadcast %515 : vector<5x1xf32> to vector<5x64xf32>
    %517 = arith.subf %507, %516 : vector<5x64xf32>
    %518 = arith.mulf %517, %517 : vector<5x64xf32>
    %cst_382 = arith.constant dense<0.000000e+00> : vector<5xf32>
    %519 = vector.multi_reduction <add>, %518, %cst_382 [1] : vector<5x64xf32> to vector<5xf32>
    %520 = vector.shape_cast %519 : vector<5xf32> to vector<5x1xf32>
    %cst_383 = arith.constant 6.400000e+01 : f32
    %521 = vector.broadcast %cst_383 : f32 to vector<5x1xf32>
    %522 = arith.divf %520, %521 : vector<5x1xf32>
    %cst_384 = arith.constant 9.99999997E-7 : f32
    %523 = vector.broadcast %cst_384 : f32 to vector<5x1xf32>
    %524 = arith.addf %522, %523 : vector<5x1xf32>
    %525 = math.rsqrt %524 : vector<5x1xf32>
    %526 = vector.broadcast %525 : vector<5x1xf32> to vector<5x64xf32>
    %527 = arith.mulf %517, %526 : vector<5x64xf32>
    %528 = vector.broadcast %509 : vector<1x64xf32> to vector<5x64xf32>
    %529 = arith.mulf %527, %528 : vector<5x64xf32>
    %530 = vector.broadcast %511 : vector<1x64xf32> to vector<5x64xf32>
    %531 = arith.addf %529, %530 : vector<5x64xf32>
    %532 = arith.truncf %531 : vector<5x64xf32> to vector<5x64xbf16>
    %c1_385 = arith.constant 1 : index
    %c0_386 = arith.constant 0 : index
    %c0_387 = arith.constant 0 : index
    %533 = vector.load %arg18[%c1_385, %c0_386, %c0_387] : memref<2x64x128xbf16, #tpu.memory_space<vmem>>, vector<1x64x128xbf16>
    %534 = vector.shape_cast %533 : vector<1x64x128xbf16> to vector<64x128xbf16>
    %cst_388 = arith.constant dense<0.000000e+00> : vector<5x128xf32>
    %535 = tpu.matmul %532, %534, %cst_388 {dimension_numbers = #tpu.dot_dimension_numbers<[1], [0], [0], [1], [0, 0, 1, 1], [], []>} : vector<5x64xbf16>, vector<64x128xbf16>, vector<5x128xf32> -> vector<5x128xf32>
    %c1_389 = arith.constant 1 : index
    %c0_390 = arith.constant 0 : index
    %c0_391 = arith.constant 0 : index
    %536 = vector.load %arg19[%c1_389, %c0_390, %c0_391] : memref<2x1x128xf32, #tpu.memory_space<vmem>>, vector<1x1x128xf32>
    %537 = vector.shape_cast %536 : vector<1x1x128xf32> to vector<1x128xf32>
    %538 = vector.broadcast %537 : vector<1x128xf32> to vector<5x128xf32>
    %539 = arith.addf %535, %538 : vector<5x128xf32>
    %cst_392 = arith.constant 5.000000e-01 : f32
    %540 = vector.broadcast %cst_392 : f32 to vector<5x128xf32>
    %541 = arith.mulf %540, %539 : vector<5x128xf32>
    %cst_393 = arith.constant 0.707106769 : f32
    %542 = vector.broadcast %cst_393 : f32 to vector<5x128xf32>
    %543 = arith.mulf %539, %542 : vector<5x128xf32>
    %cst_394 = arith.constant 0.000000e+00 : f32
    %544 = vector.broadcast %cst_394 : f32 to vector<5x128xf32>
    %545 = arith.cmpf oge, %543, %544 : vector<5x128xf32>
    %cst_395 = arith.constant 1.000000e+00 : f32
    %cst_396 = arith.constant -1.000000e+00 : f32
    %546 = vector.broadcast %cst_395 : f32 to vector<5x128xf32>
    %547 = vector.broadcast %cst_396 : f32 to vector<5x128xf32>
    %548 = arith.select %545, %546, %547 : vector<5x128xi1>, vector<5x128xf32>
    %549 = math.absf %543 : vector<5x128xf32>
    %cst_397 = arith.constant 0.327591091 : f32
    %550 = vector.broadcast %cst_397 : f32 to vector<5x128xf32>
    %551 = arith.mulf %550, %549 : vector<5x128xf32>
    %cst_398 = arith.constant 1.000000e+00 : f32
    %552 = vector.broadcast %cst_398 : f32 to vector<5x128xf32>
    %553 = arith.addf %552, %551 : vector<5x128xf32>
    %cst_399 = arith.constant 1.000000e+00 : f32
    %554 = vector.broadcast %cst_399 : f32 to vector<5x128xf32>
    %555 = arith.divf %554, %553 : vector<5x128xf32>
    %cst_400 = arith.constant 1.06140542 : f32
    %556 = vector.broadcast %cst_400 : f32 to vector<5x128xf32>
    %557 = arith.mulf %556, %555 : vector<5x128xf32>
    %cst_401 = arith.constant -1.45315206 : f32
    %558 = vector.broadcast %cst_401 : f32 to vector<5x128xf32>
    %559 = arith.addf %557, %558 : vector<5x128xf32>
    %560 = arith.mulf %559, %555 : vector<5x128xf32>
    %cst_402 = arith.constant 1.42141378 : f32
    %561 = vector.broadcast %cst_402 : f32 to vector<5x128xf32>
    %562 = arith.addf %560, %561 : vector<5x128xf32>
    %563 = arith.mulf %562, %555 : vector<5x128xf32>
    %cst_403 = arith.constant -0.284496725 : f32
    %564 = vector.broadcast %cst_403 : f32 to vector<5x128xf32>
    %565 = arith.addf %563, %564 : vector<5x128xf32>
    %566 = arith.mulf %565, %555 : vector<5x128xf32>
    %cst_404 = arith.constant 0.254829586 : f32
    %567 = vector.broadcast %cst_404 : f32 to vector<5x128xf32>
    %568 = arith.addf %566, %567 : vector<5x128xf32>
    %569 = arith.mulf %568, %555 : vector<5x128xf32>
    %cst_405 = arith.constant 0.000000e+00 : f32
    %570 = vector.broadcast %cst_405 : f32 to vector<5x128xf32>
    %571 = arith.subf %570, %549 : vector<5x128xf32>
    %572 = arith.mulf %571, %549 : vector<5x128xf32>
    %573 = math.exp %572 : vector<5x128xf32>
    %574 = arith.mulf %569, %573 : vector<5x128xf32>
    %cst_406 = arith.constant 1.000000e+00 : f32
    %575 = vector.broadcast %cst_406 : f32 to vector<5x128xf32>
    %576 = arith.subf %575, %574 : vector<5x128xf32>
    %577 = arith.mulf %548, %576 : vector<5x128xf32>
    %cst_407 = arith.constant 1.000000e+00 : f32
    %578 = vector.broadcast %cst_407 : f32 to vector<5x128xf32>
    %579 = arith.addf %578, %577 : vector<5x128xf32>
    %580 = arith.mulf %541, %579 : vector<5x128xf32>
    %581 = arith.truncf %580 : vector<5x128xf32> to vector<5x128xbf16>
    %c1_408 = arith.constant 1 : index
    %c0_409 = arith.constant 0 : index
    %c0_410 = arith.constant 0 : index
    %582 = vector.load %arg20[%c1_408, %c0_409, %c0_410] : memref<2x128x64xbf16, #tpu.memory_space<vmem>>, vector<1x128x64xbf16>
    %583 = vector.shape_cast %582 : vector<1x128x64xbf16> to vector<128x64xbf16>
    %cst_411 = arith.constant dense<0.000000e+00> : vector<5x64xf32>
    %584 = tpu.matmul %581, %583, %cst_411 {dimension_numbers = #tpu.dot_dimension_numbers<[1], [0], [0], [1], [0, 0, 1, 1], [], []>} : vector<5x128xbf16>, vector<128x64xbf16>, vector<5x64xf32> -> vector<5x64xf32>
    %c1_412 = arith.constant 1 : index
    %c0_413 = arith.constant 0 : index
    %c0_414 = arith.constant 0 : index
    %585 = vector.load %arg21[%c1_412, %c0_413, %c0_414] : memref<2x1x64xf32, #tpu.memory_space<vmem>>, vector<1x1x64xf32>
    %586 = vector.shape_cast %585 : vector<1x1x64xf32> to vector<1x64xf32>
    %587 = vector.broadcast %586 : vector<1x64xf32> to vector<5x64xf32>
    %588 = arith.addf %584, %587 : vector<5x64xf32>
    %589 = arith.addf %507, %588 : vector<5x64xf32>
    %590 = vector.extract_strided_slice %589 {offsets = [0, 0], sizes = [1, 64], strides = [1, 1]} : vector<5x64xf32> to vector<1x64xf32>
    %c0_415 = arith.constant 0 : index
    %c0_416 = arith.constant 0 : index
    %591 = vector.load %arg22[%c0_415, %c0_416] : memref<1x64xf32, #tpu.memory_space<vmem>>, vector<1x64xf32>
    %c0_417 = arith.constant 0 : index
    %c0_418 = arith.constant 0 : index
    %592 = vector.load %arg23[%c0_417, %c0_418] : memref<1x64xf32, #tpu.memory_space<vmem>>, vector<1x64xf32>
    %cst_419 = arith.constant dense<0.000000e+00> : vector<1xf32>
    %593 = vector.multi_reduction <add>, %590, %cst_419 [1] : vector<1x64xf32> to vector<1xf32>
    %594 = vector.shape_cast %593 : vector<1xf32> to vector<1x1xf32>
    %cst_420 = arith.constant 6.400000e+01 : f32
    %595 = vector.broadcast %cst_420 : f32 to vector<1x1xf32>
    %596 = arith.divf %594, %595 : vector<1x1xf32>
    %597 = vector.broadcast %596 : vector<1x1xf32> to vector<1x64xf32>
    %598 = arith.subf %590, %597 : vector<1x64xf32>
    %599 = arith.mulf %598, %598 : vector<1x64xf32>
    %cst_421 = arith.constant dense<0.000000e+00> : vector<1xf32>
    %600 = vector.multi_reduction <add>, %599, %cst_421 [1] : vector<1x64xf32> to vector<1xf32>
    %601 = vector.shape_cast %600 : vector<1xf32> to vector<1x1xf32>
    %cst_422 = arith.constant 6.400000e+01 : f32
    %602 = vector.broadcast %cst_422 : f32 to vector<1x1xf32>
    %603 = arith.divf %601, %602 : vector<1x1xf32>
    %cst_423 = arith.constant 9.99999997E-7 : f32
    %604 = vector.broadcast %cst_423 : f32 to vector<1x1xf32>
    %605 = arith.addf %603, %604 : vector<1x1xf32>
    %606 = math.rsqrt %605 : vector<1x1xf32>
    %607 = vector.broadcast %606 : vector<1x1xf32> to vector<1x64xf32>
    %608 = arith.mulf %598, %607 : vector<1x64xf32>
    %609 = arith.mulf %608, %591 : vector<1x64xf32>
    %610 = arith.addf %609, %592 : vector<1x64xf32>
    %611 = arith.truncf %610 : vector<1x64xf32> to vector<1x64xbf16>
    %c0_424 = arith.constant 0 : index
    %c0_425 = arith.constant 0 : index
    %612 = vector.load %arg24[%c0_424, %c0_425] : memref<64x1024xbf16, #tpu.memory_space<vmem>>, vector<64x1024xbf16>
    %cst_426 = arith.constant dense<0.000000e+00> : vector<1x1024xf32>
    %613 = tpu.matmul %611, %612, %cst_426 {dimension_numbers = #tpu.dot_dimension_numbers<[1], [0], [0], [1], [0, 0, 1, 1], [], []>} : vector<1x64xbf16>, vector<64x1024xbf16>, vector<1x1024xf32> -> vector<1x1024xf32>
    %c0_427 = arith.constant 0 : index
    %c0_428 = arith.constant 0 : index
    %614 = vector.load %arg25[%c0_427, %c0_428] : memref<1x1024xf32, #tpu.memory_space<vmem>>, vector<1x1024xf32>
    %615 = arith.addf %613, %614 : vector<1x1024xf32>
    %616 = arith.truncf %615 : vector<1x1024xf32> to vector<1x1024xbf16>
    %c0_429 = arith.constant 0 : index
    %c0_430 = arith.constant 0 : index
    %617 = vector.load %arg26[%c0_429, %c0_430] : memref<1024x512xbf16, #tpu.memory_space<vmem>>, vector<1024x512xbf16>
    %cst_431 = arith.constant dense<0.000000e+00> : vector<1x512xf32>
    %618 = tpu.matmul %616, %617, %cst_431 {dimension_numbers = #tpu.dot_dimension_numbers<[1], [0], [0], [1], [0, 0, 1, 1], [], []>} : vector<1x1024xbf16>, vector<1024x512xbf16>, vector<1x512xf32> -> vector<1x512xf32>
    %c0_432 = arith.constant 0 : index
    %c0_433 = arith.constant 0 : index
    %619 = vector.load %arg27[%c0_432, %c0_433] : memref<1x512xf32, #tpu.memory_space<vmem>>, vector<1x512xf32>
    %620 = arith.addf %618, %619 : vector<1x512xf32>
    %c0_434 = arith.constant 0 : index
    %c0_435 = arith.constant 0 : index
    %621 = vector.load %arg28[%c0_434, %c0_435] : memref<1x512xf32, #tpu.memory_space<vmem>>, vector<1x512xf32>
    %622 = arith.mulf %620, %621 : vector<1x512xf32>
    %c0_436 = arith.constant 0 : index
    %c0_437 = arith.constant 0 : index
    %623 = vector.load %arg29[%c0_436, %c0_437] : memref<1x512xf32, #tpu.memory_space<vmem>>, vector<1x512xf32>
    %624 = arith.addf %622, %623 : vector<1x512xf32>
    %cst_438 = arith.constant 0.000000e+00 : f32
    %625 = vector.broadcast %cst_438 : f32 to vector<1x512xf32>
    %626 = arith.cmpf oge, %624, %625 : vector<1x512xf32>
    %cst_439 = arith.constant 2.000000e-01 : f32
    %627 = vector.broadcast %cst_439 : f32 to vector<1x512xf32>
    %628 = arith.mulf %627, %624 : vector<1x512xf32>
    %629 = arith.select %626, %624, %628 : vector<1x512xi1>, vector<1x512xf32>
    %630 = arith.truncf %629 : vector<1x512xf32> to vector<1x512xbf16>
    %c0_440 = arith.constant 0 : index
    %c0_441 = arith.constant 0 : index
    %631 = vector.load %arg30[%c0_440, %c0_441] : memref<512x10xbf16, #tpu.memory_space<vmem>>, vector<512x10xbf16>
    %cst_442 = arith.constant dense<0.000000e+00> : vector<1x10xf32>
    %632 = tpu.matmul %630, %631, %cst_442 {dimension_numbers = #tpu.dot_dimension_numbers<[1], [0], [0], [1], [0, 0, 1, 1], [], []>} : vector<1x512xbf16>, vector<512x10xbf16>, vector<1x10xf32> -> vector<1x10xf32>
    %c0_443 = arith.constant 0 : index
    %c0_444 = arith.constant 0 : index
    %633 = vector.load %arg31[%c0_443, %c0_444] : memref<1x10xf32, #tpu.memory_space<vmem>>, vector<1x10xf32>
    %634 = arith.addf %632, %633 : vector<1x10xf32>
    %c0_445 = arith.constant 0 : index
    %c0_446 = arith.constant 0 : index
    %c0_447 = arith.constant 0 : index
    %635 = vector.load %arg32[%c0_445, %c0_446, %c0_447] : memref<1x1x10xf32, #tpu.memory_space<vmem>>, vector<1x1x10xf32>
    %636 = vector.shape_cast %635 : vector<1x1x10xf32> to vector<1x10xf32>
    %637 = vector.shape_cast %634 : vector<1x10xf32> to vector<1x1x10xf32>
    tpu.vector_store %arg32[%c0_445, %c0_446, %c0_447], %637 {strides = array<i32>} : memref<1x1x10xf32, #tpu.memory_space<vmem>>, vector<1x1x10xf32>,
    return
  }
  func.func @transform_0(%arg0: i32) -> (i32, i32, i32) {
    %c0_i32 = arith.constant 0 : i32
    %c0_i32_0 = arith.constant 0 : i32
    %c0_i32_1 = arith.constant 0 : i32
    return %arg0, %c0_i32, %c0_i32_0 : i32, i32, i32
  }
  func.func @transform_1(%arg0: i32) -> (i32, i32) {
    %c0_i32 = arith.constant 0 : i32
    %c0_i32_0 = arith.constant 0 : i32
    %c0_i32_1 = arith.constant 0 : i32
    return %c0_i32, %c0_i32_0 : i32, i32
  }
  func.func @transform_2(%arg0: i32) -> (i32, i32) {
    %c0_i32 = arith.constant 0 : i32
    %c0_i32_0 = arith.constant 0 : i32
    %c0_i32_1 = arith.constant 0 : i32
    return %c0_i32, %c0_i32_0 : i32, i32
  }
  func.func @transform_3(%arg0: i32) -> (i32, i32) {
    %c0_i32 = arith.constant 0 : i32
    %c0_i32_0 = arith.constant 0 : i32
    %c0_i32_1 = arith.constant 0 : i32
    return %c0_i32, %c0_i32_0 : i32, i32
  }
  func.func @transform_4(%arg0: i32) -> (i32, i32) {
    %c0_i32 = arith.constant 0 : i32
    %c0_i32_0 = arith.constant 0 : i32
    %c0_i32_1 = arith.constant 0 : i32
    return %c0_i32, %c0_i32_0 : i32, i32
  }
  func.func @transform_5(%arg0: i32) -> (i32, i32, i32) {
    %c0_i32 = arith.constant 0 : i32
    %c0_i32_0 = arith.constant 0 : i32
    %c0_i32_1 = arith.constant 0 : i32
    %c0_i32_2 = arith.constant 0 : i32
    return %c0_i32, %c0_i32_0, %c0_i32_1 : i32, i32, i32
  }
  func.func @transform_6(%arg0: i32) -> (i32, i32, i32) {
    %c0_i32 = arith.constant 0 : i32
    %c0_i32_0 = arith.constant 0 : i32
    %c0_i32_1 = arith.constant 0 : i32
    %c0_i32_2 = arith.constant 0 : i32
    return %c0_i32, %c0_i32_0, %c0_i32_1 : i32, i32, i32
  }
  func.func @transform_7(%arg0: i32) -> (i32, i32, i32, i32) {
    %c0_i32 = arith.constant 0 : i32
    %c0_i32_0 = arith.constant 0 : i32
    %c0_i32_1 = arith.constant 0 : i32
    %c0_i32_2 = arith.constant 0 : i32
    %c0_i32_3 = arith.constant 0 : i32
    return %c0_i32, %c0_i32_0, %c0_i32_1, %c0_i32_2 : i32, i32, i32, i32
  }
  func.func @transform_8(%arg0: i32) -> (i32, i32, i32, i32) {
    %c0_i32 = arith.constant 0 : i32
    %c0_i32_0 = arith.constant 0 : i32
    %c0_i32_1 = arith.constant 0 : i32
    %c0_i32_2 = arith.constant 0 : i32
    %c0_i32_3 = arith.constant 0 : i32
    return %c0_i32, %c0_i32_0, %c0_i32_1, %c0_i32_2 : i32, i32, i32, i32
  }
  func.func @transform_9(%arg0: i32) -> (i32, i32, i32, i32) {
    %c0_i32 = arith.constant 0 : i32
    %c0_i32_0 = arith.constant 0 : i32
    %c0_i32_1 = arith.constant 0 : i32
    %c0_i32_2 = arith.constant 0 : i32
    %c0_i32_3 = arith.constant 0 : i32
    return %c0_i32, %c0_i32_0, %c0_i32_1, %c0_i32_2 : i32, i32, i32, i32
  }
  func.func @transform_10(%arg0: i32) -> (i32, i32, i32, i32) {
    %c0_i32 = arith.constant 0 : i32
    %c0_i32_0 = arith.constant 0 : i32
    %c0_i32_1 = arith.constant 0 : i32
    %c0_i32_2 = arith.constant 0 : i32
    %c0_i32_3 = arith.constant 0 : i32
    return %c0_i32, %c0_i32_0, %c0_i32_1, %c0_i32_2 : i32, i32, i32, i32
  }
  func.func @transform_11(%arg0: i32) -> (i32, i32, i32, i32) {
    %c0_i32 = arith.constant 0 : i32
    %c0_i32_0 = arith.constant 0 : i32
    %c0_i32_1 = arith.constant 0 : i32
    %c0_i32_2 = arith.constant 0 : i32
    %c0_i32_3 = arith.constant 0 : i32
    return %c0_i32, %c0_i32_0, %c0_i32_1, %c0_i32_2 : i32, i32, i32, i32
  }
  func.func @transform_12(%arg0: i32) -> (i32, i32, i32, i32) {
    %c0_i32 = arith.constant 0 : i32
    %c0_i32_0 = arith.constant 0 : i32
    %c0_i32_1 = arith.constant 0 : i32
    %c0_i32_2 = arith.constant 0 : i32
    %c0_i32_3 = arith.constant 0 : i32
    return %c0_i32, %c0_i32_0, %c0_i32_1, %c0_i32_2 : i32, i32, i32, i32
  }
  func.func @transform_13(%arg0: i32) -> (i32, i32, i32, i32) {
    %c0_i32 = arith.constant 0 : i32
    %c0_i32_0 = arith.constant 0 : i32
    %c0_i32_1 = arith.constant 0 : i32
    %c0_i32_2 = arith.constant 0 : i32
    %c0_i32_3 = arith.constant 0 : i32
    return %c0_i32, %c0_i32_0, %c0_i32_1, %c0_i32_2 : i32, i32, i32, i32
  }
  func.func @transform_14(%arg0: i32) -> (i32, i32, i32) {
    %c0_i32 = arith.constant 0 : i32
    %c0_i32_0 = arith.constant 0 : i32
    %c0_i32_1 = arith.constant 0 : i32
    %c0_i32_2 = arith.constant 0 : i32
    return %c0_i32, %c0_i32_0, %c0_i32_1 : i32, i32, i32
  }
  func.func @transform_15(%arg0: i32) -> (i32, i32, i32) {
    %c0_i32 = arith.constant 0 : i32
    %c0_i32_0 = arith.constant 0 : i32
    %c0_i32_1 = arith.constant 0 : i32
    %c0_i32_2 = arith.constant 0 : i32
    return %c0_i32, %c0_i32_0, %c0_i32_1 : i32, i32, i32
  }
  func.func @transform_16(%arg0: i32) -> (i32, i32, i32) {
    %c0_i32 = arith.constant 0 : i32
    %c0_i32_0 = arith.constant 0 : i32
    %c0_i32_1 = arith.constant 0 : i32
    %c0_i32_2 = arith.constant 0 : i32
    return %c0_i32, %c0_i32_0, %c0_i32_1 : i32, i32, i32
  }
  func.func @transform_17(%arg0: i32) -> (i32, i32, i32) {
    %c0_i32 = arith.constant 0 : i32
    %c0_i32_0 = arith.constant 0 : i32
    %c0_i32_1 = arith.constant 0 : i32
    %c0_i32_2 = arith.constant 0 : i32
    return %c0_i32, %c0_i32_0, %c0_i32_1 : i32, i32, i32
  }
  func.func @transform_18(%arg0: i32) -> (i32, i32, i32) {
    %c0_i32 = arith.constant 0 : i32
    %c0_i32_0 = arith.constant 0 : i32
    %c0_i32_1 = arith.constant 0 : i32
    %c0_i32_2 = arith.constant 0 : i32
    return %c0_i32, %c0_i32_0, %c0_i32_1 : i32, i32, i32
  }
  func.func @transform_19(%arg0: i32) -> (i32, i32, i32) {
    %c0_i32 = arith.constant 0 : i32
    %c0_i32_0 = arith.constant 0 : i32
    %c0_i32_1 = arith.constant 0 : i32
    %c0_i32_2 = arith.constant 0 : i32
    return %c0_i32, %c0_i32_0, %c0_i32_1 : i32, i32, i32
  }
  func.func @transform_20(%arg0: i32) -> (i32, i32, i32) {
    %c0_i32 = arith.constant 0 : i32
    %c0_i32_0 = arith.constant 0 : i32
    %c0_i32_1 = arith.constant 0 : i32
    %c0_i32_2 = arith.constant 0 : i32
    return %c0_i32, %c0_i32_0, %c0_i32_1 : i32, i32, i32
  }
  func.func @transform_21(%arg0: i32) -> (i32, i32) {
    %c0_i32 = arith.constant 0 : i32
    %c0_i32_0 = arith.constant 0 : i32
    %c0_i32_1 = arith.constant 0 : i32
    return %c0_i32, %c0_i32_0 : i32, i32
  }
  func.func @transform_22(%arg0: i32) -> (i32, i32) {
    %c0_i32 = arith.constant 0 : i32
    %c0_i32_0 = arith.constant 0 : i32
    %c0_i32_1 = arith.constant 0 : i32
    return %c0_i32, %c0_i32_0 : i32, i32
  }
  func.func @transform_23(%arg0: i32) -> (i32, i32) {
    %c0_i32 = arith.constant 0 : i32
    %c0_i32_0 = arith.constant 0 : i32
    %c0_i32_1 = arith.constant 0 : i32
    return %c0_i32, %c0_i32_0 : i32, i32
  }
  func.func @transform_24(%arg0: i32) -> (i32, i32) {
    %c0_i32 = arith.constant 0 : i32
    %c0_i32_0 = arith.constant 0 : i32
    %c0_i32_1 = arith.constant 0 : i32
    return %c0_i32, %c0_i32_0 : i32, i32
  }
  func.func @transform_25(%arg0: i32) -> (i32, i32) {
    %c0_i32 = arith.constant 0 : i32
    %c0_i32_0 = arith.constant 0 : i32
    %c0_i32_1 = arith.constant 0 : i32
    return %c0_i32, %c0_i32_0 : i32, i32
  }
  func.func @transform_26(%arg0: i32) -> (i32, i32) {
    %c0_i32 = arith.constant 0 : i32
    %c0_i32_0 = arith.constant 0 : i32
    %c0_i32_1 = arith.constant 0 : i32
    return %c0_i32, %c0_i32_0 : i32, i32
  }
  func.func @transform_27(%arg0: i32) -> (i32, i32) {
    %c0_i32 = arith.constant 0 : i32
    %c0_i32_0 = arith.constant 0 : i32
    %c0_i32_1 = arith.constant 0 : i32
    return %c0_i32, %c0_i32_0 : i32, i32
  }
  func.func @transform_28(%arg0: i32) -> (i32, i32) {
    %c0_i32 = arith.constant 0 : i32
    %c0_i32_0 = arith.constant 0 : i32
    %c0_i32_1 = arith.constant 0 : i32
    return %c0_i32, %c0_i32_0 : i32, i32
  }
  func.func @transform_29(%arg0: i32) -> (i32, i32) {
    %c0_i32 = arith.constant 0 : i32
    %c0_i32_0 = arith.constant 0 : i32
    %c0_i32_1 = arith.constant 0 : i32
    return %c0_i32, %c0_i32_0 : i32, i32
  }
  func.func @transform_30(%arg0: i32) -> (i32, i32) {
    %c0_i32 = arith.constant 0 : i32
    %c0_i32_0 = arith.constant 0 : i32
    %c0_i32_1 = arith.constant 0 : i32
    return %c0_i32, %c0_i32_0 : i32, i32
  }
  func.func @transform_31(%arg0: i32) -> (i32, i32, i32) {
    %c0_i32 = arith.constant 0 : i32
    %c0_i32_0 = arith.constant 0 : i32
    %c0_i32_1 = arith.constant 0 : i32
    return %arg0, %c0_i32, %c0_i32_0 : i32, i32, i32
  }
}

</mosaic_0001>

<bundles_post_ra>
// kernel: vit_backbone_forward.1
= control target key start
LH: loop header
LB: loop body
LE: loop exit
PB: predicated region body
PF: predicated region fallthrough
CT: control target
= control target key end

     0   :  { %s10566_s6 = smov 1   ;;  %s10567_s10 = smov 2   ;;  %s11935_s0 = inlined_call_operand.smem [shape: u32[32], index: -1, kind: input, shape index: {}] }
   0x1   :  { %s10611_s5 = sld [smem:[%s11935_s0]]   ;;  %s10568_s14 = smov 3  }
   0x2   :  { %s10616_s9 = sld [smem:[%s11935_s0 + %s10566_s6]]   ;;  %s10569_s18 = smov 4  }
   0x3   :  { %s10621_s13 = sld [smem:[%s11935_s0 + %s10567_s10]]   ;;  %s10570_s22 = smov 5  }
   0x4   :  { %s10626_s17 = sld [smem:[%s11935_s0 + %s10568_s14]]   ;;  %s10571_s26 = smov 6  }
   0x5   :  { %s10631_s21 = sld [smem:[%s11935_s0 + %s10569_s18]]   ;;  %s10572_s30 = smov 7  }
   0x6   :  { %s10636_s25 = sld [smem:[%s11935_s0 + %s10570_s22]]   ;;  %s10573_s4 = smov 8  }
   0x7   :  { %11957 = sst [smem:[#allocation5_spill]] %s10611_s5  ;;  %s10574_s10 = smov 9  }
   0x8   :  { %11958 = sst [smem:[#allocation6_spill]] %s10616_s9  ;;  %s10575_s15 = smov 10  }
   0x9   :  { %11959 = sst [smem:[#allocation7_spill]] %s10621_s13  ;;  %s10576_s20 = smov 11  }
   0xa   :  { %s10641_s29 = sld [smem:[%s11935_s0 + %s10571_s26]]   ;;  %s10577_s26 = smov 12  }
   0xb   :  { %s10646_s3 = sld [smem:[%s11935_s0 + %s10572_s30]]   ;;  %s10578_s1 = smov 13  }
   0xc   :  { %s10651_s8 = sld [smem:[%s11935_s0 + %s10573_s4]]   ;;  %s10579_s7 = smov 14  }
   0xd   :  { %s10656_s14 = sld [smem:[%s11935_s0 + %s10574_s10]]   ;;  %s10581_s22 = smov 16  }
   0xe   :  { %s10661_s19 = sld [smem:[%s11935_s0 + %s10575_s15]]   ;;  %s10580_s15 = smov 15  }
   0xf   :  { %s10666_s24 = sld [smem:[%s11935_s0 + %s10576_s20]]   ;;  %s10582_s28 = smov 17  }
  0x10   :  { %s10671_s30 = sld [smem:[%s11935_s0 + %s10577_s26]]  }
  0x11   :  { %11960 = sst [smem:[#allocation8_spill]] %s10646_s3 }
  0x12   :  { %11961 = sst [smem:[#allocation9_spill]] %s10651_s8 }
  0x13   :  { %s10676_s6 = sld [smem:[%s11935_s0 + %s10578_s1]]  }
  0x14   :  { %s10681_s12 = sld [smem:[%s11935_s0 + %s10579_s7]]   ;;  %s10583_s7 = smov 18  }
  0x15   :  { %s10686_s20 = sld [smem:[%s11935_s0 + %s10580_s15]]   ;;  %s10584_s15 = smov 19  }
  0x16   :  { %s10691_s27 = sld [smem:[%s11935_s0 + %s10581_s22]]   ;;  %s10585_s22 = smov 20  }
  0x17   :  { %s10696_s4 = sld [smem:[%s11935_s0 + %s10582_s28]]   ;;  %s10586_s28 = smov 21  }
  0x19   :  { %11962 = sst [smem:[#allocation10_spill]] %s10676_s6 }
  0x1a   :  { %11963 = sst [smem:[#allocation11_spill]] %s10681_s12 }
  0x1b   :  { %11964 = sst [smem:[#allocation12_spill]] %s10686_s20 }
  0x1c   :  { %11965 = sst [smem:[#allocation13_spill]] %s10691_s27 }
  0x1d   :  { %11966 = sst [smem:[#allocation14_spill]] %s10696_s4 }
  0x1e   :  { %s10701_s12 = sld [smem:[%s11935_s0 + %s10583_s7]]   ;;  %s10587_s7 = smov 22  }
  0x1f   :  { %s10706_s20 = sld [smem:[%s11935_s0 + %s10584_s15]]   ;;  %s10588_s15 = smov 23  }
  0x20   :  { %s10711_s27 = sld [smem:[%s11935_s0 + %s10585_s22]]   ;;  %s10589_s22 = smov 24  }
  0x21   :  { %s10716_s4 = sld [smem:[%s11935_s0 + %s10586_s28]]   ;;  %s10590_s28 = smov 25  }
  0x24   :  { %11967 = sst [smem:[#allocation15_spill]] %s10701_s12 }
  0x25   :  { %11968 = sst [smem:[#allocation16_spill]] %s10706_s20 }
  0x26   :  { %11969 = sst [smem:[#allocation17_spill]] %s10711_s27 }
  0x27   :  { %11970 = sst [smem:[#allocation18_spill]] %s10716_s4 }
  0x28   :  { %s10721_s12 = sld [smem:[%s11935_s0 + %s10587_s7]]   ;;  %s10591_s7 = smov 26  }
  0x29   :  { %s10726_s20 = sld [smem:[%s11935_s0 + %s10588_s15]]   ;;  %s10592_s15 = smov 27  }
  0x2a   :  { %s10731_s27 = sld [smem:[%s11935_s0 + %s10589_s22]]   ;;  %s10593_s22 = smov 28  }
  0x2b   :  { %s10736_s4 = sld [smem:[%s11935_s0 + %s10590_s28]]   ;;  %s10594_s28 = smov 29  }
  0x2e   :  { %11971 = sst [smem:[#allocation19_spill]] %s10721_s12 }
  0x2f   :  { %11972 = sst [smem:[#allocation20_spill]] %s10726_s20 }
  0x30   :  { %11973 = sst [smem:[#allocation21_spill]] %s10731_s27 }
  0x31   :  { %11974 = sst [smem:[#allocation22_spill]] %s10736_s4 }
  0x32   :  { %s10741_s12 = sld [smem:[%s11935_s0 + %s10591_s7]]   ;;  %s10595_s7 = smov 30  }
  0x33   :  { %s10746_s20 = sld [smem:[%s11935_s0 + %s10592_s15]]   ;;  %s10596_s15 = smov 31  }
  0x34   :  { %s10751_s27 = sld [smem:[%s11935_s0 + %s10593_s22]]  }
  0x35   :  { %s10756_s4 = sld [smem:[%s11935_s0 + %s10594_s28]]  }
  0x38   :  { %11975 = sst [smem:[#allocation23_spill]] %s10741_s12 }
  0x39   :  { %11976 = sst [smem:[#allocation24_spill]] %s10746_s20 }
  0x3a   :  { %s10761_s12 = sld [smem:[%s11935_s0 + %s10595_s7]]  }
  0x3b   :  { %11977 = sst [smem:[#allocation25_spill]] %s10756_s4 }
  0x3c   :  { %s10766_s20 = sld [smem:[%s11935_s0 + %s10596_s15]]  }
  0x3d   :  { %68 = vsyncpa [#allocation3], 0 }
  0x3e   :  { %70 = vsyncpa [#allocation3 + $0x1], 0  ;;  %s10768_s22 = smov 0   ;;  %s10770_s23 = smov 0  }
  0x3f   :  { %s10772_s26 = smov 0   ;;  %s10774_s28 = smov 0  }
  0x40 LB: > { %s11978_s8 = sld [smem:[#allocation9_spill]]  ;;  %s10789_s0 = sadd.s32 4294967295, %s10564_s28   ;;  %s10552_s22 = sphi %s10768_s22, %s12001_s22   ;;  %s10564_s28 = sphi %s10774_s28, %s12004_s28   ;;  %s10560_s26 = sphi %s10772_s26, %s12003_s26   ;;  %s10556_s23 = sphi %s10770_s23, %s12002_s23  }
  0x41   : > { %s11979_s4 = sld [smem:[#allocation25_spill]]  ;;  %s8150_s1 = sadd.s32 4294967294, %s10564_s28  }
  0x42   : > { %s11980_s6 = sld [smem:[#allocation10_spill]]  ;;  %s10793_s2 = sadd.s32 1, %s10564_s28  }
  0x43   : > { %s11981_s3 = sld [smem:[#allocation8_spill]]  ;;  %s739_s7 = sadd.s32 1, %s10560_s26 }
  0x44   : > { %s11982_s9 = sld [smem:[#allocation6_spill]]  ;;  %s736_s10 = ssub.s32 %s10564_s28, %s10793_s2 }
  0x45   : > { %p749_p0 = scmp.ne.s32.totalorder %s10560_s26, %s10556_s23  ;;  %p737_p1 = scmp.eq.s32.totalorder %s736_s10, 0 }
  0x46   : > { %p750_p2 = scmp.eq.s32.totalorder %s10789_s0, 1  ;;  %p755_p3 = scmp.ne.s32.totalorder %s10556_s23, %s10552_s22 }
  0x47   : > { %p756_p4 = scmp.eq.s32.totalorder %s8150_s1, 1  ;;  %p8153_p7 = scmp.ge.s32.totalorder %s10564_s28, 1 }
  0x48   : > { %s10804_s11 = scalar_select %p737_p1, %s10560_s26, %s739_s7  }
  0x49   : > { %p10806_p5 = por %p750_p2, %p749_p0  ;;  %p10810_p6 = por %p756_p4, %p755_p3 }
  0x4a   : > { %p872_p8 = scmp.lt.s32.totalorder %s10564_s28, 3 }
  0x4c   : > { %p873_p9 = pnand %p8153_p7, %p872_p8 }
  0x4d   : > { %p951_p10 = scmp.lt.s32.totalorder (!%p873_p9), %s10789_s0, 1  ;;  %s11985_s5 = sld [smem:[#allocation5_spill]] (!%p873_p9) }
  0x4e   : > { %876 = sbr.rel (%p873_p9) target bundleno = 11025 (0x2b11), region = 144  ;;  %s11986_s13 = sld [smem:[#allocation7_spill]] (!%p873_p9) }
  0x4f   : > { %s11987_s10 = sld [smem:[#allocation11_spill]] (!%p873_p9) }
  0x53   : > { %v9859_v0 = vld [vmem:[%s11982_s9 + $0x78] sm:$0xff]   ;;  %v9863_v4 = vld [vmem:[%s11982_s9 + $0x70] sm:$0xff]   ;;  %v9867_v8 = vld [vmem:[%s11982_s9 + $0x68] sm:$0xff]   ;;  %s952_s18 = scalar_select %p951_p10, %s10789_s0, 1  ;;  %vm1490_vm0 = vcmask 1040384   ;;  %vm1496_vm1 = vcmask 520192  }
  0x54   : > { %v9860_v1 = vld [vmem:[%s11982_s9 + $0x38] sm:$0xff]   ;;  %8981 = vmatprep.subr.bf16.mxu0 %v9859_v0  ;;  %v9864_v5 = vld [vmem:[%s11982_s9 + $0x30] sm:$0xff]   ;;  %v9868_v9 = vld [vmem:[%s11982_s9 + $0x28] sm:$0xff]   ;;  %vm10598_vm2 = vmmov 0   ;;  %vm1565_vm3 = vcmask 523264   ;;  %vm1769_vm4 = vcmask 130048  }
  0x55   : > { %v9861_v2 = vld [vmem:[%s11982_s9 + $0xf8] sm:$0xff]   ;;  %8982 = vmatpush3.bf16.msra.mxu0 %v9860_v1  ;;  %v9865_v6 = vld [vmem:[%s11982_s9 + $0xf0] sm:$0xff]   ;;  %v9869_v10 = vld [vmem:[%s11982_s9 + $0xe8] sm:$0xff]   ;;  %s9783_s1 = smul.u32 24, %s952_s18  ;;  %vm1835_vm5 = vcmask 1041408   ;;  %vm1836_vm6 = vcmask 1042432  }
  0x56   : > { %v9862_v3 = vld [vmem:[%s11982_s9 + $0xb8] sm:$0xff]   ;;  %9003 = vmatprep.subr.bf16.mxu1 %v9861_v2  ;;  %8983 = vmatprep.subr.bf16.mxu0 %v9863_v4  ;;  %v9866_v7 = vld [vmem:[%s11982_s9 + $0xb0] sm:$0xff]   ;;  %v9870_v11 = vld [vmem:[%s11982_s9 + $0xa8] sm:$0xff]   ;;  %vm1817_vm7 = vcmask 36864   ;;  %vm1831_vm8 = vcmask 39936   ;;  %s11988_s18 = sld [smem:[#allocation14_spill]] }
  0x57   : > { %9004 = vmatpush3.bf16.msra.mxu1 %v9862_v3  ;;  %v9871_v12 = vld [vmem:[%s11982_s9 + $0x60] sm:$0xff]   ;;  %v9875_v16 = vld [vmem:[%s11982_s9 + $0x58] sm:$0xff]   ;;  %v9879_v20 = vld [vmem:[%s11982_s9 + $0x50] sm:$0xff]   ;;  %s10848_s7 = scalar_lea.vmem %s11985_s5, %s9783_s1  ;;  %s11989_s1 = sld [smem:[#allocation12_spill]]  ;;  %vm5332_vm11 = vcmask 516096  }
  0x58   : > { %9005 = vmatprep.subr.bf16.mxu1 %v9865_v6  ;;  %v9872_v13 = vld [vmem:[%s11982_s9 + $0x20] sm:$0xff]   ;;  %v9876_v17 = vld [vmem:[%s11982_s9 + $0x18] sm:$0xff]   ;;  %v9880_v21 = vld [vmem:[%s11982_s9 + $0x10] sm:$0xff]   ;;  %s11991_s5 = sld [smem:[#allocation16_spill]] }
  0x59   : > { %8984 = vmatpush3.bf16.msra.mxu0 %v9864_v5  ;;  %v9873_v14 = vld [vmem:[%s11982_s9 + $0xe0] sm:$0xff]   ;;  %v9877_v18 = vld [vmem:[%s11982_s9 + $0xd8] sm:$0xff]   ;;  %v9881_v22 = vld [vmem:[%s11982_s9 + $0xd0] sm:$0xff]  }
  0x5a   : > { %8985 = vmatprep.subr.bf16.mxu0 %v9867_v8  ;;  %v9874_v15 = vld [vmem:[%s11982_s9 + $0xa0] sm:$0xff]   ;;  %v9878_v19 = vld [vmem:[%s11982_s9 + $0x98] sm:$0xff]   ;;  %v9882_v23 = vld [vmem:[%s11982_s9 + $0x90] sm:$0xff]  }
  0x5b   : > { %9006 = vmatpush3.bf16.msra.mxu1 %v9866_v7  ;;  %v9883_v24 = vld [vmem:[%s11982_s9 + $0x48] sm:$0xff]   ;;  %v9887_v28 = vld [vmem:[%s11982_s9 + $0x40] sm:$0xff]   ;;  %v9892_v35 = vld [vmem:[%s11982_s9 + $0x178] sm:$0xff]  }
  0x5c   : > { %9007 = vmatprep.subr.bf16.mxu1 %v9869_v10  ;;  %v9884_v25 = vld [vmem:[%s11982_s9 + $0x8] sm:$0xff]   ;;  %v9888_v29 = vld [vmem:[%s11982_s9] sm:$0xff]   ;;  %v9894_v39 = vld [vmem:[%s11982_s9 + $0x138] sm:$0xff]  }
  0x5d   : > { %8986 = vmatpush3.bf16.msra.mxu0 %v9868_v9  ;;  %v9885_v26 = vld [vmem:[%s11982_s9 + $0xc8] sm:$0xff]   ;;  %v9889_v30 = vld [vmem:[%s11982_s9 + $0xc0] sm:$0xff]   ;;  %v9895_v41 = vld [vmem:[%s11982_s9 + $0x170] sm:$0xff]  }
  0x5e   : > { %8987 = vmatprep.subr.bf16.mxu0 %v9871_v12  ;;  %v9886_v27 = vld [vmem:[%s11982_s9 + $0x88] sm:$0xff]   ;;  %v957_v31 = vld [vmem:[%s10848_s7] sm:$0xff]  ;;  %v9896_v43 = vld [vmem:[%s11982_s9 + $0x130] sm:$0xff]  }
  0x5f   : > { %9008 = vmatpush3.bf16.msra.mxu1 %v9870_v11  ;;  %v963_v32 = vcombine.high %v957_v31, %v957_v31  ;;  %v9891_v33 = vld [vmem:[%s11982_s9 + $0x80] sm:$0xff]   ;;  %v969_v34 = vpack.c.bf16 %v957_v31, %v957_v31  ;;  %v958_v36 = vld [vmem:[%s10848_s7 + $0x8] sm:$0xff]  ;;  %v9901_v48 = vld [vmem:[%s11982_s9 + $0x158] sm:$0xff]  }
  0x60   : > { %9009 = vmatprep.subr.bf16.mxu1 %v9873_v14  ;;  %v964_v38 = vcombine.high %v958_v36, %v958_v36  ;;  %v971_v40 = vpack.c.bf16 %v958_v36, %v958_v36  ;;  %v9897_v44 = vld [vmem:[%s11982_s9 + $0x168] sm:$0xff]   ;;  %v9899_v46 = vld [vmem:[%s11982_s9 + $0x160] sm:$0xff]   ;;  %v9902_v49 = vld [vmem:[%s11982_s9 + $0x118] sm:$0xff]  }
  0x61   : > { %8988 = vmatpush3.bf16.msra.mxu0 %v9872_v13  ;;  %v970_v37 = vpack.c.bf16 %v963_v32, %v963_v32  ;;  %v9898_v45 = vld [vmem:[%s11982_s9 + $0x128] sm:$0xff]   ;;  %v9900_v47 = vld [vmem:[%s11982_s9 + $0x120] sm:$0xff]   ;;  %v959_v50 = vld [vmem:[%s10848_s7 + $0x10] sm:$0xff]  ;;  %s11990_s7 = sld [smem:[#allocation13_spill]] }
  0x62   : > { %8989 = vmatprep.subr.bf16.mxu0 %v9875_v16  ;;  %v972_v42 = vpack.c.bf16 %v964_v38, %v964_v38  ;;  %v9903_v51 = vld [vmem:[%s11982_s9 + $0x150] sm:$0xff]   ;;  %v965_v52 = vcombine.high %v959_v50, %v959_v50  ;;  %v9905_v55 = vld [vmem:[%s11982_s9 + $0x148] sm:$0xff]   ;;  %v9907_v57 = vld [vmem:[%s11982_s9 + $0x140] sm:$0xff]   ;;  %v973_v59 = vpack.c.bf16 %v959_v50, %v959_v50 }
  0x63   : > { %9010 = vmatpush3.bf16.msra.mxu1 %v9874_v15  ;;  %1398 = vmatprep.mubr.bf16.mxu0 %v970_v37  ;;  %v9904_v54 = vld [vmem:[%s11982_s9 + $0x110] sm:$0xff]   ;;  %v9906_v56 = vld [vmem:[%s11982_s9 + $0x108] sm:$0xff]   ;;  %v9908_v58 = vld [vmem:[%s11982_s9 + $0x100] sm:$0xff]   ;;  %s11992_s9 = sld [smem:[#allocation15_spill]] }
  0x64   : > { %9011 = vmatprep.subr.bf16.mxu1 %v9877_v18  ;;  %1438 = vmatprep.mubr.bf16.mxu1 %v972_v42  ;;  %v974_v53 = vpack.c.bf16 %v965_v52, %v965_v52  ;;  %v8155_v5 = vld [vmem:[%s11986_s13] ss:$0 sm:$0xff]  ;;  %v9914_v31 = vld [vmem:[%s11981_s3 + $0x8] sm:$0xff]   ;;  %s11993_s13 = sld [smem:[#allocation17_spill]] }
  0x65   : > { %8990 = vmatpush3.bf16.msra.mxu0 %v9876_v17  ;;  %v1486_v15 = vld [vmem:[%s10626_s17] sm:$0x1]  ;;  %v9915_v32 = vld [vmem:[%s10656_s14 + $0x8] sm:$0xff]  }
  0x66   : > { %8991 = vmatprep.subr.bf16.mxu0 %v9879_v20  ;;  %v1492_v17 = vld [vmem:[%s10631_s21] sm:$0x1f]  ;;  %v9923_v50 = vld [vmem:[%s11981_s3 + $0x28] sm:$0xff]  }
  0x67   : > { %9012 = vmatpush3.bf16.msra.mxu1 %v9878_v19  ;;  %v9925_v52 = vld [vmem:[%s11981_s3 + $0x20] sm:$0xff]  }
  0x68   : > { %9013 = vmatprep.subr.bf16.mxu1 %v9881_v22 }
  0x69   : > { %8992 = vmatpush3.bf16.msra.mxu0 %v9880_v21 }
  0x6a   : > { %8993 = vmatprep.subr.bf16.mxu0 %v9883_v24 }
  0x6b   : > { %9014 = vmatpush3.bf16.msra.mxu1 %v9882_v23 }
  0x6c   : > { %9015 = vmatprep.subr.bf16.mxu1 %v9885_v26  ;;  %v9910_v26 = vld [vmem:[%s11981_s3 + $0x18] sm:$0xff]  }
  0x6d   : > { %8994 = vmatpush3.bf16.msra.mxu0 %v9884_v25 }
  0x6e   : > { %8995 = vmatprep.subr.bf16.mxu0 %v9887_v28  ;;  %v10597_v28 = vmov 0.0  }
  0x6f   : > { %9016 = vmatpush3.bf16.msra.mxu1 %v9886_v27  ;;  %v9911_v27 = vld [vmem:[%s10656_s14 + $0x18] sm:$0xff]  }
  0x70   : > { %9017 = vmatprep.subr.bf16.mxu1 %v9889_v30  ;;  %v9913_v30 = vld [vmem:[%s10656_s14 + $0x10] sm:$0xff]  }
  0x71   : > { %8996 = vmatpush3.bf16.msra.mxu0 %v9888_v29  ;;  %v9912_v29 = vld [vmem:[%s11981_s3 + $0x10] sm:$0xff]  }
  0x72   : > { %9025 = vmatprep.subr.bf16.mxu0 %v9892_v35 }
  0x73   : > { %9018 = vmatpush3.bf16.msra.mxu1 %v9891_v33  ;;  %v9916_v33 = vld [vmem:[%s11981_s3] sm:$0xff]  }
  0x74   : > { %1399 = vmatmul.mubr.bf16.vlgmr.msra.gmra.mxu0 %v969_v34  ;;  %9287 = vmatprep.subr.bf16.mxu1 %v10597_v28  ;;  %v9917_v34 = vld [vmem:[%s10656_s14] sm:$0xff]  }
  0x75   : > { %9026 = vmatpush3.bf16.msra.mxu0 %v9894_v39  ;;  %1478 = vmatprep.mubr.bf16.mxu0 %v974_v53  ;;  %v8204_v39 = vld [vmem:[%s10636_s25] ss:$0 sm:$0xff]  ;;  %v9926_v53 = vld [vmem:[%s10656_s14 + $0x38] sm:$0xff]  }
  0x76   : > { %1439 = vmatmul.mubr.bf16.vlgmr.msra.gmra.mxu1 %v971_v40  ;;  %9027 = vmatprep.subr.bf16.mxu0 %v9895_v41  ;;  %v8205_v41 = vld [vmem:[%s10641_s29] ss:$0 sm:$0xff] }
  0x77   : > { %9288 = vmatpush3.bf16.msra.mxu1 %v9910_v26  ;;  %9295 = vmatprep.mubr.msk.bf16.mxu1 %vm10598_vm2, %v10597_v28 }
  0x78   : > { %9289 = vmatprep.subr.bf16.mxu1 %v10597_v28 }
  0x79   : > { %9028 = vmatpush3.bf16.msra.mxu0 %v9896_v43 }
  0x7a   : > { %9029 = vmatprep.subr.bf16.mxu0 %v9897_v44  ;;  %v9918_v44 = vld [vmem:[%s11978_s8 + $0x18] sm:$0xff]  }
  0x7b   : > { %9290 = vmatpush3.bf16.msra.mxu1 %v9912_v29 }
  0x7c   : > { %9291 = vmatprep.subr.bf16.mxu1 %v10597_v28 }
  0x7d   : > { %9030 = vmatpush3.bf16.msra.mxu0 %v9898_v45  ;;  %v9919_v45 = vld [vmem:[%s11981_s3 + $0x38] sm:$0xff]  }
  0x7e   : > { %9031 = vmatprep.subr.bf16.mxu0 %v9899_v46 }
  0x7f   : > { %9292 = vmatpush3.bf16.msra.mxu1 %v9914_v31 }
  0x80   : > { %9293 = vmatprep.subr.bf16.mxu1 %v10597_v28 }
  0x81   : > { %9032 = vmatpush3.bf16.msra.mxu0 %v9900_v47  ;;  %v9920_v47 = vld [vmem:[%s11978_s8 + $0x10] sm:$0xff]  }
  0x82   : > { %9033 = vmatprep.subr.bf16.mxu0 %v9901_v48  ;;  %v9921_v48 = vld [vmem:[%s11981_s3 + $0x30] sm:$0xff]  }
  0x83   : > { %9294 = vmatpush3.bf16.msra.mxu1 %v9916_v33 }
  0x84   : > { %9299 = vmatprep.subr.bf16.mxu1 %v10597_v28 }
  0x85   : > { %9034 = vmatpush3.bf16.msra.mxu0 %v9902_v49  ;;  %v9922_v49 = vld [vmem:[%s11978_s8 + $0x8] sm:$0xff]  }
  0x86   : > { %9035 = vmatprep.subr.bf16.mxu0 %v9903_v51  ;;  %v9924_v51 = vld [vmem:[%s11978_s8] sm:$0xff]  }
  0x89   : > { %9036 = vmatpush3.bf16.msra.mxu0 %v9904_v54  ;;  %v9927_v54 = vld [vmem:[%s10656_s14 + $0x30] sm:$0xff]  }
  0x8a   : > { %9037 = vmatprep.subr.bf16.mxu0 %v9905_v55  ;;  %v9928_v55 = vld [vmem:[%s10656_s14 + $0x28] sm:$0xff]  }
  0x8d   : > { %9038 = vmatpush3.bf16.msra.mxu0 %v9906_v56  ;;  %v9929_v56 = vld [vmem:[%s10656_s14 + $0x20] sm:$0xff]  }
  0x8e   : > { %9039 = vmatprep.subr.bf16.mxu0 %v9907_v57  ;;  %v9930_v57 = vld [vmem:[%s11981_s3 + $0x58] sm:$0xff]  }
  0x91   : > { %9040 = vmatpush3.bf16.msra.mxu0 %v9908_v58  ;;  %v9931_v58 = vld [vmem:[%s11981_s3 + $0x50] sm:$0xff]  }
  0x92   : > { %9311 = vmatprep.subr.bf16.mxu0 %v10597_v28 }
  0x94   : > { %1479 = vmatmul.mubr.bf16.vlgmr.msra.gmra.mxu0 %v973_v59  ;;  %v9932_v59 = vld [vmem:[%s11981_s3 + $0x48] sm:$0xff]  }
  0x95   : > { %9312 = vmatpush3.bf16.msra.mxu0 %v9911_v27  ;;  %9319 = vmatprep.mubr.msk.bf16.mxu0 %vm10598_vm2, %v10597_v28 }
  0x96   : > { %9313 = vmatprep.subr.bf16.mxu0 %v10597_v28 }
  0x99   : > { %9314 = vmatpush3.bf16.msra.mxu0 %v9913_v30 }
  0x9a   : > { %9315 = vmatprep.subr.bf16.mxu0 %v10597_v28 }
  0x9d   : > { %9316 = vmatpush3.bf16.msra.mxu0 %v9915_v32 }
  0x9e   : > { %9317 = vmatprep.subr.bf16.mxu0 %v10597_v28 }
  0xa1   : > { %9318 = vmatpush3.bf16.msra.mxu0 %v9917_v34 }
  0xa2   : > { %9335 = vmatprep.subr.bf16.mxu0 %v10597_v28 }
 0x134   : > { %v8997_v60 = vpop.f32.mrf.mxu0 }
 0x136   : > { %v8998_v61 = vpop.f32.mrf.mxu0  ;;  %v9019_v62 = vpop.f32.mrf.mxu1 }
 0x137   : > { %v8999_v4 = vadd.f32 %v8998_v61, %v8997_v60  ;;  %v9933_v60 = vld [vmem:[%s11981_s3 + $0x40] sm:$0xff]   ;;  %v9934_v61 = vld [vmem:[%s10656_s14 + $0x58] sm:$0xff]  }
 0x138   : > { %v9000_v63 = vpop.f32.mrf.mxu0  ;;  %v9020_v0 = vpop.f32.mrf.mxu1 }
 0x139   : > { %v1401_v6 = vadd.f32 %v8999_v4, %v8155_v5  ;;  %v9021_v7 = vadd.f32 %v9020_v0, %v9019_v62  ;;  %v9935_v62 = vld [vmem:[%s10656_s14 + $0x50] sm:$0xff]   ;;  %v9936_v63 = vld [vmem:[%s10656_s14 + $0x48] sm:$0xff]   ;;  %v9937_v0 = vld [vmem:[%s10656_s14 + $0x40] sm:$0xff]  }
 0x13a   : > { %v9001_v1 = vpop.f32.mrf.mxu0  ;;  %v9022_v2 = vpop.f32.mrf.mxu1 }
 0x13b   : > { %v1441_v10 = vadd.f32 %v9021_v7, %v1401_v6 }
 0x13c   : > { %v9023_v3 = vpop.f32.mrf.mxu1 }
 0x154   : > { %v9041_v8 = vpop.f32.mrf.mxu0 }
 0x156   : > { %v9042_v9 = vpop.f32.mrf.mxu0 }
 0x157   : > { %v9043_v11 = vadd.f32 %v9042_v9, %v9041_v8  ;;  %v8212_v9 = vld [vmem:[%s10666_s24] ss:$0 sm:$0xff] }
 0x158   : > { %v9044_v12 = vpop.f32.mrf.mxu0 }
 0x159   : > { %v1481_v13 = vadd.f32 %v9043_v11, %v1441_v10  ;;  %v8218_v12 = vld [vmem:[%s10671_s30] ss:$0 sm:$0xff] }
 0x15a   : > { %v9045_v14 = vpop.f32.mrf.mxu0 }
 0x15b   : > { %v1488_v16 = vrot.slane %v1481_v13, 7 }
 0x15d   : > { %v1491_v18 = vsel %vm1490_vm0, %v1486_v15, %v1488_v16  ;;  %vm8049_vm0 = vcmask 73728  }
 0x15e   : > { %v10875_v19 = vadd.f32 %v1492_v17, %v1491_v18  ;;  %v8206_v17 = vld [vmem:[%s10661_s19] ss:$0 sm:$0xff] }
 0x160   : > { %v1497_v20 = vsel %vm1496_vm1, %v10875_v19, 0.0 }
 0x161   : > { %1498 = vadd.xlane.f32.xlu0 %v1497_v20 }
 0x1ea   : > { %v1499_v21 = vpop.xlane.xlu0 %1498 }
 0x1eb   : > { %v1501_v22 = vmul.f32 0.015625, %v1499_v21 }
 0x1ed   : > { %v1502_v23 = vsub.f32 %v10875_v19, %v1501_v22 }
 0x1ef   : > { %v1503_v24 = vmul.f32 %v1502_v23, %v1502_v23 }
 0x1f1   : > { %v1504_v25 = vsel %vm1496_vm1, %v1503_v24, 0.0 }
 0x1f2   : > { %1505 = vadd.xlane.f32.xlu0 %v1504_v25 }
 0x27b   : > { %v1506_v35 = vpop.xlane.xlu0 %1505 }
 0x27c   : > { %v1507_v36 = vmul.f32 0.015625, %v1506_v35 }
 0x27e   : > { %v1508_v37 = vadd.f32 1e-06, %v1507_v36 }
 0x280   : > { %10454 = vrsqrt.f32 %v1508_v37 }
 0x28d   : > { %v10455_v38 = vpop.eup %10454 }
 0x28e   : > { %v1510_v40 = vmul.f32 %v10455_v38, %v1502_v23  ;;  %v10599_v23 = vmov 65535  }
 0x28f   : > { %v1837_v24 = vsel %vm1835_vm5, 4294967295, %v10599_v23 }
 0x290   : > { %v1517_v42 = vmul.f32 %v8204_v39, %v1510_v40  ;;  %v10982_v30 = vsel %vm1836_vm6, %v1837_v24, 0 }
 0x292   : > { %v1524_v43 = vadd.f32 %v8205_v41, %v1517_v42 }
 0x294   : > { %v10907_v46 = vpack.c.bf16 %v1524_v43, %v1524_v43 }
 0x296   : > { %9296 = vmatmul.mubr.msk.bf16.vlgmr.msra.gmra.mxu1 %vm1565_vm3, %v10907_v46  ;;  %9320 = vmatmul.mubr.msk.bf16.vlgmr.msra.gmra.mxu0 %vm1565_vm3, %v10907_v46 }
 0x297   : > { %9300 = vmatpush3.bf16.msra.mxu1 %v9918_v44  ;;  %9336 = vmatpush3.bf16.msra.mxu0 %v9919_v45 }
 0x298   : > { %9301 = vmatprep.subr.bf16.mxu1 %v10597_v28  ;;  %9337 = vmatprep.subr.bf16.mxu0 %v10597_v28 }
 0x299   : > { %9307 = vmatprep.mubr.msk.bf16.mxu1 %vm10598_vm2, %v10597_v28  ;;  %9343 = vmatprep.mubr.msk.bf16.mxu0 %vm10598_vm2, %v10597_v28 }
 0x29b   : > { %9302 = vmatpush3.bf16.msra.mxu1 %v9920_v47  ;;  %9338 = vmatpush3.bf16.msra.mxu0 %v9921_v48 }
 0x29c   : > { %9303 = vmatprep.subr.bf16.mxu1 %v10597_v28  ;;  %9339 = vmatprep.subr.bf16.mxu0 %v10597_v28 }
 0x29f   : > { %9304 = vmatpush3.bf16.msra.mxu1 %v9922_v49  ;;  %9340 = vmatpush3.bf16.msra.mxu0 %v9923_v50 }
 0x2a0   : > { %9305 = vmatprep.subr.bf16.mxu1 %v10597_v28  ;;  %9341 = vmatprep.subr.bf16.mxu0 %v10597_v28 }
 0x2a3   : > { %9306 = vmatpush3.bf16.msra.mxu1 %v9924_v51  ;;  %9342 = vmatpush3.bf16.msra.mxu0 %v9925_v52 }
 0x2a4   : > { %9359 = vmatprep.subr.bf16.mxu0 %v10597_v28  ;;  %9323 = vmatprep.subr.bf16.mxu1 %v10597_v28 }
 0x2a6   : > { %9308 = vmatmul.mubr.msk.bf16.vlgmr.msra.gmra.mxu1 %vm1565_vm3, %v10907_v46  ;;  %9344 = vmatmul.mubr.msk.bf16.vlgmr.msra.gmra.mxu0 %vm1565_vm3, %v10907_v46 }
 0x2a7   : > { %9360 = vmatpush3.bf16.msra.mxu0 %v9926_v53  ;;  %9367 = vmatprep.mubr.msk.bf16.mxu0 %vm10598_vm2, %v10597_v28 }
 0x2a8   : > { %9361 = vmatprep.subr.bf16.mxu0 %v10597_v28  ;;  %9325 = vmatprep.mubr.msk.bf16.mxu1 %vm10598_vm2, %v10597_v28 }
 0x2ab   : > { %9362 = vmatpush3.bf16.msra.mxu0 %v9927_v54 }
 0x2ac   : > { %9363 = vmatprep.subr.bf16.mxu0 %v10597_v28 }
 0x2af   : > { %9364 = vmatpush3.bf16.msra.mxu0 %v9928_v55 }
 0x2b0   : > { %9365 = vmatprep.subr.bf16.mxu0 %v10597_v28 }
 0x2b3   : > { %9366 = vmatpush3.bf16.msra.mxu0 %v9929_v56 }
 0x2b4   : > { %9395 = vmatprep.subr.bf16.mxu0 %v10597_v28 }
 0x2b6   : > { %9368 = vmatmul.mubr.msk.bf16.vlgmr.msra.gmra.mxu0 %vm1565_vm3, %v10907_v46 }
 0x2b7   : > { %9396 = vmatpush3.bf16.msra.mxu0 %v9930_v57  ;;  %9403 = vmatprep.mubr.msk.bf16.mxu0 %vm10598_vm2, %v10597_v28 }
 0x2b8   : > { %9397 = vmatprep.subr.bf16.mxu0 %v10597_v28 }
 0x2bb   : > { %9398 = vmatpush3.bf16.msra.mxu0 %v9931_v58 }
 0x2bc   : > { %9399 = vmatprep.subr.bf16.mxu0 %v10597_v28 }
 0x2bf   : > { %9400 = vmatpush3.bf16.msra.mxu0 %v9932_v59 }
 0x2c0   : > { %9401 = vmatprep.subr.bf16.mxu0 %v10597_v28 }
 0x2c3   : > { %9402 = vmatpush3.bf16.msra.mxu0 %v9933_v60  ;;  %v9938_v60 = vld [vmem:[%s11978_s8 + $0x38] sm:$0xff]  }
 0x2c4   : > { %9419 = vmatprep.subr.bf16.mxu0 %v10597_v28 }
 0x2c6   : > { %9404 = vmatmul.mubr.msk.bf16.vlgmr.msra.gmra.mxu0 %vm1565_vm3, %v10907_v46 }
 0x2c7   : > { %9420 = vmatpush3.bf16.msra.mxu0 %v9934_v61  ;;  %9427 = vmatprep.mubr.msk.bf16.mxu0 %vm10598_vm2, %v10597_v28 }
 0x2c8   : > { %9421 = vmatprep.subr.bf16.mxu0 %v10597_v28 }
 0x2cb   : > { %9422 = vmatpush3.bf16.msra.mxu0 %v9935_v62  ;;  %v9939_v62 = vld [vmem:[%s11978_s8 + $0x30] sm:$0xff]  }
 0x2cc   : > { %9423 = vmatprep.subr.bf16.mxu0 %v10597_v28 }
 0x2cf   : > { %9424 = vmatpush3.bf16.msra.mxu0 %v9936_v63  ;;  %v9940_v63 = vld [vmem:[%s11978_s8 + $0x28] sm:$0xff]  }
 0x2d0   : > { %9425 = vmatprep.subr.bf16.mxu0 %v10597_v28 }
 0x2d3   : > { %9426 = vmatpush3.bf16.msra.mxu0 %v9937_v0  ;;  %v9941_v0 = vld [vmem:[%s11978_s8 + $0x20] sm:$0xff]  }
 0x2d4   : > { %9443 = vmatprep.subr.bf16.mxu0 %v10597_v28 }
 0x2d6   : > { %9428 = vmatmul.mubr.msk.bf16.vlgmr.msra.gmra.mxu0 %vm1565_vm3, %v10907_v46 }
 0x2d7   : > { %9445 = vmatprep.mubr.msk.bf16.mxu0 %vm10598_vm2, %v10597_v28 }
 0x356   : > { %v1603_v1 = vpop.f32.mrf.mxu1  ;;  %v1761_v2 = vpop.f32.mrf.mxu0 }
 0x357   : > { %v1762_v18 = vadd.f32 %v8218_v12, %v1761_v2  ;;  %v1604_v27 = vadd.f32 %v8206_v17, %v1603_v1  ;;  %v8235_v12 = vld [vmem:[%s10661_s19 + $0x1] ss:$0 sm:$0xff] }
 0x358   : > { %v9297_v3 = vpop.f32.mrf.mxu1  ;;  %v9321_v4 = vpop.f32.mrf.mxu0 }
 0x359   : > { %v1830_v29 = vpack.c.bf16 %v1762_v18, %v1762_v18  ;;  %v1767_v31 = vpack.c.bf16 %v1604_v27, %v1604_v27 }
 0x35a   : > { %v1606_v5 = vpop.f32.mrf.mxu1  ;;  %v1764_v6 = vpop.f32.mrf.mxu0 }
 0x35b   : > { %v1840_v32 = vand.u32 %v10982_v30, %v1830_v29  ;;  %v8250_v5 = vld [vmem:[%s10666_s24 + $0x1] ss:$0 sm:$0xff] }
 0x35c   : > { %v9298_v7 = vpop.f32.mrf.mxu1  ;;  %v9322_v8 = vpop.f32.mrf.mxu0 }
 0x35d   : > { %v8265_v7 = vld [vmem:[%s10671_s30 + $0x1] ss:$0 sm:$0xff] }
 0x366   : > { %v1682_v10 = vpop.f32.mrf.mxu1  ;;  %v10976_v11 = vpop.f32.mrf.mxu0 }
 0x367   : > { %v1683_v13 = vadd.f32 %v8212_v9, %v1682_v10  ;;  %v1961_v17 = vadd.f32 %v8235_v12, %v10976_v11 }
 0x368   : > { %v9309_v14 = vpop.f32.mrf.mxu1  ;;  %v9345_v15 = vpop.f32.mrf.mxu0 }
 0x369   : > { %v1768_v16 = vpack.c.bf16 %v1683_v13, %v1683_v13 }
 0x36a   : > { %v1685_v20 = vpop.f32.mrf.mxu1  ;;  %v1963_v21 = vpop.f32.mrf.mxu0 }
 0x36b   : > { %v1774_v22 = vsel %vm1769_vm4, %v1768_v16, 0  ;;  %v2128_v20 = vpack.c.bf16 %v1961_v17, %v1961_v17 }
 0x36c   : > { %v9310_v25 = vpop.f32.mrf.mxu1  ;;  %9324 = vmatpush3.bf16.xpose.msra.mxu1 %v1774_v22  ;;  %v9346_v26 = vpop.f32.mrf.mxu0 }
 0x36d   : > { %9329 = vmatprep.subr.bf16.mxu1 %v10597_v28 }
 0x373   : > { %9326 = vmatmul.mubr.msk.bf16.vlgmr.msra.gmra.mxu1 %vm1769_vm4, %v1767_v31 }
 0x374   : > { %9330 = vmatpush3.bf16.msra.mxu1 %v1840_v32  ;;  %9331 = vmatprep.mubr.msk.bf16.mxu1 %vm10598_vm2, %v10597_v28 }
 0x375   : > { %9347 = vmatprep.subr.bf16.mxu1 %v10597_v28 }
 0x376   : > { %v2122_v33 = vpop.f32.mrf.mxu0 }
 0x377   : > { %v2123_v13 = vadd.f32 %v8265_v7, %v2122_v33 }
 0x378   : > { %v9369_v34 = vpop.f32.mrf.mxu0 }
 0x379   : > { %v2189_v18 = vpack.c.bf16 %v2123_v13, %v2123_v13 }
 0x37a   : > { %v2125_v35 = vpop.f32.mrf.mxu0 }
 0x37b   : > { %v2194_v21 = vand.u32 %v2189_v18, %v10982_v30 }
 0x37c   : > { %v9370_v36 = vpop.f32.mrf.mxu0 }
 0x386   : > { %v10989_v37 = vpop.f32.mrf.mxu0 }
 0x388   : > { %v9405_v38 = vpop.f32.mrf.mxu0 }
 0x389   : > { %v9942_v38 = vld [vmem:[%s11980_s6 + $0x8] sm:$0xff]  }
 0x38a   : > { %v2416_v39 = vpop.f32.mrf.mxu0 }
 0x38c   : > { %v9406_v40 = vpop.f32.mrf.mxu0 }
 0x396   : > { %v10991_v41 = vpop.f32.mrf.mxu0 }
 0x398   : > { %v9429_v42 = vpop.f32.mrf.mxu0 }
 0x399   : > { %v9943_v42 = vld [vmem:[%s11980_s6] sm:$0xff]  }
 0x39a   : > { %v2578_v43 = vpop.f32.mrf.mxu0 }
 0x39c   : > { %v9430_v44 = vpop.f32.mrf.mxu0 }
 0x433   : > { %v1810_v45 = vpop.f32.mrf.mxu1 }
 0x434   : > { %v1816_v47 = vmul.f32 0.25, %v1810_v45 }
 0x435   : > { %v9327_v48 = vpop.f32.mrf.mxu1 }
 0x436   : > { %v1818_v49 = vsel %vm1817_vm7, %v1816_v47, -inf  ;;  %v9944_v48 = vld [vmem:[%s11978_s8 + $0x58] sm:$0xff]  }
 0x437   : > { %1819 = vmax.xlane.f32.xlu1 %v1818_v49  ;;  %v1813_v50 = vpop.f32.mrf.mxu1 }
 0x438   : > { %v9945_v50 = vld [vmem:[%s11978_s8 + $0x50] sm:$0xff]  }
 0x439   : > { %v9328_v51 = vpop.f32.mrf.mxu1 }
 0x43a   : > { %v9946_v51 = vld [vmem:[%s11978_s8 + $0x48] sm:$0xff]  }
 0x4c0   : > { %v1820_v52 = vpop.xlane.xlu1 %1819 }
 0x4c1   : > { %v1821_v53 = vsub.f32 %v1816_v47, %v1820_v52  ;;  %v9947_v52 = vld [vmem:[%s11978_s8 + $0x40] sm:$0xff]  }
 0x4c3   : > { %v1822_v54 = vmul.f32 1.442695, %v1821_v53 }
 0x4c5   : > { %10456 = vpow2.f32 %v1822_v54 }
 0x4d2   : > { %v10457_v55 = vpop.eup %10456 }
 0x4d3   : > { %v1824_v56 = vsel %vm1817_vm7, %v10457_v55, 0.0 }
 0x4d4   : > { %1825 = vadd.xlane.f32.xlu1 %v1824_v56 }
 0x55d   : > { %v1826_v57 = vpop.xlane.xlu1 %1825 }
 0x55e   : > { %10458 = vrcp.f32 %v1826_v57 }
 0x56b   : > { %v10459_v58 = vpop.eup %10458 }
 0x56c   : > { %v1828_v59 = vmul.f32 %v10459_v58, %v10457_v55 }
 0x56e   : > { %v1829_v61 = vpack.c.bf16 %v1828_v59, %v1828_v59 }
 0x570   : > { %9332 = vmatmul.mubr.msk.bf16.vlgmr.msra.gmra.mxu1 %vm1831_vm8, %v1829_v61 }
 0x571   : > { %9348 = vmatpush3.bf16.msra.mxu1 %v9938_v60  ;;  %9355 = vmatprep.mubr.msk.bf16.mxu1 %vm10598_vm2, %v10597_v28 }
 0x572   : > { %9349 = vmatprep.subr.bf16.mxu1 %v10597_v28 }
 0x575   : > { %9350 = vmatpush3.bf16.msra.mxu1 %v9939_v62  ;;  %v8303_v62 = vld [vmem:[%s10666_s24 + $0x2] ss:$0 sm:$0xff] }
 0x576   : > { %9351 = vmatprep.subr.bf16.mxu1 %v10597_v28 }
 0x579   : > { %9352 = vmatpush3.bf16.msra.mxu1 %v9940_v63 }
 0x57a   : > { %9353 = vmatprep.subr.bf16.mxu1 %v10597_v28 }
 0x57d   : > { %9354 = vmatpush3.bf16.msra.mxu1 %v9941_v0  ;;  %v8318_v0 = vld [vmem:[%s10671_s30 + $0x2] ss:$0 sm:$0xff] }
 0x57e   : > { %9371 = vmatprep.subr.bf16.mxu1 %v10597_v28 }
 0x580   : > { %9356 = vmatmul.mubr.msk.bf16.vlgmr.msra.gmra.mxu1 %vm1565_vm3, %v10907_v46 }
 0x581   : > { %9373 = vmatprep.mubr.msk.bf16.mxu1 %vm10598_vm2, %v10597_v28 }
 0x630   : > { %v1876_v1 = vpop.f32.mrf.mxu1 }
 0x631   : > { %v1882_v49 = vpack.c.bf16 %v1876_v1, %v1876_v1 }
 0x632   : > { %v9333_v2 = vpop.f32.mrf.mxu1 }
 0x634   : > { %v1879_v3 = vpop.f32.mrf.mxu1 }
 0x636   : > { %v9334_v4 = vpop.f32.mrf.mxu1 }
 0x637   : > { %v8288_v4 = vld [vmem:[%s10661_s19 + $0x2] ss:$0 sm:$0xff] }
 0x640   : > { %v2041_v6 = vpop.f32.mrf.mxu1 }
 0x641   : > { %v2042_v8 = vadd.f32 %v8250_v5, %v2041_v6  ;;  %v2576_v5 = vadd.f32 %v8318_v0, %v10991_v41  ;;  %v8354_v0 = vld [vmem:[%s10666_s24 + $0x3] ss:$0 sm:$0xff] }
 0x642   : > { %v9357_v9 = vpop.f32.mrf.mxu1 }
 0x643   : > { %v2129_v10 = vpack.c.bf16 %v2042_v8, %v2042_v8  ;;  %v2414_v9 = vadd.f32 %v8288_v4, %v10989_v37 }
 0x644   : > { %v2044_v14 = vpop.f32.mrf.mxu1 }
 0x645   : > { %v2134_v15 = vsel %vm1769_vm4, %v2129_v10, 0  ;;  %v2642_v10 = vpack.c.bf16 %v2576_v5, %v2576_v5  ;;  %v2581_v12 = vpack.c.bf16 %v2414_v9, %v2414_v9  ;;  %v8339_v5 = vld [vmem:[%s10661_s19 + $0x3] ss:$0 sm:$0xff] }
 0x646   : > { %v9358_v16 = vpop.f32.mrf.mxu1  ;;  %9372 = vmatpush3.bf16.xpose.msra.mxu1 %v2134_v15 }
 0x647   : > { %9377 = vmatprep.subr.bf16.mxu1 %v10597_v28  ;;  %v2647_v13 = vand.u32 %v2642_v10, %v10982_v30 }
 0x64d   : > { %9374 = vmatmul.mubr.msk.bf16.vlgmr.msra.gmra.mxu1 %vm1769_vm4, %v2128_v20 }
 0x64e   : > { %9378 = vmatpush3.bf16.msra.mxu1 %v2194_v21  ;;  %9379 = vmatprep.mubr.msk.bf16.mxu1 %vm10598_vm2, %v10597_v28 }
 0x64f   : > { %9383 = vmatprep.subr.bf16.mxu1 %v10597_v28 }
 0x70d   : > { %v2170_v22 = vpop.f32.mrf.mxu1 }
 0x70e   : > { %v2176_v23 = vmul.f32 0.25, %v2170_v22 }
 0x70f   : > { %v9375_v24 = vpop.f32.mrf.mxu1 }
 0x710   : > { %v2177_v11 = vsel %vm1817_vm7, %v2176_v23, -inf  ;;  %v9956_v24 = vld [vmem:[%s11980_s6 + $0x10] sm:$0xff]  }
 0x711   : > { %2178 = vmax.xlane.f32.xlu0 %v2177_v11  ;;  %v2173_v25 = vpop.f32.mrf.mxu1  ;;  %9444 = vmatpush3.bf16.msra.mxu0 %v9956_v24  ;;  %v9961_v24 = vld [vmem:[%s11980_s6 + $0x18] sm:$0xff]  }
 0x712   : > { %9461 = vmatprep.subr.bf16.mxu0 %v10597_v28 }
 0x713   : > { %v9376_v26 = vpop.f32.mrf.mxu1 }
 0x79a   : > { %v2179_v27 = vpop.xlane.xlu0 %2178 }
 0x79b   : > { %v2180_v29 = vsub.f32 %v2176_v23, %v2179_v27  ;;  %v9948_v27 = vld [vmem:[%s11981_s3 + $0x78] sm:$0xff]  }
 0x79d   : > { %v2181_v31 = vmul.f32 1.442695, %v2180_v29 }
 0x79f   : > { %10460 = vpow2.f32 %v2181_v31  ;;  %v9949_v31 = vld [vmem:[%s11981_s3 + $0x70] sm:$0xff]  }
 0x7ac   : > { %v10461_v32 = vpop.eup %10460 }
 0x7ad   : > { %v2183_v33 = vsel %vm1817_vm7, %v10461_v32, 0.0 }
 0x7ae   : > { %2184 = vadd.xlane.f32.xlu1 %v2183_v33  ;;  %v9951_v33 = vld [vmem:[%s11981_s3 + $0x60] sm:$0xff]  }
 0x837   : > { %v2185_v34 = vpop.xlane.xlu1 %2184 }
 0x838   : > { %10462 = vrcp.f32 %v2185_v34  ;;  %v9952_v34 = vld [vmem:[%s10656_s14 + $0x78] sm:$0xff]  }
 0x845   : > { %v10463_v35 = vpop.eup %10462 }
 0x846   : > { %v2187_v36 = vmul.f32 %v10463_v35, %v10461_v32  ;;  %v9950_v32 = vld [vmem:[%s11981_s3 + $0x68] sm:$0xff]   ;;  %v9953_v35 = vld [vmem:[%s10656_s14 + $0x70] sm:$0xff]  }
 0x848   : > { %v2188_v39 = vpack.c.bf16 %v2187_v36, %v2187_v36  ;;  %v9954_v36 = vld [vmem:[%s10656_s14 + $0x68] sm:$0xff]  }
 0x84a   : > { %9380 = vmatmul.mubr.msk.bf16.vlgmr.msra.gmra.mxu1 %vm1831_vm8, %v2188_v39 }
 0x84b   : > { %9384 = vmatpush3.bf16.msra.mxu1 %v9942_v38  ;;  %9385 = vmatprep.mubr.msk.bf16.mxu1 %vm10598_vm2, %v10597_v28  ;;  %v9955_v38 = vld [vmem:[%s10656_s14 + $0x60] sm:$0xff]  }
 0x84c   : > { %9389 = vmatprep.subr.bf16.mxu1 %v10597_v28 }
 0x90a   : > { %v2230_v40 = vpop.f32.mrf.mxu1 }
 0x90b   : > { %v2236_v43 = vpack.c.bf16 %v2230_v40, %v2230_v40  ;;  %v9957_v40 = vld [vmem:[%s11978_s8 + $0x78] sm:$0xff]  }
 0x90c   : > { %v9381_v44 = vpop.f32.mrf.mxu1 }
 0x90d   : > { %9386 = vmatmul.mubr.msk.bf16.vlgmr.msra.gmra.mxu1 %vm1769_vm4, %v2236_v43 }
 0x90e   : > { %v2233_v45 = vpop.f32.mrf.mxu1  ;;  %9390 = vmatpush3.bf16.msra.mxu1 %v9943_v42  ;;  %9391 = vmatprep.mubr.msk.bf16.mxu1 %vm10598_vm2, %v10597_v28 }
 0x90f   : > { %9407 = vmatprep.subr.bf16.mxu1 %v10597_v28  ;;  %v9958_v45 = vld [vmem:[%s11978_s8 + $0x70] sm:$0xff]  }
 0x910   : > { %v9382_v47 = vpop.f32.mrf.mxu1 }
 0x915   : > { %9392 = vmatmul.mubr.msk.bf16.vlgmr.msra.gmra.mxu1 %vm1769_vm4, %v1882_v49  ;;  %v9960_v49 = vld [vmem:[%s11978_s8 + $0x60] sm:$0xff]  }
 0x916   : > { %9408 = vmatpush3.bf16.msra.mxu1 %v9944_v48  ;;  %9415 = vmatprep.mubr.msk.bf16.mxu1 %vm10598_vm2, %v10597_v28  ;;  %v9959_v48 = vld [vmem:[%s11978_s8 + $0x68] sm:$0xff]  }
 0x917   : > { %9409 = vmatprep.subr.bf16.mxu1 %v10597_v28 }
 0x91a   : > { %9410 = vmatpush3.bf16.msra.mxu1 %v9945_v50 }
 0x91b   : > { %9411 = vmatprep.subr.bf16.mxu1 %v10597_v28 }
 0x91e   : > { %9412 = vmatpush3.bf16.msra.mxu1 %v9946_v51 }
 0x91f   : > { %9413 = vmatprep.subr.bf16.mxu1 %v10597_v28 }
 0x922   : > { %9414 = vmatpush3.bf16.msra.mxu1 %v9947_v52 }
 0x923   : > { %9431 = vmatprep.subr.bf16.mxu1 %v10597_v28 }
 0x925   : > { %9416 = vmatmul.mubr.msk.bf16.vlgmr.msra.gmra.mxu1 %vm1565_vm3, %v10907_v46 }
 0x926   : > { %9433 = vmatprep.mubr.msk.bf16.mxu1 %vm10598_vm2, %v10597_v28 }
 0x9cd   : > { %v2283_v53 = vpop.f32.mrf.mxu1 }
 0x9cf   : > { %v9387_v54 = vpop.f32.mrf.mxu1 }
 0x9d1   : > { %v2286_v55 = vpop.f32.mrf.mxu1 }
 0x9d3   : > { %v9388_v56 = vpop.f32.mrf.mxu1 }
 0x9d5   : > { %v2332_v57 = vpop.f32.mrf.mxu1 }
 0x9d6   : > { %v11048_v58 = vadd.f32 %v2332_v57, %v2283_v53 }
 0x9d7   : > { %v9393_v59 = vpop.f32.mrf.mxu1 }
 0x9d9   : > { %v2335_v60 = vpop.f32.mrf.mxu1 }
 0x9db   : > { %v9394_v61 = vpop.f32.mrf.mxu1 }
 0x9e5   : > { %v2494_v63 = vpop.f32.mrf.mxu1 }
 0x9e6   : > { %v2495_v1 = vadd.f32 %v8303_v62, %v2494_v63 }
 0x9e7   : > { %v9417_v2 = vpop.f32.mrf.mxu1 }
 0x9e8   : > { %v2582_v3 = vpack.c.bf16 %v2495_v1, %v2495_v1  ;;  %v8369_v2 = vld [vmem:[%s10671_s30 + $0x3] ss:$0 sm:$0xff] }
 0x9e9   : > { %v2497_v6 = vpop.f32.mrf.mxu1 }
 0x9ea   : > { %v2587_v7 = vsel %vm1769_vm4, %v2582_v3, 0 }
 0x9eb   : > { %v9418_v8 = vpop.f32.mrf.mxu1  ;;  %9432 = vmatpush3.bf16.xpose.msra.mxu1 %v2587_v7 }
 0x9ec   : > { %9437 = vmatprep.subr.bf16.mxu1 %v10597_v28 }
 0x9f2   : > { %9434 = vmatmul.mubr.msk.bf16.vlgmr.msra.gmra.mxu1 %vm1769_vm4, %v2581_v12 }
 0x9f3   : > { %9438 = vmatpush3.bf16.msra.mxu1 %v2647_v13  ;;  %9439 = vmatprep.mubr.msk.bf16.mxu1 %vm10598_vm2, %v10597_v28 }
 0x9f4   : > { %9449 = vmatprep.subr.bf16.mxu1 %v10597_v28 }
 0xab2   : > { %v2623_v41 = vpop.f32.mrf.mxu1 }
 0xab3   : > { %v2629_v14 = vmul.f32 0.25, %v2623_v41 }
 0xab4   : > { %v9435_v15 = vpop.f32.mrf.mxu1 }
 0xab5   : > { %v2630_v37 = vsel %vm1817_vm7, %v2629_v14, -inf }
 0xab6   : > { %2631 = vmax.xlane.f32.xlu0 %v2630_v37  ;;  %v2626_v16 = vpop.f32.mrf.mxu1 }
 0xab8   : > { %v9436_v17 = vpop.f32.mrf.mxu1 }
 0xb3f   : > { %v2632_v18 = vpop.xlane.xlu0 %2631 }
 0xb40   : > { %v2633_v20 = vsub.f32 %v2629_v14, %v2632_v18 }
 0xb42   : > { %v2634_v21 = vmul.f32 1.442695, %v2633_v20 }
 0xb44   : > { %10464 = vpow2.f32 %v2634_v21 }
 0xb51   : > { %v10465_v22 = vpop.eup %10464 }
 0xb52   : > { %v2636_v23 = vsel %vm1817_vm7, %v10465_v22, 0.0 }
 0xb53   : > { %2637 = vadd.xlane.f32.xlu1 %v2636_v23 }
 0xbdc   : > { %v2638_v11 = vpop.xlane.xlu1 %2637 }
 0xbdd   : > { %10466 = vrcp.f32 %v2638_v11 }
 0xbea   : > { %v10467_v25 = vpop.eup %10466 }
 0xbeb   : > { %v2640_v26 = vmul.f32 %v10467_v25, %v10465_v22 }
 0xbed   : > { %v2641_v29 = vpack.c.bf16 %v2640_v26, %v2640_v26 }
 0xbef   : > { %9440 = vmatmul.mubr.msk.bf16.vlgmr.msra.gmra.mxu1 %vm1831_vm8, %v2641_v29 }
 0xbf0   : > { %9450 = vmatpush3.bf16.msra.mxu1 %v9948_v27  ;;  %9457 = vmatprep.mubr.msk.bf16.mxu1 %vm10598_vm2, %v10597_v28 }
 0xbf1   : > { %9451 = vmatprep.subr.bf16.mxu1 %v10597_v28 }
 0xbf4   : > { %9452 = vmatpush3.bf16.msra.mxu1 %v9949_v31 }
 0xbf5   : > { %9453 = vmatprep.subr.bf16.mxu1 %v10597_v28 }
 0xbf8   : > { %9454 = vmatpush3.bf16.msra.mxu1 %v9950_v32 }
 0xbf9   : > { %9455 = vmatprep.subr.bf16.mxu1 %v10597_v28 }
 0xbfc   : > { %9456 = vmatpush3.bf16.msra.mxu1 %v9951_v33 }
 0xbfd   : > { %9473 = vmatprep.subr.bf16.mxu1 %v10597_v28 }
 0xbff   : > { %9458 = vmatmul.mubr.msk.bf16.vlgmr.msra.gmra.mxu1 %vm1565_vm3, %v10907_v46 }
 0xc00   : > { %9474 = vmatpush3.bf16.msra.mxu1 %v9952_v34  ;;  %9481 = vmatprep.mubr.msk.bf16.mxu1 %vm10598_vm2, %v10597_v28 }
 0xc01   : > { %9475 = vmatprep.subr.bf16.mxu1 %v10597_v28 }
 0xc04   : > { %9476 = vmatpush3.bf16.msra.mxu1 %v9953_v35 }
 0xc05   : > { %9477 = vmatprep.subr.bf16.mxu1 %v10597_v28 }
 0xc08   : > { %9478 = vmatpush3.bf16.msra.mxu1 %v9954_v36 }
 0xc09   : > { %9479 = vmatprep.subr.bf16.mxu1 %v10597_v28 }
 0xc0c   : > { %9480 = vmatpush3.bf16.msra.mxu1 %v9955_v38  ;;  %v8381_v38 = vld [vmem:[%s11987_s10] ss:$0 sm:$0xff] }
 0xc0d   : > { %9497 = vmatprep.subr.bf16.mxu1 %v10597_v28 }
 0xc0f   : > { %9482 = vmatmul.mubr.msk.bf16.vlgmr.msra.gmra.mxu1 %vm1565_vm3, %v10907_v46 }
 0xc10   : > { %9499 = vmatprep.mubr.msk.bf16.mxu1 %vm10598_vm2, %v10597_v28  ;;  %9498 = vmatpush3.bf16.msra.mxu1 %v9961_v24 }
 0xc11   : > { %9515 = vmatprep.subr.bf16.mxu1 %v10597_v28 }
 0xcaf   : > { %v2683_v39 = vpop.f32.mrf.mxu1 }
 0xcb0   : > { %v2689_v42 = vpack.c.bf16 %v2683_v39, %v2683_v39 }
 0xcb1   : > { %v9441_v43 = vpop.f32.mrf.mxu1 }
 0xcb2   : > { %9446 = vmatmul.mubr.msk.bf16.vlgmr.msra.gmra.mxu0 %vm1769_vm4, %v2689_v42 }
 0xcb3   : > { %9462 = vmatpush3.bf16.msra.mxu0 %v9957_v40  ;;  %v2686_v44 = vpop.f32.mrf.mxu1  ;;  %9469 = vmatprep.mubr.msk.bf16.mxu0 %vm10598_vm2, %v10597_v28 }
 0xcb4   : > { %9463 = vmatprep.subr.bf16.mxu0 %v10597_v28 }
 0xcb5   : > { %v9442_v47 = vpop.f32.mrf.mxu1 }
 0xcb7   : > { %9464 = vmatpush3.bf16.msra.mxu0 %v9958_v45 }
 0xcb8   : > { %9465 = vmatprep.subr.bf16.mxu0 %v10597_v28 }
 0xcbb   : > { %9466 = vmatpush3.bf16.msra.mxu0 %v9959_v48 }
 0xcbc   : > { %9467 = vmatprep.subr.bf16.mxu0 %v10597_v28 }
 0xcbf   : > { %v2818_v50 = vpop.f32.mrf.mxu1  ;;  %9468 = vmatpush3.bf16.msra.mxu0 %v9960_v49 }
 0xcc0   : > { %9485 = vmatprep.subr.bf16.mxu0 %v10597_v28  ;;  %v2819_v10 = vadd.f32 %v8339_v5, %v2818_v50  ;;  %v9970_v5 = vld [vmem:[%s11991_s5 + $0x18] sm:$0xff]  }
 0xcc1   : > { %v9459_v51 = vpop.f32.mrf.mxu1 }
 0xcc2   : > { %9470 = vmatmul.mubr.msk.bf16.vlgmr.msra.gmra.mxu0 %vm1565_vm3, %v10907_v46  ;;  %v2986_v12 = vpack.c.bf16 %v2819_v10, %v2819_v10 }
 0xcc3   : > { %v2821_v52 = vpop.f32.mrf.mxu1  ;;  %9487 = vmatprep.mubr.msk.bf16.mxu0 %vm10598_vm2, %v10597_v28 }
 0xcc4   : > { %v9962_v52 = vld [vmem:[%s11988_s18 + $0x18] sm:$0xff]  }
 0xcc5   : > { %v9460_v53 = vpop.f32.mrf.mxu1 }
 0xcc6   : > { %v9964_v53 = vld [vmem:[%s11988_s18 + $0x8] sm:$0xff]  }
 0xccf   : > { %v2980_v54 = vpop.f32.mrf.mxu1 }
 0xcd0   : > { %v2981_v6 = vadd.f32 %v8369_v2, %v2980_v54  ;;  %v9965_v54 = vld [vmem:[%s11988_s18] sm:$0xff]   ;;  %v9966_v2 = vld [vmem:[%s11991_s5 + $0x38] sm:$0xff]  }
 0xcd1   : > { %v9483_v55 = vpop.f32.mrf.mxu1 }
 0xcd3   : > { %v2983_v56 = vpop.f32.mrf.mxu1 }
 0xcd5   : > { %v9484_v57 = vpop.f32.mrf.mxu1 }
 0xd72   : > { %v2736_v59 = vpop.f32.mrf.mxu0 }
 0xd73   : > { %v2742_v60 = vadd.f32 %v2736_v59, %v11048_v58  ;;  %v3047_v58 = vpack.c.bf16 %v2981_v6, %v2981_v6  ;;  %v9971_v6 = vld [vmem:[%s11991_s5 + $0x10] sm:$0xff]  }
 0xd74   : > { %v9447_v61 = vpop.f32.mrf.mxu0 }
 0xd75   : > { %v3052_v13 = vand.u32 %v3047_v58, %v10982_v30 }
 0xd76   : > { %v2739_v62 = vpop.f32.mrf.mxu0 }
 0xd77   : > { %v8383_v62 = vld [vmem:[%s11990_s7] ss:$0 sm:$0xff] }
 0xd78   : > { %v9448_v63 = vpop.f32.mrf.mxu0 }
 0xd82   : > { %v2899_v1 = vpop.f32.mrf.mxu0 }
 0xd83   : > { %v2900_v46 = vadd.f32 %v8354_v0, %v2899_v1 }
 0xd84   : > { %v9471_v3 = vpop.f32.mrf.mxu0 }
 0xd85   : > { %v2987_v4 = vpack.c.bf16 %v2900_v46, %v2900_v46  ;;  %v9967_v46 = vld [vmem:[%s11991_s5 + $0x30] sm:$0xff]   ;;  %v9968_v3 = vld [vmem:[%s11991_s5 + $0x28] sm:$0xff]  }
 0xd86   : > { %v2902_v7 = vpop.f32.mrf.mxu0 }
 0xd87   : > { %v2992_v8 = vsel %vm1769_vm4, %v2987_v4, 0  ;;  %v9969_v4 = vld [vmem:[%s11991_s5 + $0x20] sm:$0xff]   ;;  %v9972_v7 = vld [vmem:[%s11991_s5 + $0x8] sm:$0xff]  }
 0xd88   : > { %v9472_v9 = vpop.f32.mrf.mxu0  ;;  %9486 = vmatpush3.bf16.xpose.msra.mxu0 %v2992_v8  ;;  %v9973_v8 = vld [vmem:[%s11991_s5] sm:$0xff]  }
 0xd89   : > { %9491 = vmatprep.subr.bf16.mxu0 %v10597_v28  ;;  %v8384_v9 = vld [vmem:[%s11992_s9] ss:$0 sm:$0xff] }
 0xd8f   : > { %9488 = vmatmul.mubr.msk.bf16.vlgmr.msra.gmra.mxu0 %vm1769_vm4, %v2986_v12 }
 0xd90   : > { %9492 = vmatpush3.bf16.msra.mxu0 %v3052_v13  ;;  %9493 = vmatprep.mubr.msk.bf16.mxu0 %vm10598_vm2, %v10597_v28 }
 0xd91   : > { %9503 = vmatprep.subr.bf16.mxu0 %v10597_v28 }
 0xe4f   : > { %v3028_v41 = vpop.f32.mrf.mxu0 }
 0xe50   : > { %v3034_v14 = vmul.f32 0.25, %v3028_v41 }
 0xe51   : > { %v9489_v15 = vpop.f32.mrf.mxu0 }
 0xe52   : > { %v3035_v37 = vsel %vm1817_vm7, %v3034_v14, -inf }
 0xe53   : > { %3036 = vmax.xlane.f32.xlu0 %v3035_v37  ;;  %v3031_v16 = vpop.f32.mrf.mxu0 }
 0xe55   : > { %v9490_v17 = vpop.f32.mrf.mxu0 }
 0xedc   : > { %v3037_v18 = vpop.xlane.xlu0 %3036 }
 0xedd   : > { %v3038_v20 = vsub.f32 %v3034_v14, %v3037_v18 }
 0xedf   : > { %v3039_v21 = vmul.f32 1.442695, %v3038_v20 }
 0xee1   : > { %10468 = vpow2.f32 %v3039_v21 }
 0xeee   : > { %v10469_v22 = vpop.eup %10468 }
 0xeef   : > { %v3041_v23 = vsel %vm1817_vm7, %v10469_v22, 0.0 }
 0xef0   : > { %3042 = vadd.xlane.f32.xlu1 %v3041_v23 }
 0xf79   : > { %v3043_v11 = vpop.xlane.xlu1 %3042 }
 0xf7a   : > { %10470 = vrcp.f32 %v3043_v11 }
 0xf87   : > { %v10471_v25 = vpop.eup %10470 }
 0xf88   : > { %v3045_v26 = vmul.f32 %v10471_v25, %v10469_v22 }
 0xf8a   : > { %v3046_v27 = vpack.c.bf16 %v3045_v26, %v3045_v26 }
 0xf8c   : > { %9494 = vmatmul.mubr.msk.bf16.vlgmr.msra.gmra.mxu0 %vm1831_vm8, %v3046_v27 }
 0xf8d   : > { %9511 = vmatprep.mubr.msk.bf16.mxu0 %vm10598_vm2, %v10597_v28  ;;  %9504 = vmatpush3.bf16.msra.mxu0 %v9962_v52 }
 0xf8e   : > { %9505 = vmatprep.subr.bf16.mxu0 %v10597_v28 }
0x104c   : > { %v3088_v29 = vpop.f32.mrf.mxu0 }
0x104d   : > { %v3094_v31 = vpack.c.bf16 %v3088_v29, %v3088_v29 }
0x104e   : > { %v9495_v32 = vpop.f32.mrf.mxu0 }
0x104f   : > { %9500 = vmatmul.mubr.msk.bf16.vlgmr.msra.gmra.mxu1 %vm1769_vm4, %v3094_v31 }
0x1050   : > { %v3091_v33 = vpop.f32.mrf.mxu0  ;;  %9531 = vmatprep.mubr.msk.bf16.mxu1 %vm10598_vm2, %v10597_v28  ;;  %9516 = vmatpush3.bf16.msra.mxu1 %v9966_v2 }
0x1051   : > { %9517 = vmatprep.subr.bf16.mxu1 %v10597_v28 }
0x1052   : > { %v9496_v34 = vpop.f32.mrf.mxu0 }
0x1054   : > { %9518 = vmatpush3.bf16.msra.mxu1 %v9967_v46 }
0x1055   : > { %9519 = vmatprep.subr.bf16.mxu1 %v10597_v28 }
0x1058   : > { %9520 = vmatpush3.bf16.msra.mxu1 %v9968_v3 }
0x1059   : > { %9521 = vmatprep.subr.bf16.mxu1 %v10597_v28 }
0x105c   : > { %9522 = vmatpush3.bf16.msra.mxu1 %v9969_v4 }
0x105d   : > { %9523 = vmatprep.subr.bf16.mxu1 %v10597_v28 }
0x1060   : > { %9524 = vmatpush3.bf16.msra.mxu1 %v9970_v5  ;;  %v8401_v5 = vld [vmem:[%s10636_s25 + $0x1] ss:$0 sm:$0xff] }
0x1061   : > { %9525 = vmatprep.subr.bf16.mxu1 %v10597_v28 }
0x1064   : > { %9526 = vmatpush3.bf16.msra.mxu1 %v9971_v6 }
0x1065   : > { %9527 = vmatprep.subr.bf16.mxu1 %v10597_v28 }
0x1068   : > { %9528 = vmatpush3.bf16.msra.mxu1 %v9972_v7  ;;  %v8402_v7 = vld [vmem:[%s10641_s29 + $0x1] ss:$0 sm:$0xff] }
0x1069   : > { %9529 = vmatprep.subr.bf16.mxu1 %v10597_v28 }
0x106c   : > { %9530 = vmatpush3.bf16.msra.mxu1 %v9973_v8 }
0x106d   : > { %9559 = vmatprep.subr.bf16.mxu1 %v10597_v28 }
0x110f   : > { %v3141_v35 = vpop.f32.mrf.mxu1 }
0x1110   : > { %v3147_v36 = vadd.f32 %v3141_v35, %v2742_v60  ;;  %v8382_v60 = vld [vmem:[%s11989_s1] ss:$0 sm:$0xff]  ;;  %v10600_v35 = vmov -1.0  }
0x1111   : > { %v9501_v39 = vpop.f32.mrf.mxu1 }
0x1112   : > { %v3148_v40 = vadd.f32 %v3147_v36, %v10875_v19  ;;  %v9963_v19 = vld [vmem:[%s11988_s18 + $0x10] sm:$0xff]  }
0x1113   : > { %v3144_v42 = vpop.f32.mrf.mxu1  ;;  %9506 = vmatpush3.bf16.msra.mxu0 %v9963_v19 }
0x1114   : > { %v11131_v43 = vadd.f32 %v8381_v38, %v3148_v40  ;;  %9507 = vmatprep.subr.bf16.mxu0 %v10597_v28 }
0x1115   : > { %v9502_v44 = vpop.f32.mrf.mxu1 }
0x1116   : > { %v3159_v45 = vsel %vm1496_vm1, %v11131_v43, 0.0 }
0x1117   : > { %3160 = vadd.xlane.f32.xlu0 %v3159_v45  ;;  %9508 = vmatpush3.bf16.msra.mxu0 %v9964_v53  ;;  %v8390_v45 = vld [vmem:[%s11993_s13] ss:$0 sm:$0xff] }
0x1118   : > { %9509 = vmatprep.subr.bf16.mxu0 %v10597_v28 }
0x111b   : > { %9510 = vmatpush3.bf16.msra.mxu0 %v9965_v54 }
0x111c   : > { %9535 = vmatprep.subr.bf16.mxu0 %v10597_v28 }
0x11a0   : > { %v3161_v47 = vpop.xlane.xlu0 %3160 }
0x11a1   : > { %v3162_v48 = vmul.f32 0.015625, %v3161_v47 }
0x11a3   : > { %v3163_v49 = vsub.f32 %v11131_v43, %v3162_v48 }
0x11a5   : > { %v3164_v50 = vmul.f32 %v3163_v49, %v3163_v49 }
0x11a7   : > { %v3165_v51 = vsel %vm1496_vm1, %v3164_v50, 0.0 }
0x11a8   : > { %3166 = vadd.xlane.f32.xlu1 %v3165_v51 }
0x1231   : > { %v3167_v55 = vpop.xlane.xlu1 %3166 }
0x1232   : > { %v3168_v56 = vmul.f32 0.015625, %v3167_v55 }
0x1234   : > { %v3169_v57 = vadd.f32 1e-06, %v3168_v56 }
0x1236   : > { %10472 = vrsqrt.f32 %v3169_v57 }
0x1243   : > { %v10473_v59 = vpop.eup %10472 }
0x1244   : > { %v3171_v61 = vmul.f32 %v10473_v59, %v3163_v49  ;;  %v9975_v59 = vld [vmem:[%s10656_s14 + $0x98] sm:$0xff]  }
0x1246   : > { %v3178_v63 = vmul.f32 %v8382_v60, %v3171_v61  ;;  %v9976_v60 = vld [vmem:[%s11981_s3 + $0x90] sm:$0xff]  }
0x1247   : > { %v9977_v61 = vld [vmem:[%s10656_s14 + $0x90] sm:$0xff]  }
0x1248   : > { %v3185_v0 = vadd.f32 %v8383_v62, %v3178_v63  ;;  %v9978_v62 = vld [vmem:[%s11981_s3 + $0x88] sm:$0xff]  }
0x1249   : > { %v9979_v63 = vld [vmem:[%s10656_s14 + $0x88] sm:$0xff]  }
0x124a   : > { %v3186_v1 = vpack.c.bf16 %v3185_v0, %v3185_v0  ;;  %v9980_v0 = vld [vmem:[%s11981_s3 + $0x80] sm:$0xff]  }
0x124c   : > { %9512 = vmatmul.mubr.msk.bf16.vlgmr.msra.gmra.mxu0 %vm1565_vm3, %v3186_v1  ;;  %v9981_v1 = vld [vmem:[%s10656_s14 + $0x80] sm:$0xff]  }
0x124d   : > { %9543 = vmatprep.mubr.msk.bf16.mxu0 %vm10598_vm2, %v10597_v28 }
0x130c   : > { %v3263_v10 = vpop.f32.mrf.mxu0 }
0x130d   : > { %v3264_v58 = vadd.f32 %v8384_v9, %v3263_v10  ;;  %v9982_v10 = vld [vmem:[%s11978_s8 + $0x98] sm:$0xff]  }
0x130e   : > { %v9513_v12 = vpop.f32.mrf.mxu0 }
0x130f   : > { %v3270_v13 = vmul.f32 0.70710677, %v3264_v58  ;;  %v3269_v39 = vmul.f32 0.5, %v3264_v58  ;;  %v9983_v12 = vld [vmem:[%s11978_s8 + $0x90] sm:$0xff]  }
0x1310   : > { %v3266_v41 = vpop.f32.mrf.mxu0 }
0x1311   : > { %v3273_v14 = vand.u32 2147483647, %v3270_v13  ;;  %vm3271_vm9 = vcmp.ge.f32.partialorder %v3270_v13, 0.0  ;;  %v9984_v13 = vld [vmem:[%s11978_s8 + $0x88] sm:$0xff]   ;;  %v9985_v41 = vld [vmem:[%s11978_s8 + $0x80] sm:$0xff]  }
0x1312   : > { %v9514_v15 = vpop.f32.mrf.mxu0  ;;  %v3272_v36 = vsel %vm3271_vm9, 1.0, %v10600_v35 }
0x1313   : > { %v3274_v37 = vmul.f32 0.3275911, %v3273_v14  ;;  %v3287_v17 = vsub.f32 0.0, %v3273_v14 }
0x1315   : > { %v3275_v16 = vadd.f32 1.0, %v3274_v37  ;;  %v3288_v18 = vmul.f32 %v3287_v17, %v3273_v14  ;;  %v8442_v14 = vld [vmem:[%s10671_s30 + $0x4] ss:$0 sm:$0xff] }
0x1317   : > { %10474 = vrcp.f32 %v3275_v16  ;;  %v3289_v22 = vmul.f32 1.442695, %v3288_v18 }
0x1319   : > { %10476 = vpow2.f32 %v3289_v22 }
0x1324   : > { %v10475_v20 = vpop.eup %10474 }
0x1325   : > { %v3278_v21 = vmul.f32 1.0614054, %v10475_v20 }
0x1326   : > { %v10477_v32 = vpop.eup %10476 }
0x1327   : > { %v3279_v23 = vadd.f32 -1.4531521, %v3278_v21 }
0x1329   : > { %v3280_v24 = vmul.f32 %v10475_v20, %v3279_v23 }
0x132b   : > { %v3281_v11 = vadd.f32 1.4214138, %v3280_v24 }
0x132d   : > { %v3282_v25 = vmul.f32 %v10475_v20, %v3281_v11 }
0x132f   : > { %v3283_v26 = vadd.f32 -0.28449672, %v3282_v25  ;;  %v8427_v25 = vld [vmem:[%s10666_s24 + $0x4] ss:$0 sm:$0xff] }
0x1331   : > { %v3284_v27 = vmul.f32 %v10475_v20, %v3283_v26 }
0x1333   : > { %v3285_v29 = vadd.f32 0.2548296, %v3284_v27 }
0x1335   : > { %v3286_v31 = vmul.f32 %v10475_v20, %v3285_v29 }
0x1337   : > { %v3291_v33 = vmul.f32 %v10477_v32, %v3286_v31  ;;  %v8412_v32 = vld [vmem:[%s10661_s19 + $0x4] ss:$0 sm:$0xff] }
0x1339   : > { %v3292_v34 = vsub.f32 1.0, %v3291_v33 }
0x133b   : > { %v3293_v38 = vmul.f32 %v3292_v34, %v3272_v36 }
0x133d   : > { %v3294_v40 = vadd.f32 1.0, %v3293_v38 }
0x133f   : > { %v3295_v42 = vmul.f32 %v3294_v40, %v3269_v39  ;;  %v9986_v39 = vld [vmem:[%s11981_s3 + $0xb8] sm:$0xff]  }
0x1341   : > { %v3296_v44 = vpack.c.bf16 %v3295_v42, %v3295_v42  ;;  %v9987_v42 = vld [vmem:[%s11981_s3 + $0xb0] sm:$0xff]  }
0x1343   : > { %9532 = vmatmul.mubr.bf16.vlgmr.msra.gmra.mxu1 %v3296_v44  ;;  %v9988_v44 = vld [vmem:[%s11981_s3 + $0xa8] sm:$0xff]  }
0x1344   : > { %9567 = vmatprep.mubr.msk.bf16.mxu1 %vm10598_vm2, %v10597_v28  ;;  %9560 = vmatpush3.bf16.msra.mxu1 %v9975_v59 }
0x1345   : > { %9561 = vmatprep.subr.bf16.mxu1 %v10597_v28 }
0x1348   : > { %9562 = vmatpush3.bf16.msra.mxu1 %v9977_v61 }
0x1349   : > { %9563 = vmatprep.subr.bf16.mxu1 %v10597_v28 }
0x134c   : > { %9564 = vmatpush3.bf16.msra.mxu1 %v9979_v63 }
0x134d   : > { %9565 = vmatprep.subr.bf16.mxu1 %v10597_v28 }
0x1350   : > { %9566 = vmatpush3.bf16.msra.mxu1 %v9981_v1 }
0x1351   : > { %9577 = vmatprep.subr.bf16.mxu1 %v10597_v28 }
0x1403   : > { %v3402_v47 = vpop.f32.mrf.mxu1 }
0x1404   : > { %v3403_v48 = vadd.f32 %v8390_v45, %v3402_v47  ;;  %v9989_v45 = vld [vmem:[%s11981_s3 + $0xa0] sm:$0xff]   ;;  %v9990_v47 = vld [vmem:[%s10656_s14 + $0xb8] sm:$0xff]  }
0x1405   : > { %v9533_v49 = vpop.f32.mrf.mxu1 }
0x1406   : > { %v11172_v50 = vadd.f32 %v3403_v48, %v11131_v43  ;;  %v9974_v43 = vld [vmem:[%s11981_s3 + $0x98] sm:$0xff]   ;;  %v9991_v48 = vld [vmem:[%s10656_s14 + $0xb0] sm:$0xff]   ;;  %v9992_v49 = vld [vmem:[%s10656_s14 + $0xa8] sm:$0xff]  }
0x1407   : > { %v3405_v51 = vpop.f32.mrf.mxu1  ;;  %9536 = vmatpush3.bf16.msra.mxu0 %v9974_v43 }
0x1408   : > { %v3413_v52 = vsel %vm1496_vm1, %v11172_v50, 0.0  ;;  %9537 = vmatprep.subr.bf16.mxu0 %v10597_v28  ;;  %v9993_v51 = vld [vmem:[%s10656_s14 + $0xa0] sm:$0xff]  }
0x1409   : > { %3414 = vadd.xlane.f32.xlu0 %v3413_v52  ;;  %v9534_v19 = vpop.f32.mrf.mxu1 }
0x140b   : > { %9538 = vmatpush3.bf16.msra.mxu0 %v9976_v60 }
0x140c   : > { %9539 = vmatprep.subr.bf16.mxu0 %v10597_v28 }
0x140f   : > { %9540 = vmatpush3.bf16.msra.mxu0 %v9978_v62 }
0x1410   : > { %9541 = vmatprep.subr.bf16.mxu0 %v10597_v28 }
0x1413   : > { %9542 = vmatpush3.bf16.msra.mxu0 %v9980_v0 }
0x1414   : > { %9547 = vmatprep.subr.bf16.mxu0 %v10597_v28 }
0x1492   : > { %v3415_v53 = vpop.xlane.xlu0 %3414 }
0x1493   : > { %v3416_v54 = vmul.f32 0.015625, %v3415_v53 }
0x1495   : > { %v3417_v55 = vsub.f32 %v11172_v50, %v3416_v54 }
0x1497   : > { %v3418_v56 = vmul.f32 %v3417_v55, %v3417_v55 }
0x1499   : > { %v3419_v57 = vsel %vm1496_vm1, %v3418_v56, 0.0 }
0x149a   : > { %3420 = vadd.xlane.f32.xlu1 %v3419_v57 }
0x1523   : > { %v3421_v2 = vpop.xlane.xlu1 %3420 }
0x1524   : > { %v3422_v46 = vmul.f32 0.015625, %v3421_v2 }
0x1526   : > { %v3423_v3 = vadd.f32 1e-06, %v3422_v46 }
0x1528   : > { %10478 = vrsqrt.f32 %v3423_v3 }
0x1535   : > { %v10479_v4 = vpop.eup %10478 }
0x1536   : > { %v3425_v6 = vmul.f32 %v10479_v4, %v3417_v55 }
0x1538   : > { %v3432_v8 = vmul.f32 %v8401_v5, %v3425_v6 }
0x153a   : > { %v3439_v9 = vadd.f32 %v8402_v7, %v3432_v8  ;;  %v9994_v8 = vld [vmem:[%s11978_s8 + $0xb8] sm:$0xff]  }
0x153c   : > { %v11197_v58 = vpack.c.bf16 %v3439_v9, %v3439_v9 }
0x153e   : > { %9544 = vmatmul.mubr.msk.bf16.vlgmr.msra.gmra.mxu0 %vm1565_vm3, %v11197_v58  ;;  %9568 = vmatmul.mubr.msk.bf16.vlgmr.msra.gmra.mxu1 %vm1565_vm3, %v11197_v58 }
0x153f   : > { %9548 = vmatpush3.bf16.msra.mxu0 %v9982_v10  ;;  %9555 = vmatprep.mubr.msk.bf16.mxu0 %vm10598_vm2, %v10597_v28  ;;  %v9995_v10 = vld [vmem:[%s11978_s8 + $0xb0] sm:$0xff]  }
0x1540   : > { %9549 = vmatprep.subr.bf16.mxu0 %v10597_v28  ;;  %9579 = vmatprep.mubr.msk.bf16.mxu1 %vm10598_vm2, %v10597_v28 }
0x1543   : > { %9550 = vmatpush3.bf16.msra.mxu0 %v9983_v12  ;;  %v9996_v12 = vld [vmem:[%s11978_s8 + $0xa8] sm:$0xff]  }
0x1544   : > { %9551 = vmatprep.subr.bf16.mxu0 %v10597_v28 }
0x1547   : > { %9552 = vmatpush3.bf16.msra.mxu0 %v9984_v13  ;;  %v9997_v13 = vld [vmem:[%s11978_s8 + $0xa0] sm:$0xff]  }
0x1548   : > { %9553 = vmatprep.subr.bf16.mxu0 %v10597_v28 }
0x154b   : > { %9554 = vmatpush3.bf16.msra.mxu0 %v9985_v41 }
0x154c   : > { %9571 = vmatprep.subr.bf16.mxu0 %v10597_v28 }
0x154e   : > { %9556 = vmatmul.mubr.msk.bf16.vlgmr.msra.gmra.mxu0 %vm1565_vm3, %v11197_v58 }
0x154f   : > { %9573 = vmatprep.mubr.msk.bf16.mxu0 %vm10598_vm2, %v10597_v28 }
0x15fe   : > { %v3519_v15 = vpop.f32.mrf.mxu0  ;;  %v3681_v37 = vpop.f32.mrf.mxu1 }
0x15ff   : > { %v3682_v16 = vadd.f32 %v8442_v14, %v3681_v37  ;;  %v3520_v38 = vadd.f32 %v8412_v32, %v3519_v15 }
0x1600   : > { %v9545_v17 = vpop.f32.mrf.mxu0  ;;  %v9569_v18 = vpop.f32.mrf.mxu1 }
0x1601   : > { %v3748_v20 = vpack.c.bf16 %v3682_v16, %v3682_v16  ;;  %v3687_v40 = vpack.c.bf16 %v3520_v38, %v3520_v38  ;;  %v8476_v16 = vld [vmem:[%s10666_s24 + $0x5] ss:$0 sm:$0xff] }
0x1602   : > { %v3522_v21 = vpop.f32.mrf.mxu0  ;;  %v3684_v22 = vpop.f32.mrf.mxu1  ;;  %v8491_v18 = vld [vmem:[%s10671_s30 + $0x5] ss:$0 sm:$0xff] }
0x1603   : > { %v3753_v23 = vand.u32 %v3748_v20, %v10982_v30 }
0x1604   : > { %v9546_v24 = vpop.f32.mrf.mxu0  ;;  %v9570_v11 = vpop.f32.mrf.mxu1 }
0x1605   : > { %9578 = vmatpush3.bf16.msra.mxu1 %v3753_v23  ;;  %v8461_v23 = vld [vmem:[%s10661_s19 + $0x5] ss:$0 sm:$0xff] }
0x1606   : > { %9595 = vmatprep.subr.bf16.mxu1 %v10597_v28 }
0x160e   : > { %v3600_v26 = vpop.f32.mrf.mxu0 }
0x160f   : > { %v3601_v27 = vadd.f32 %v8427_v25, %v3600_v26 }
0x1610   : > { %v9557_v29 = vpop.f32.mrf.mxu0 }
0x1611   : > { %v3688_v31 = vpack.c.bf16 %v3601_v27, %v3601_v27 }
0x1612   : > { %v3603_v33 = vpop.f32.mrf.mxu0 }
0x1613   : > { %v3693_v34 = vsel %vm1769_vm4, %v3688_v31, 0 }
0x1614   : > { %v9558_v36 = vpop.f32.mrf.mxu0  ;;  %9572 = vmatpush3.bf16.xpose.msra.mxu0 %v3693_v34 }
0x1615   : > { %9583 = vmatprep.subr.bf16.mxu0 %v10597_v28 }
0x161b   : > { %9574 = vmatmul.mubr.msk.bf16.vlgmr.msra.gmra.mxu0 %vm1769_vm4, %v3687_v40 }
0x161c   : > { %9584 = vmatpush3.bf16.msra.mxu0 %v9986_v39  ;;  %9591 = vmatprep.mubr.msk.bf16.mxu0 %vm10598_vm2, %v10597_v28 }
0x161d   : > { %9585 = vmatprep.subr.bf16.mxu0 %v10597_v28 }
0x1620   : > { %9586 = vmatpush3.bf16.msra.mxu0 %v9987_v42 }
0x1621   : > { %9587 = vmatprep.subr.bf16.mxu0 %v10597_v28 }
0x1624   : > { %9588 = vmatpush3.bf16.msra.mxu0 %v9988_v44 }
0x1625   : > { %9589 = vmatprep.subr.bf16.mxu0 %v10597_v28 }
0x1628   : > { %9590 = vmatpush3.bf16.msra.mxu0 %v9989_v45 }
0x1629   : > { %9607 = vmatprep.subr.bf16.mxu0 %v10597_v28 }
0x162b   : > { %9592 = vmatmul.mubr.msk.bf16.vlgmr.msra.gmra.mxu0 %vm1565_vm3, %v11197_v58 }
0x162c   : > { %9608 = vmatpush3.bf16.msra.mxu0 %v9990_v47  ;;  %9615 = vmatprep.mubr.msk.bf16.mxu0 %vm10598_vm2, %v10597_v28 }
0x162d   : > { %9609 = vmatprep.subr.bf16.mxu0 %v10597_v28 }
0x1630   : > { %9610 = vmatpush3.bf16.msra.mxu0 %v9991_v48 }
0x1631   : > { %9611 = vmatprep.subr.bf16.mxu0 %v10597_v28 }
0x1634   : > { %9612 = vmatpush3.bf16.msra.mxu0 %v9992_v49  ;;  %v10003_v49 = vld [vmem:[%s11980_s6 + $0x28] sm:$0xff]  }
0x1635   : > { %9613 = vmatprep.subr.bf16.mxu0 %v10597_v28 }
0x1638   : > { %9614 = vmatpush3.bf16.msra.mxu0 %v9993_v51 }
0x1639   : > { %9631 = vmatprep.subr.bf16.mxu0 %v10597_v28 }
0x163b   : > { %9616 = vmatmul.mubr.msk.bf16.vlgmr.msra.gmra.mxu0 %vm1565_vm3, %v11197_v58 }
0x163c   : > { %9633 = vmatprep.mubr.msk.bf16.mxu0 %vm10598_vm2, %v10597_v28  ;;  %9632 = vmatpush3.bf16.msra.mxu0 %v10003_v49 }
0x163d   : > { %9643 = vmatprep.subr.bf16.mxu0 %v10597_v28 }
0x16db   : > { %v3729_v52 = vpop.f32.mrf.mxu0 }
0x16dc   : > { %v3735_v19 = vmul.f32 0.25, %v3729_v52 }
0x16dd   : > { %v9575_v53 = vpop.f32.mrf.mxu0 }
0x16de   : > { %v3736_v54 = vsel %vm1817_vm7, %v3735_v19, -inf  ;;  %v9998_v53 = vld [vmem:[%s11980_s6 + $0x20] sm:$0xff]  }
0x16df   : > { %3737 = vmax.xlane.f32.xlu0 %v3736_v54  ;;  %v3732_v55 = vpop.f32.mrf.mxu0 }
0x16e0   : > { %v9999_v55 = vld [vmem:[%s11978_s8 + $0xd8] sm:$0xff]  }
0x16e1   : > { %v9576_v56 = vpop.f32.mrf.mxu0 }
0x16eb   : > { %v3874_v57 = vpop.f32.mrf.mxu0 }
0x16ec   : > { %v3875_v27 = vadd.f32 %v8461_v23, %v3874_v57  ;;  %v10000_v57 = vld [vmem:[%s11978_s8 + $0xd0] sm:$0xff]  }
0x16ed   : > { %v9593_v43 = vpop.f32.mrf.mxu0 }
0x16ee   : > { %v4042_v31 = vpack.c.bf16 %v3875_v27, %v3875_v27  ;;  %v10001_v43 = vld [vmem:[%s11978_s8 + $0xc8] sm:$0xff]  }
0x16ef   : > { %v3877_v59 = vpop.f32.mrf.mxu0 }
0x16f0   : > { %v10002_v59 = vld [vmem:[%s11978_s8 + $0xc0] sm:$0xff]  }
0x16f1   : > { %v9594_v60 = vpop.f32.mrf.mxu0 }
0x16fb   : > { %v4036_v61 = vpop.f32.mrf.mxu0 }
0x16fc   : > { %v4037_v24 = vadd.f32 %v8491_v18, %v4036_v61  ;;  %v10004_v61 = vld [vmem:[%s11981_s3 + $0xd8] sm:$0xff]  }
0x16fd   : > { %v9617_v62 = vpop.f32.mrf.mxu0 }
0x16fe   : > { %v4103_v29 = vpack.c.bf16 %v4037_v24, %v4037_v24  ;;  %v8514_v24 = vld [vmem:[%s10661_s19 + $0x6] ss:$0 sm:$0xff] }
0x16ff   : > { %v4039_v63 = vpop.f32.mrf.mxu0 }
0x1700   : > { %v4108_v32 = vand.u32 %v4103_v29, %v10982_v30 }
0x1701   : > { %v9618_v0 = vpop.f32.mrf.mxu0 }
0x1768   : > { %v3738_v1 = vpop.xlane.xlu0 %3737 }
0x1769   : > { %v3739_v2 = vsub.f32 %v3735_v19, %v3738_v1  ;;  %v10005_v1 = vld [vmem:[%s11981_s3 + $0xd0] sm:$0xff]  }
0x176b   : > { %v3740_v46 = vmul.f32 1.442695, %v3739_v2 }
0x176d   : > { %10480 = vpow2.f32 %v3740_v46 }
0x177a   : > { %v10481_v3 = vpop.eup %10480 }
0x177b   : > { %v3742_v4 = vsel %vm1817_vm7, %v10481_v3, 0.0 }
0x177c   : > { %3743 = vadd.xlane.f32.xlu1 %v3742_v4 }
0x1805   : > { %v3744_v5 = vpop.xlane.xlu1 %3743 }
0x1806   : > { %10482 = vrcp.f32 %v3744_v5 }
0x1813   : > { %v10483_v6 = vpop.eup %10482 }
0x1814   : > { %v3746_v7 = vmul.f32 %v10483_v6, %v10481_v3  ;;  %v10006_v3 = vld [vmem:[%s11981_s3 + $0xc8] sm:$0xff]   ;;  %v10007_v6 = vld [vmem:[%s11981_s3 + $0xc0] sm:$0xff]  }
0x1816   : > { %v3747_v9 = vpack.c.bf16 %v3746_v7, %v3746_v7 }
0x1818   : > { %9580 = vmatmul.mubr.msk.bf16.vlgmr.msra.gmra.mxu1 %vm1831_vm8, %v3747_v9  ;;  %v10009_v9 = vld [vmem:[%s10656_s14 + $0xd0] sm:$0xff]  }
0x1819   : > { %9596 = vmatpush3.bf16.msra.mxu1 %v9994_v8  ;;  %9603 = vmatprep.mubr.msk.bf16.mxu1 %vm10598_vm2, %v10597_v28  ;;  %v10008_v8 = vld [vmem:[%s10656_s14 + $0xd8] sm:$0xff]  }
0x181a   : > { %9597 = vmatprep.subr.bf16.mxu1 %v10597_v28 }
0x181d   : > { %9598 = vmatpush3.bf16.msra.mxu1 %v9995_v10  ;;  %v8529_v10 = vld [vmem:[%s10666_s24 + $0x6] ss:$0 sm:$0xff] }
0x181e   : > { %9599 = vmatprep.subr.bf16.mxu1 %v10597_v28 }
0x1821   : > { %9600 = vmatpush3.bf16.msra.mxu1 %v9996_v12 }
0x1822   : > { %9601 = vmatprep.subr.bf16.mxu1 %v10597_v28 }
0x1825   : > { %9602 = vmatpush3.bf16.msra.mxu1 %v9997_v13  ;;  %v10010_v13 = vld [vmem:[%s10656_s14 + $0xc8] sm:$0xff]  }
0x1826   : > { %9619 = vmatprep.subr.bf16.mxu1 %v10597_v28 }
0x1828   : > { %9604 = vmatmul.mubr.msk.bf16.vlgmr.msra.gmra.mxu1 %vm1565_vm3, %v11197_v58 }
0x1829   : > { %9621 = vmatprep.mubr.msk.bf16.mxu1 %vm10598_vm2, %v10597_v28 }
0x18d8   : > { %v3789_v41 = vpop.f32.mrf.mxu1 }
0x18d9   : > { %v3795_v56 = vpack.c.bf16 %v3789_v41, %v3789_v41 }
0x18da   : > { %v9581_v14 = vpop.f32.mrf.mxu1 }
0x18dc   : > { %v3792_v15 = vpop.f32.mrf.mxu1 }
0x18de   : > { %v9582_v37 = vpop.f32.mrf.mxu1 }
0x18e8   : > { %v3955_v17 = vpop.f32.mrf.mxu1 }
0x18e9   : > { %v3956_v20 = vadd.f32 %v8476_v16, %v3955_v17  ;;  %v10011_v16 = vld [vmem:[%s10656_s14 + $0xc0] sm:$0xff]  }
0x18ea   : > { %v9605_v21 = vpop.f32.mrf.mxu1 }
0x18eb   : > { %v4043_v22 = vpack.c.bf16 %v3956_v20, %v3956_v20 }
0x18ec   : > { %v3958_v11 = vpop.f32.mrf.mxu1 }
0x18ed   : > { %v4048_v25 = vsel %vm1769_vm4, %v4043_v22, 0 }
0x18ee   : > { %v9606_v26 = vpop.f32.mrf.mxu1  ;;  %9620 = vmatpush3.bf16.xpose.msra.mxu1 %v4048_v25 }
0x18ef   : > { %9625 = vmatprep.subr.bf16.mxu1 %v10597_v28 }
0x18f5   : > { %9622 = vmatmul.mubr.msk.bf16.vlgmr.msra.gmra.mxu1 %vm1769_vm4, %v4042_v31 }
0x18f6   : > { %9626 = vmatpush3.bf16.msra.mxu1 %v4108_v32  ;;  %9627 = vmatprep.mubr.msk.bf16.mxu1 %vm10598_vm2, %v10597_v28  ;;  %v8544_v32 = vld [vmem:[%s10671_s30 + $0x6] ss:$0 sm:$0xff] }
0x18f7   : > { %9637 = vmatprep.subr.bf16.mxu1 %v10597_v28 }
0x19b5   : > { %v4084_v33 = vpop.f32.mrf.mxu1 }
0x19b6   : > { %v4090_v34 = vmul.f32 0.25, %v4084_v33 }
0x19b7   : > { %v9623_v36 = vpop.f32.mrf.mxu1 }
0x19b8   : > { %v4091_v38 = vsel %vm1817_vm7, %v4090_v34, -inf }
0x19b9   : > { %4092 = vmax.xlane.f32.xlu0 %v4091_v38  ;;  %v4087_v39 = vpop.f32.mrf.mxu1 }
0x19bb   : > { %v9624_v40 = vpop.f32.mrf.mxu1 }
0x1a42   : > { %v4093_v42 = vpop.xlane.xlu0 %4092 }
0x1a43   : > { %v4094_v44 = vsub.f32 %v4090_v34, %v4093_v42 }
0x1a45   : > { %v4095_v45 = vmul.f32 1.442695, %v4094_v44 }
0x1a47   : > { %10484 = vpow2.f32 %v4095_v45 }
0x1a54   : > { %v10485_v47 = vpop.eup %10484 }
0x1a55   : > { %v4097_v48 = vsel %vm1817_vm7, %v10485_v47, 0.0 }
0x1a56   : > { %4098 = vadd.xlane.f32.xlu1 %v4097_v48 }
0x1adf   : > { %v4099_v51 = vpop.xlane.xlu1 %4098 }
0x1ae0   : > { %10486 = vrcp.f32 %v4099_v51 }
0x1aed   : > { %v10487_v52 = vpop.eup %10486 }
0x1aee   : > { %v4101_v19 = vmul.f32 %v10487_v52, %v10485_v47 }
0x1af0   : > { %v4102_v54 = vpack.c.bf16 %v4101_v19, %v4101_v19 }
0x1af2   : > { %9628 = vmatmul.mubr.msk.bf16.vlgmr.msra.gmra.mxu1 %vm1831_vm8, %v4102_v54 }
0x1af3   : > { %9638 = vmatpush3.bf16.msra.mxu1 %v9998_v53  ;;  %9639 = vmatprep.mubr.msk.bf16.mxu1 %vm10598_vm2, %v10597_v28 }
0x1af4   : > { %9655 = vmatprep.subr.bf16.mxu1 %v10597_v28 }
0x1afa   : > { %9640 = vmatmul.mubr.msk.bf16.vlgmr.msra.gmra.mxu1 %vm1769_vm4, %v3795_v56  ;;  %v10020_v56 = vld [vmem:[%s11980_s6 + $0x30] sm:$0xff]  }
0x1afb   : > { %9656 = vmatpush3.bf16.msra.mxu1 %v9999_v55  ;;  %9663 = vmatprep.mubr.msk.bf16.mxu1 %vm10598_vm2, %v10597_v28 }
0x1afc   : > { %9657 = vmatprep.subr.bf16.mxu1 %v10597_v28 }
0x1aff   : > { %9658 = vmatpush3.bf16.msra.mxu1 %v10000_v57 }
0x1b00   : > { %9659 = vmatprep.subr.bf16.mxu1 %v10597_v28 }
0x1b03   : > { %9660 = vmatpush3.bf16.msra.mxu1 %v10001_v43 }
0x1b04   : > { %9661 = vmatprep.subr.bf16.mxu1 %v10597_v28 }
0x1b07   : > { %9662 = vmatpush3.bf16.msra.mxu1 %v10002_v59 }
0x1b08   : > { %9679 = vmatprep.subr.bf16.mxu1 %v10597_v28 }
0x1b0a   : > { %9664 = vmatmul.mubr.msk.bf16.vlgmr.msra.gmra.mxu1 %vm1565_vm3, %v11197_v58 }
0x1b0b   : > { %9681 = vmatprep.mubr.msk.bf16.mxu1 %vm10598_vm2, %v10597_v28 }
0x1bb2   : > { %v4144_v60 = vpop.f32.mrf.mxu1 }
0x1bb3   : > { %v4150_v62 = vpack.c.bf16 %v4144_v60, %v4144_v60  ;;  %v10012_v60 = vld [vmem:[%s11981_s3 + $0xf8] sm:$0xff]  }
0x1bb4   : > { %v9629_v63 = vpop.f32.mrf.mxu1 }
0x1bb5   : > { %9634 = vmatmul.mubr.msk.bf16.vlgmr.msra.gmra.mxu0 %vm1769_vm4, %v4150_v62  ;;  %v10013_v62 = vld [vmem:[%s11981_s3 + $0xf0] sm:$0xff]   ;;  %v10014_v63 = vld [vmem:[%s11981_s3 + $0xe8] sm:$0xff]  }
0x1bb6   : > { %9644 = vmatpush3.bf16.msra.mxu0 %v10004_v61  ;;  %v4147_v0 = vpop.f32.mrf.mxu1  ;;  %9651 = vmatprep.mubr.msk.bf16.mxu0 %vm10598_vm2, %v10597_v28 }
0x1bb7   : > { %9645 = vmatprep.subr.bf16.mxu0 %v10597_v28  ;;  %v10015_v0 = vld [vmem:[%s11981_s3 + $0xe0] sm:$0xff]   ;;  %s11995_s3 = sld [smem:[#allocation22_spill]] }
0x1bb8   : > { %v9630_v2 = vpop.f32.mrf.mxu1 }
0x1bb9   : > { %v10017_v2 = vld [vmem:[%s10656_s14 + $0xf0] sm:$0xff]  }
0x1bba   : > { %9646 = vmatpush3.bf16.msra.mxu0 %v10005_v1  ;;  %v11309_v46 = vpop.f32.mrf.mxu1  ;;  %v10016_v1 = vld [vmem:[%s10656_s14 + $0xf8] sm:$0xff]  }
0x1bbb   : > { %9647 = vmatprep.subr.bf16.mxu0 %v10597_v28 }
0x1bbc   : > { %v9641_v4 = vpop.f32.mrf.mxu1 }
0x1bbd   : > { %v10019_v4 = vld [vmem:[%s10656_s14 + $0xe0] sm:$0xff]  }
0x1bbe   : > { %9648 = vmatpush3.bf16.msra.mxu0 %v10006_v3  ;;  %v4249_v5 = vpop.f32.mrf.mxu1  ;;  %v10018_v3 = vld [vmem:[%s10656_s14 + $0xe8] sm:$0xff]  }
0x1bbf   : > { %9649 = vmatprep.subr.bf16.mxu0 %v10597_v28 }
0x1bc0   : > { %v9642_v7 = vpop.f32.mrf.mxu1 }
0x1bc2   : > { %9650 = vmatpush3.bf16.msra.mxu0 %v10007_v6  ;;  %v10021_v6 = vld [vmem:[%s11978_s8 + $0xf8] sm:$0xff]  }
0x1bc3   : > { %9667 = vmatprep.subr.bf16.mxu0 %v10597_v28 }
0x1bc5   : > { %9652 = vmatmul.mubr.msk.bf16.vlgmr.msra.gmra.mxu0 %vm1565_vm3, %v11197_v58 }
0x1bc6   : > { %9668 = vmatpush3.bf16.msra.mxu0 %v10008_v8  ;;  %9675 = vmatprep.mubr.msk.bf16.mxu0 %vm10598_vm2, %v10597_v28 }
0x1bc7   : > { %9669 = vmatprep.subr.bf16.mxu0 %v10597_v28 }
0x1bca   : > { %v4408_v12 = vpop.f32.mrf.mxu1  ;;  %9670 = vmatpush3.bf16.msra.mxu0 %v10009_v9 }
0x1bcb   : > { %v4409_v41 = vadd.f32 %v8529_v10, %v4408_v12  ;;  %9671 = vmatprep.subr.bf16.mxu0 %v10597_v28  ;;  %v10022_v10 = vld [vmem:[%s11978_s8 + $0xf0] sm:$0xff]  }
0x1bcc   : > { %v9665_v14 = vpop.f32.mrf.mxu1 }
0x1bcd   : > { %v4496_v15 = vpack.c.bf16 %v4409_v41, %v4409_v41  ;;  %v10024_v41 = vld [vmem:[%s11978_s8 + $0xe0] sm:$0xff]  }
0x1bce   : > { %v4411_v37 = vpop.f32.mrf.mxu1  ;;  %9672 = vmatpush3.bf16.msra.mxu0 %v10010_v13  ;;  %v10023_v13 = vld [vmem:[%s11978_s8 + $0xe8] sm:$0xff]  }
0x1bcf   : > { %v4501_v17 = vsel %vm1769_vm4, %v4496_v15, 0  ;;  %9673 = vmatprep.subr.bf16.mxu0 %v10597_v28 }
0x1bd0   : > { %v9666_v18 = vpop.f32.mrf.mxu1  ;;  %9680 = vmatpush3.bf16.xpose.msra.mxu1 %v4501_v17 }
0x1bd1   : > { %9685 = vmatprep.subr.bf16.mxu1 %v10597_v28 }
0x1bd2   : > { %9674 = vmatpush3.bf16.msra.mxu0 %v10011_v16 }
0x1bd3   : > { %9691 = vmatprep.subr.bf16.mxu0 %v10597_v28 }
0x1bd5   : > { %9676 = vmatmul.mubr.msk.bf16.vlgmr.msra.gmra.mxu0 %vm1565_vm3, %v11197_v58 }
0x1bd6   : > { %9693 = vmatprep.mubr.msk.bf16.mxu0 %vm10598_vm2, %v10597_v28  ;;  %9692 = vmatpush3.bf16.msra.mxu0 %v10020_v56 }
0x1bd7   : > { %9709 = vmatprep.subr.bf16.mxu0 %v10597_v28 }
0x1c75   : > { %v11335_v20 = vpop.f32.mrf.mxu0 }
0x1c77   : > { %v9635_v21 = vpop.f32.mrf.mxu0 }
0x1c79   : > { %v4200_v22 = vpop.f32.mrf.mxu0 }
0x1c7b   : > { %v9636_v23 = vpop.f32.mrf.mxu0 }
0x1c7c   : > { %v4247_v23 = vadd.f32 %v11309_v46, %v11335_v20 }
0x1c85   : > { %v4327_v11 = vpop.f32.mrf.mxu0 }
0x1c86   : > { %v4328_v25 = vadd.f32 %v8514_v24, %v4327_v11 }
0x1c87   : > { %v9653_v26 = vpop.f32.mrf.mxu0 }
0x1c88   : > { %v4495_v27 = vpack.c.bf16 %v4328_v25, %v4328_v25 }
0x1c89   : > { %v4330_v29 = vpop.f32.mrf.mxu0 }
0x1c8a   : > { %9682 = vmatmul.mubr.msk.bf16.vlgmr.msra.gmra.mxu1 %vm1769_vm4, %v4495_v27 }
0x1c8b   : > { %v9654_v31 = vpop.f32.mrf.mxu0  ;;  %9687 = vmatprep.mubr.msk.bf16.mxu1 %vm10598_vm2, %v10597_v28 }
0x1c8c   : > { %v8595_v31 = vld [vmem:[%s10671_s30 + $0x7] ss:$0 sm:$0xff] }
0x1c95   : > { %v4489_v33 = vpop.f32.mrf.mxu0 }
0x1c96   : > { %v4490_v34 = vadd.f32 %v8544_v32, %v4489_v33 }
0x1c97   : > { %v9677_v36 = vpop.f32.mrf.mxu0 }
0x1c98   : > { %v4556_v38 = vpack.c.bf16 %v4490_v34, %v4490_v34  ;;  %v8565_v36 = vld [vmem:[%s10661_s19 + $0x7] ss:$0 sm:$0xff] }
0x1c99   : > { %v4492_v39 = vpop.f32.mrf.mxu0 }
0x1c9a   : > { %v4561_v40 = vand.u32 %v4556_v38, %v10982_v30 }
0x1c9b   : > { %v9678_v42 = vpop.f32.mrf.mxu0 }
0x1c9c   : > { %9686 = vmatpush3.bf16.msra.mxu1 %v4561_v40 }
0x1c9d   : > { %9697 = vmatprep.subr.bf16.mxu1 %v10597_v28 }
0x1d4a   : > { %v4537_v44 = vpop.f32.mrf.mxu1 }
0x1d4b   : > { %v4543_v45 = vmul.f32 0.25, %v4537_v44 }
0x1d4c   : > { %v9683_v47 = vpop.f32.mrf.mxu1 }
0x1d4d   : > { %v4544_v48 = vsel %vm1817_vm7, %v4543_v45, -inf }
0x1d4e   : > { %4545 = vmax.xlane.f32.xlu0 %v4544_v48  ;;  %v4540_v49 = vpop.f32.mrf.mxu1 }
0x1d50   : > { %v9684_v51 = vpop.f32.mrf.mxu1 }
0x1dd7   : > { %v4546_v52 = vpop.xlane.xlu0 %4545 }
0x1dd8   : > { %v4547_v19 = vsub.f32 %v4543_v45, %v4546_v52 }
0x1dda   : > { %v4548_v53 = vmul.f32 1.442695, %v4547_v19 }
0x1ddc   : > { %10488 = vpow2.f32 %v4548_v53 }
0x1de9   : > { %v10489_v54 = vpop.eup %10488 }
0x1dea   : > { %v4550_v55 = vsel %vm1817_vm7, %v10489_v54, 0.0 }
0x1deb   : > { %4551 = vadd.xlane.f32.xlu1 %v4550_v55 }
0x1e74   : > { %v4552_v57 = vpop.xlane.xlu1 %4551 }
0x1e75   : > { %10490 = vrcp.f32 %v4552_v57  ;;  %v10025_v57 = vld [vmem:[%s11980_s6 + $0x38] sm:$0xff]   ;;  %s11997_s6 = sld [smem:[#allocation19_spill]] }
0x1e82   : > { %v10491_v43 = vpop.eup %10490 }
0x1e83   : > { %v4554_v59 = vmul.f32 %v10491_v43, %v10489_v54 }
0x1e85   : > { %v4555_v61 = vpack.c.bf16 %v4554_v59, %v4554_v59 }
0x1e87   : > { %9688 = vmatmul.mubr.msk.bf16.vlgmr.msra.gmra.mxu1 %vm1831_vm8, %v4555_v61 }
0x1e88   : > { %9698 = vmatpush3.bf16.msra.mxu1 %v10012_v60  ;;  %9705 = vmatprep.mubr.msk.bf16.mxu1 %vm10598_vm2, %v10597_v28 }
0x1e89   : > { %9699 = vmatprep.subr.bf16.mxu1 %v10597_v28 }
0x1e8c   : > { %9700 = vmatpush3.bf16.msra.mxu1 %v10013_v62 }
0x1e8d   : > { %9701 = vmatprep.subr.bf16.mxu1 %v10597_v28 }
0x1e90   : > { %9702 = vmatpush3.bf16.msra.mxu1 %v10014_v63 }
0x1e91   : > { %9703 = vmatprep.subr.bf16.mxu1 %v10597_v28 }
0x1e94   : > { %9704 = vmatpush3.bf16.msra.mxu1 %v10015_v0 }
0x1e95   : > { %9721 = vmatprep.subr.bf16.mxu1 %v10597_v28 }
0x1e97   : > { %9706 = vmatmul.mubr.msk.bf16.vlgmr.msra.gmra.mxu1 %vm1565_vm3, %v11197_v58 }
0x1e98   : > { %9722 = vmatpush3.bf16.msra.mxu1 %v10016_v1  ;;  %9729 = vmatprep.mubr.msk.bf16.mxu1 %vm10598_vm2, %v10597_v28 }
0x1e99   : > { %9723 = vmatprep.subr.bf16.mxu1 %v10597_v28 }
0x1e9c   : > { %9724 = vmatpush3.bf16.msra.mxu1 %v10017_v2 }
0x1e9d   : > { %9725 = vmatprep.subr.bf16.mxu1 %v10597_v28 }
0x1ea0   : > { %9726 = vmatpush3.bf16.msra.mxu1 %v10018_v3 }
0x1ea1   : > { %9727 = vmatprep.subr.bf16.mxu1 %v10597_v28 }
0x1ea4   : > { %9728 = vmatpush3.bf16.msra.mxu1 %v10019_v4 }
0x1ea5   : > { %9745 = vmatprep.subr.bf16.mxu1 %v10597_v28 }
0x1ea7   : > { %9730 = vmatmul.mubr.msk.bf16.vlgmr.msra.gmra.mxu1 %vm1565_vm3, %v11197_v58 }
0x1ea8   : > { %9747 = vmatprep.mubr.msk.bf16.mxu1 %vm10598_vm2, %v10597_v28  ;;  %9746 = vmatpush3.bf16.msra.mxu1 %v10025_v57 }
0x1ea9   : > { %9763 = vmatprep.subr.bf16.mxu1 %v10597_v28 }
0x1f47   : > { %v4597_v5 = vpop.f32.mrf.mxu1 }
0x1f48   : > { %v4603_v7 = vpack.c.bf16 %v4597_v5, %v4597_v5  ;;  %v8608_v5 = vld [vmem:[%s11987_s10 + $0x1] ss:$0 sm:$0xff] }
0x1f49   : > { %v9689_v8 = vpop.f32.mrf.mxu1 }
0x1f4a   : > { %9694 = vmatmul.mubr.msk.bf16.vlgmr.msra.gmra.mxu0 %vm1769_vm4, %v4603_v7 }
0x1f4b   : > { %9710 = vmatpush3.bf16.msra.mxu0 %v10021_v6  ;;  %v4600_v9 = vpop.f32.mrf.mxu1  ;;  %9717 = vmatprep.mubr.msk.bf16.mxu0 %vm10598_vm2, %v10597_v28 }
0x1f4c   : > { %9711 = vmatprep.subr.bf16.mxu0 %v10597_v28 }
0x1f4d   : > { %v9690_v12 = vpop.f32.mrf.mxu1 }
0x1f4f   : > { %9712 = vmatpush3.bf16.msra.mxu0 %v10022_v10 }
0x1f50   : > { %9713 = vmatprep.subr.bf16.mxu0 %v10597_v28 }
0x1f53   : > { %9714 = vmatpush3.bf16.msra.mxu0 %v10023_v13 }
0x1f54   : > { %9715 = vmatprep.subr.bf16.mxu0 %v10597_v28 }
0x1f57   : > { %v4732_v14 = vpop.f32.mrf.mxu1  ;;  %9716 = vmatpush3.bf16.msra.mxu0 %v10024_v41 }
0x1f58   : > { %9733 = vmatprep.subr.bf16.mxu0 %v10597_v28  ;;  %v4733_v44 = vadd.f32 %v8565_v36, %v4732_v14  ;;  %v10034_v36 = vld [vmem:[%s11991_s5 + $0x58] sm:$0xff]  }
0x1f59   : > { %v9707_v15 = vpop.f32.mrf.mxu1 }
0x1f5a   : > { %9718 = vmatmul.mubr.msk.bf16.vlgmr.msra.gmra.mxu0 %vm1565_vm3, %v11197_v58  ;;  %v8580_v58 = vld [vmem:[%s10666_s24 + $0x7] ss:$0 sm:$0xff]  ;;  %v4900_v20 = vpack.c.bf16 %v4733_v44, %v4733_v44 }
0x1f5b   : > { %v4735_v37 = vpop.f32.mrf.mxu1  ;;  %9735 = vmatprep.mubr.msk.bf16.mxu0 %vm10598_vm2, %v10597_v28 }
0x1f5d   : > { %v9708_v16 = vpop.f32.mrf.mxu1 }
0x1f5e   : > { %v10026_v16 = vld [vmem:[%s11988_s18 + $0x38] sm:$0xff]  }
0x1f67   : > { %v4894_v17 = vpop.f32.mrf.mxu1 }
0x1f68   : > { %v4895_v38 = vadd.f32 %v8595_v31, %v4894_v17  ;;  %v10028_v17 = vld [vmem:[%s11988_s18 + $0x28] sm:$0xff]   ;;  %v10030_v31 = vld [vmem:[%s11991_s5 + $0x78] sm:$0xff]  }
0x1f69   : > { %v9731_v18 = vpop.f32.mrf.mxu1 }
0x1f6a   : > { %v4961_v46 = vpack.c.bf16 %v4895_v38, %v4895_v38  ;;  %v10029_v18 = vld [vmem:[%s11988_s18 + $0x20] sm:$0xff]   ;;  %v10035_v38 = vld [vmem:[%s11991_s5 + $0x50] sm:$0xff]  }
0x1f6b   : > { %v4897_v21 = vpop.f32.mrf.mxu1 }
0x1f6c   : > { %v4966_v45 = vand.u32 %v4961_v46, %v10982_v30 }
0x1f6d   : > { %v9732_v22 = vpop.f32.mrf.mxu1 }
0x200a   : > { %v4650_v24 = vpop.f32.mrf.mxu0 }
0x200b   : > { %v4656_v11 = vadd.f32 %v4650_v24, %v4247_v23 }
0x200c   : > { %v9695_v25 = vpop.f32.mrf.mxu0 }
0x200e   : > { %v4653_v26 = vpop.f32.mrf.mxu0 }
0x200f   : > { %v8612_v26 = vld [vmem:[%s11990_s7 + $0x1] ss:$0 sm:$0xff] }
0x2010   : > { %v9696_v27 = vpop.f32.mrf.mxu0 }
0x201a   : > { %v4813_v29 = vpop.f32.mrf.mxu0 }
0x201b   : > { %v4814_v32 = vadd.f32 %v8580_v58, %v4813_v29 }
0x201c   : > { %v9719_v33 = vpop.f32.mrf.mxu0 }
0x201d   : > { %v4901_v34 = vpack.c.bf16 %v4814_v32, %v4814_v32  ;;  %v10031_v32 = vld [vmem:[%s11991_s5 + $0x70] sm:$0xff]   ;;  %v10032_v33 = vld [vmem:[%s11991_s5 + $0x68] sm:$0xff]  }
0x201e   : > { %v4816_v39 = vpop.f32.mrf.mxu0 }
0x201f   : > { %v4906_v40 = vsel %vm1769_vm4, %v4901_v34, 0  ;;  %v10033_v34 = vld [vmem:[%s11991_s5 + $0x60] sm:$0xff]   ;;  %v10036_v39 = vld [vmem:[%s11991_s5 + $0x48] sm:$0xff]  }
0x2020   : > { %v9720_v42 = vpop.f32.mrf.mxu0  ;;  %9734 = vmatpush3.bf16.xpose.msra.mxu0 %v4906_v40  ;;  %v10037_v40 = vld [vmem:[%s11991_s5 + $0x40] sm:$0xff]   ;;  %s11996_s5 = sld [smem:[#allocation18_spill]] }
0x2021   : > { %9739 = vmatprep.subr.bf16.mxu0 %v10597_v28  ;;  %v8622_v42 = vld [vmem:[%s11992_s9 + $0x1] ss:$0 sm:$0xff]  ;;  %s10602_s9 = smov [#allocation2]  }
0x2027   : > { %9736 = vmatmul.mubr.msk.bf16.vlgmr.msra.gmra.mxu0 %vm1769_vm4, %v4900_v20 }
0x2028   : > { %9740 = vmatpush3.bf16.msra.mxu0 %v4966_v45  ;;  %9741 = vmatprep.mubr.msk.bf16.mxu0 %vm10598_vm2, %v10597_v28 }
0x2029   : > { %9751 = vmatprep.subr.bf16.mxu0 %v10597_v28 }
0x20e7   : > { %v4942_v47 = vpop.f32.mrf.mxu0 }
0x20e8   : > { %v4948_v48 = vmul.f32 0.25, %v4942_v47 }
0x20e9   : > { %v9737_v49 = vpop.f32.mrf.mxu0 }
0x20ea   : > { %v4949_v51 = vsel %vm1817_vm7, %v4948_v48, -inf }
0x20eb   : > { %4950 = vmax.xlane.f32.xlu0 %v4949_v51  ;;  %v4945_v52 = vpop.f32.mrf.mxu0 }
0x20ed   : > { %v9738_v19 = vpop.f32.mrf.mxu0 }
0x2174   : > { %v4951_v53 = vpop.xlane.xlu0 %4950 }
0x2175   : > { %v4952_v54 = vsub.f32 %v4948_v48, %v4951_v53 }
0x2177   : > { %v4953_v30 = vmul.f32 1.442695, %v4952_v54 }
0x2179   : > { %10492 = vpow2.f32 %v4953_v30 }
0x2186   : > { %v10493_v55 = vpop.eup %10492 }
0x2187   : > { %v4955_v56 = vsel %vm1817_vm7, %v10493_v55, 0.0 }
0x2188   : > { %4956 = vadd.xlane.f32.xlu1 %v4955_v56 }
0x2211   : > { %v4957_v43 = vpop.xlane.xlu1 %4956 }
0x2212   : > { %10494 = vrcp.f32 %v4957_v43 }
0x221f   : > { %v10495_v59 = vpop.eup %10494 }
0x2220   : > { %v4959_v60 = vmul.f32 %v10495_v59, %v10493_v55 }
0x2222   : > { %v4960_v61 = vpack.c.bf16 %v4959_v60, %v4959_v60 }
0x2224   : > { %9742 = vmatmul.mubr.msk.bf16.vlgmr.msra.gmra.mxu0 %vm1831_vm8, %v4960_v61 }
0x2225   : > { %9759 = vmatprep.mubr.msk.bf16.mxu0 %vm10598_vm2, %v10597_v28  ;;  %9752 = vmatpush3.bf16.msra.mxu0 %v10026_v16 }
0x2226   : > { %9753 = vmatprep.subr.bf16.mxu0 %v10597_v28 }
0x22e4   : > { %v5002_v62 = vpop.f32.mrf.mxu0 }
0x22e5   : > { %v5008_v63 = vpack.c.bf16 %v5002_v62, %v5002_v62 }
0x22e6   : > { %v9743_v0 = vpop.f32.mrf.mxu0 }
0x22e7   : > { %9748 = vmatmul.mubr.msk.bf16.vlgmr.msra.gmra.mxu1 %vm1769_vm4, %v5008_v63 }
0x22e8   : > { %v5005_v1 = vpop.f32.mrf.mxu0  ;;  %9779 = vmatprep.mubr.msk.bf16.mxu1 %vm10598_vm2, %v10597_v28  ;;  %9764 = vmatpush3.bf16.msra.mxu1 %v10030_v31 }
0x22e9   : > { %9765 = vmatprep.subr.bf16.mxu1 %v10597_v28 }
0x22ea   : > { %v9744_v2 = vpop.f32.mrf.mxu0 }
0x22ec   : > { %9766 = vmatpush3.bf16.msra.mxu1 %v10031_v32 }
0x22ed   : > { %9767 = vmatprep.subr.bf16.mxu1 %v10597_v28 }
0x22f0   : > { %9768 = vmatpush3.bf16.msra.mxu1 %v10032_v33 }
0x22f1   : > { %9769 = vmatprep.subr.bf16.mxu1 %v10597_v28 }
0x22f4   : > { %9770 = vmatpush3.bf16.msra.mxu1 %v10033_v34 }
0x22f5   : > { %9771 = vmatprep.subr.bf16.mxu1 %v10597_v28 }
0x22f8   : > { %9772 = vmatpush3.bf16.msra.mxu1 %v10034_v36 }
0x22f9   : > { %9773 = vmatprep.subr.bf16.mxu1 %v10597_v28 }
0x22fc   : > { %9774 = vmatpush3.bf16.msra.mxu1 %v10035_v38 }
0x22fd   : > { %9775 = vmatprep.subr.bf16.mxu1 %v10597_v28 }
0x2300   : > { %9776 = vmatpush3.bf16.msra.mxu1 %v10036_v39 }
0x2301   : > { %9777 = vmatprep.subr.bf16.mxu1 %v10597_v28 }
0x2304   : > { %9778 = vmatpush3.bf16.msra.mxu1 %v10037_v40 }
0x23a7   : > { %v5055_v3 = vpop.f32.mrf.mxu1 }
0x23a8   : > { %v5061_v4 = vadd.f32 %v5055_v3, %v4656_v11  ;;  %v8611_v11 = vld [vmem:[%s11989_s1 + $0x1] ss:$0 sm:$0xff]  ;;  %s11994_s1 = sld [smem:[#allocation20_spill]] }
0x23a9   : > { %v9749_v6 = vpop.f32.mrf.mxu1 }
0x23aa   : > { %v5062_v7 = vadd.f32 %v5061_v4, %v11172_v50  ;;  %v10027_v50 = vld [vmem:[%s11988_s18 + $0x30] sm:$0xff]  }
0x23ab   : > { %v5058_v8 = vpop.f32.mrf.mxu1  ;;  %9754 = vmatpush3.bf16.msra.mxu0 %v10027_v50 }
0x23ac   : > { %v11414_v9 = vadd.f32 %v8608_v5, %v5062_v7  ;;  %9755 = vmatprep.subr.bf16.mxu0 %v10597_v28  ;;  %v8645_v8 = vld [vmem:[%s11993_s13 + $0x1] ss:$0 sm:$0xff] }
0x23ad   : > { %v9750_v10 = vpop.f32.mrf.mxu1 }
0x23ae   : > { %v5076_v12 = vsel %vm1496_vm1, %v11414_v9, 0.0  ;;  %v5367_v31 = vld [vmem:[%s11994_s1 + $0x90] sm:$0xff]  ;;  %v5357_v38 = vld [vmem:[%s11994_s1 + $0x40] sm:$0xff] }
0x23af   : > { %5077 = vadd.xlane.f32.xlu0 %v5076_v12  ;;  %9756 = vmatpush3.bf16.msra.mxu0 %v10028_v17  ;;  %v5371_v32 = vld [vmem:[%s11994_s1 + $0xb0] sm:$0xff]  ;;  %v5361_v39 = vld [vmem:[%s11994_s1 + $0x60] sm:$0xff] }
0x23b0   : > { %9757 = vmatprep.subr.bf16.mxu0 %v10597_v28  ;;  %v8675_v34 = vcombine.high %v5367_v31, %v5371_v32  ;;  %v8674_v36 = vcombine.low %v5367_v31, %v5371_v32  ;;  %v8663_v40 = vcombine.high %v5357_v38, %v5361_v39  ;;  %v10053_v31 = vld [vmem:[%s11995_s3 + $0x60] ss:$16 sps:$4 sm:$0xff]   ;;  %v5360_v32 = vld [vmem:[%s11994_s1 + $0x58] sm:$0xff] }
0x23b3   : > { %9758 = vmatpush3.bf16.msra.mxu0 %v10029_v18 }
0x2438   : > { %v5078_v13 = vpop.xlane.xlu0 %5077 }
0x2439   : > { %v5079_v41 = vmul.f32 0.015625, %v5078_v13 }
0x243b   : > { %v5080_v14 = vsub.f32 %v11414_v9, %v5079_v41 }
0x243d   : > { %v5081_v15 = vmul.f32 %v5080_v14, %v5080_v14 }
0x243f   : > { %v5082_v37 = vsel %vm1496_vm1, %v5081_v15, 0.0 }
0x2440   : > { %5083 = vadd.xlane.f32.xlu1 %v5082_v37 }
0x24c9   : > { %v5084_v21 = vpop.xlane.xlu1 %5083 }
0x24ca   : > { %v5085_v22 = vmul.f32 0.015625, %v5084_v21  ;;  %v5373_v21 = vld [vmem:[%s11994_s1 + $0xc0] sm:$0xff] }
0x24cc   : > { %v5086_v23 = vadd.f32 1e-06, %v5085_v22  ;;  %v5377_v22 = vld [vmem:[%s11994_s1 + $0xe0] sm:$0xff] }
0x24ce   : > { %10496 = vrsqrt.f32 %v5086_v23  ;;  %v5375_v23 = vld [vmem:[%s11994_s1 + $0xd0] sm:$0xff] }
0x24db   : > { %v10497_v24 = vpop.eup %10496 }
0x24dc   : > { %v5088_v25 = vmul.f32 %v10497_v24, %v5080_v14  ;;  %v5379_v24 = vld [vmem:[%s11994_s1 + $0xf0] sm:$0xff] }
0x24de   : > { %v5095_v27 = vmul.f32 %v8611_v11, %v5088_v25  ;;  %v8678_v11 = vcombine.low %v5373_v21, %v5377_v22  ;;  %v8683_v25 = vcombine.high %v5375_v23, %v5379_v24 }
0x24e0   : > { %v5102_v58 = vadd.f32 %v8612_v26, %v5095_v27  ;;  %v8682_v26 = vcombine.low %v5375_v23, %v5379_v24  ;;  %5676 = vmatprep.subr.bf16.mxu1 %v8683_v25  ;;  %v5365_v27 = vld [vmem:[%s11994_s1 + $0x80] sm:$0xff]  ;;  %v5368_v25 = vld [vmem:[%s11994_s1 + $0x98] sm:$0xff] }
0x24e2   : > { %v5103_v29 = vpack.c.bf16 %v5102_v58, %v5102_v58  ;;  %v5369_v58 = vld [vmem:[%s11994_s1 + $0xa0] sm:$0xff] }
0x24e3   : > { %v8670_v33 = vcombine.low %v5365_v27, %v5369_v58 }
0x24e4   : > { %9760 = vmatmul.mubr.msk.bf16.vlgmr.msra.gmra.mxu0 %vm1565_vm3, %v5103_v29  ;;  %v8671_v29 = vcombine.high %v5365_v27, %v5369_v58  ;;  %v10055_v27 = vld [vmem:[%s11995_s3 + $0x64] ss:$16 sps:$4 sm:$0xff]  }
0x25a4   : > { %v5182_v44 = vpop.f32.mrf.mxu0 }
0x25a5   : > { %v5183_v46 = vadd.f32 %v8622_v42, %v5182_v44  ;;  %v5359_v42 = vld [vmem:[%s11994_s1 + $0x50] sm:$0xff] }
0x25a6   : > { %v9761_v20 = vpop.f32.mrf.mxu0  ;;  %v5363_v44 = vld [vmem:[%s11994_s1 + $0x70] sm:$0xff] }
0x25a7   : > { %v5189_v45 = vmul.f32 0.70710677, %v5183_v46  ;;  %v5188_v4 = vmul.f32 0.5, %v5183_v46  ;;  %v8662_v46 = vcombine.low %v5357_v38, %v5361_v39  ;;  %v8667_v20 = vcombine.high %v5359_v42, %v5363_v44  ;;  %v10059_v39 = vld [vmem:[%s11995_s3 + $0x40] ss:$16 sps:$4 sm:$0xff]  }
0x25a8   : > { %v5185_v47 = vpop.f32.mrf.mxu0 }
0x25a9   : > { %v5192_v48 = vand.u32 2147483647, %v5189_v45  ;;  %vm5190_vm10 = vcmp.ge.f32.partialorder %v5189_v45, 0.0  ;;  %v8666_v45 = vcombine.low %v5359_v42, %v5363_v44  ;;  %v5349_v47 = vld [vmem:[%s11994_s1] sm:$0xff]  ;;  %v5356_v42 = vld [vmem:[%s11994_s1 + $0x38] sm:$0xff] }
0x25aa   : > { %v9762_v49 = vpop.f32.mrf.mxu0  ;;  %v5191_v2 = vsel %vm5190_vm10, 1.0, %v10600_v35  ;;  %v10067_v44 = vld [vmem:[%s11995_s3 + $0x24] ss:$16 sps:$4 sm:$0xff]  }
0x25ab   : > { %v5193_v51 = vmul.f32 0.3275911, %v5192_v48  ;;  %v5206_v19 = vsub.f32 0.0, %v5192_v48  ;;  %v5351_v49 = vld [vmem:[%s11994_s1 + $0x10] sm:$0xff] }
0x25ad   : > { %v5194_v52 = vadd.f32 1.0, %v5193_v51  ;;  %v5207_v53 = vmul.f32 %v5206_v19, %v5192_v48  ;;  %v5353_v48 = vld [vmem:[%s11994_s1 + $0x20] sm:$0xff]  ;;  %v5355_v19 = vld [vmem:[%s11994_s1 + $0x30] sm:$0xff] }
0x25ae   : > { %v8654_v51 = vcombine.low %v5349_v47, %v5353_v48 }
0x25af   : > { %10498 = vrcp.f32 %v5194_v52  ;;  %v5208_v55 = vmul.f32 1.442695, %v5207_v53  ;;  %v8655_v52 = vcombine.high %v5349_v47, %v5353_v48  ;;  %v10601_v53 = vmov 0   ;;  %v10073_v47 = vld [vmem:[%s11995_s3 + $0x4] ss:$16 sps:$4 sm:$0xff]  }
0x25b0   : > { %5618 = vmatprep.mubr.bf16.mxu0 %v10601_v53 }
0x25b1   : > { %10500 = vpow2.f32 %v5208_v55  ;;  %v8658_v55 = vcombine.low %v5351_v49, %v5355_v19 }
0x25bc   : > { %v10499_v54 = vpop.eup %10498 }
0x25bd   : > { %v5197_v30 = vmul.f32 1.0614054, %v10499_v54 }
0x25be   : > { %v10501_v63 = vpop.eup %10500 }
0x25bf   : > { %v5198_v56 = vadd.f32 -1.4531521, %v5197_v30  ;;  %v5378_v30 = vld [vmem:[%s11994_s1 + $0xe8] sm:$0xff] }
0x25c1   : > { %v5199_v28 = vmul.f32 %v10499_v54, %v5198_v56  ;;  %v8659_v56 = vcombine.high %v5351_v49, %v5355_v19  ;;  %v10052_v49 = vld [vmem:[%s11995_s3 + $0x2e4] ss:$16 sps:$4 sm:$0xff]   ;;  %v10050_v19 = vld [vmem:[%s11995_s3 + $0x2e0] ss:$16 sps:$4 sm:$0xff]  }
0x25c3   : > { %v5200_v57 = vadd.f32 1.4214138, %v5199_v28 }
0x25c5   : > { %v5201_v43 = vmul.f32 %v10499_v54, %v5200_v57 }
0x25c7   : > { %v5202_v59 = vadd.f32 -0.28449672, %v5201_v43  ;;  %v10040_v43 = vld [vmem:[%s11995_s3 + $0xe4] ss:$16 sps:$4 sm:$0xff]  }
0x25c9   : > { %v5203_v60 = vmul.f32 %v10499_v54, %v5202_v59 }
0x25cb   : > { %v5204_v61 = vadd.f32 0.2548296, %v5203_v60 }
0x25cd   : > { %v5205_v62 = vmul.f32 %v10499_v54, %v5204_v61  ;;  %v5374_v54 = vld [vmem:[%s11994_s1 + $0xc8] sm:$0xff] }
0x25ce   : > { %v8680_v28 = vcombine.low %v5374_v54, %v5378_v30  ;;  %v8681_v57 = vcombine.high %v5374_v54, %v5378_v30  ;;  %v10077_v54 = vld [vmem:[%s11995_s3 + $0x1e0] ss:$16 sps:$4 sm:$0xff]   ;;  %v10085_v30 = vld [vmem:[%s11995_s3 + $0x1c4] ss:$16 sps:$4 sm:$0xff]  }
0x25cf   : > { %v5210_v0 = vmul.f32 %v10501_v63, %v5205_v62  ;;  %v5330_v63 = vld [vmem:[%s11996_s5] sm:$0x1]  ;;  %s11998_s5 = sld [smem:[#allocation21_spill]] }
0x25d1   : > { %v5211_v1 = vsub.f32 1.0, %v5210_v0 }
0x25d3   : > { %v5212_v3 = vmul.f32 %v5211_v1, %v5191_v2  ;;  %v5331_v1 = vld [vmem:[%s11997_s6] sm:$0x1]  ;;  %s11999_s6 = sld [smem:[#allocation23_spill]] }
0x25d5   : > { %v5213_v5 = vadd.f32 1.0, %v5212_v3  ;;  %v5366_v3 = vld [vmem:[%s11994_s1 + $0x88] sm:$0xff] }
0x25d7   : > { %v5214_v6 = vmul.f32 %v5213_v5, %v5188_v4  ;;  %v5370_v4 = vld [vmem:[%s11994_s1 + $0xa8] sm:$0xff] }
0x25d9   : > { %v5215_v7 = vpack.c.bf16 %v5214_v6, %v5214_v6 }
0x25db   : > { %9780 = vmatmul.mubr.bf16.vlgmr.msra.gmra.mxu1 %v5215_v7  ;;  %v8673_v7 = vcombine.high %v5366_v3, %v5370_v4 }
0x25dc   : > { %5677 = vmatpush1.bf16.msra.mxu1 %v8682_v26  ;;  %5700 = vmatprep.mubr.bf16.mxu1 %v10601_v53  ;;  %v5372_v26 = vld [vmem:[%s11994_s1 + $0xb8] sm:$0xff] }
0x25dd   : > { %5678 = vmatprep.subr.bf16.mxu1 %v8675_v34  ;;  %v10061_v34 = vld [vmem:[%s11995_s3 + $0x44] ss:$16 sps:$4 sm:$0xff]  }
0x25e0   : > { %5679 = vmatpush1.bf16.msra.mxu1 %v8674_v36  ;;  %v8676_v36 = vcombine.low %v5368_v25, %v5372_v26 }
0x25e1   : > { %5680 = vmatprep.subr.bf16.mxu1 %v8667_v20 }
0x25e4   : > { %5681 = vmatpush1.bf16.msra.mxu1 %v8666_v45  ;;  %v10065_v45 = vld [vmem:[%s11995_s3 + $0x20] ss:$16 sps:$4 sm:$0xff]  }
0x25e5   : > { %5682 = vmatprep.subr.bf16.mxu1 %v8659_v56  ;;  %v10064_v56 = vld [vmem:[%s11995_s3 + $0x2a4] ss:$16 sps:$4 sm:$0xff]  }
0x25e8   : > { %5683 = vmatpush1.bf16.msra.mxu1 %v8658_v55  ;;  %v10056_v55 = vld [vmem:[%s11995_s3 + $0x2c0] ss:$16 sps:$4 sm:$0xff]  }
0x25e9   : > { %7316 = vmatprep.subr.bf16.mxu1 %v10040_v43  ;;  %v10062_v43 = vld [vmem:[%s11995_s3 + $0x2a0] ss:$16 sps:$4 sm:$0xff]  }
0x269b   : > { %v5323_v10 = vpop.f32.mrf.mxu1 }
0x269c   : > { %v5324_v12 = vadd.f32 %v8645_v8, %v5323_v10  ;;  %v10038_v8 = vld [vmem:[%s11995_s3 + $0xe0] ss:$16 sps:$4 sm:$0xff]   ;;  %v5358_v10 = vld [vmem:[%s11994_s1 + $0x48] sm:$0xff] }
0x269d   : > { %v9781_v13 = vpop.f32.mrf.mxu1 }
0x269e   : > { %v5329_v41 = vadd.f32 %v5324_v12, %v11414_v9  ;;  %v8679_v9 = vcombine.high %v5373_v21, %v5377_v22  ;;  %v5362_v12 = vld [vmem:[%s11994_s1 + $0x68] sm:$0xff]  ;;  %v10043_v13 = vld [vmem:[%s11995_s3 + $0xc4] ss:$16 sps:$4 sm:$0xff]   ;;  %v5376_v21 = vld [vmem:[%s11994_s1 + $0xd8] sm:$0xff] }
0x269f   : > { %v5326_v14 = vpop.f32.mrf.mxu1  ;;  %v5380_v22 = vld [vmem:[%s11994_s1 + $0xf8] sm:$0xff] }
0x26a0   : > { %v5333_v15 = vsel %vm5332_vm11, %v5329_v41, 0.0  ;;  %5594 = vmatprep.subr.bf16.mxu0 %v8679_v9  ;;  %v8665_v14 = vcombine.high %v5358_v10, %v5362_v12  ;;  %v10049_v9 = vld [vmem:[%s11995_s3 + $0x84] ss:$16 sps:$4 sm:$0xff]   ;;  %v8685_v24 = vcombine.high %v5376_v21, %v5380_v22  ;;  %v8684_v58 = vcombine.low %v5376_v21, %v5380_v22  ;;  %v10110_v21 = vld [vmem:[%s11995_s3 + $0x3a0] ss:$16 sps:$4 sm:$0xff]  }
0x26a1   : > { %5334 = vadd.xlane.f32.xlu0 %v5333_v15  ;;  %v9782_v35 = vpop.f32.mrf.mxu1  ;;  %5595 = vmatpush1.bf16.msra.mxu0 %v8678_v11  ;;  %v10041_v15 = vld [vmem:[%s11995_s3 + $0xc0] ss:$16 sps:$4 sm:$0xff]   ;;  %v10118_v22 = vld [vmem:[%s11995_s3 + $0x384] ss:$16 sps:$4 sm:$0xff]  }
0x26a2   : > { %5596 = vmatprep.subr.bf16.mxu0 %v8671_v29  ;;  %v5350_v35 = vld [vmem:[%s11994_s1 + $0x8] sm:$0xff]  ;;  %v10047_v11 = vld [vmem:[%s11995_s3 + $0x80] ss:$16 sps:$4 sm:$0xff]   ;;  %v8677_v29 = vcombine.high %v5368_v25, %v5372_v26  ;;  %v10130_v25 = vld [vmem:[%s11995_s3 + $0x344] ss:$16 sps:$4 sm:$0xff]  }
0x26a3   : > { %v10128_v26 = vld [vmem:[%s11995_s3 + $0x340] ss:$16 sps:$4 sm:$0xff]  }
0x26a5   : > { %5597 = vmatpush1.bf16.msra.mxu0 %v8670_v33  ;;  %v5364_v33 = vld [vmem:[%s11994_s1 + $0x78] sm:$0xff] }
0x26a6   : > { %5598 = vmatprep.subr.bf16.mxu0 %v8663_v40  ;;  %v8669_v38 = vcombine.high %v5360_v32, %v5364_v33  ;;  %v5352_v40 = vld [vmem:[%s11994_s1 + $0x18] sm:$0xff] }
0x26a7   : > { %v8661_v20 = vcombine.high %v5352_v40, %v5356_v42  ;;  %v8660_v48 = vcombine.low %v5352_v40, %v5356_v42 }
0x26a9   : > { %5599 = vmatpush1.bf16.msra.mxu0 %v8662_v46  ;;  %v8668_v46 = vcombine.low %v5360_v32, %v5364_v33  ;;  %v10148_v32 = vld [vmem:[%s11995_s3 + $0x6e4] ss:$16 sps:$4 sm:$0xff]   ;;  %v5543_v33 = vlaneseq }
0x26aa   : > { %5600 = vmatprep.subr.bf16.mxu0 %v8655_v52  ;;  %v10079_v52 = vld [vmem:[%s11995_s3 + $0x1e4] ss:$16 sps:$4 sm:$0xff]  }
0x26ad   : > { %5601 = vmatpush1.bf16.msra.mxu0 %v8654_v51  ;;  %v10071_v51 = vld [vmem:[%s11995_s3] ss:$16 sps:$4 sm:$0xff]  }
0x26ae   : > { %5635 = vmatprep.subr.bf16.mxu0 %v8681_v57  ;;  %v10091_v57 = vld [vmem:[%s11995_s3 + $0x1a4] ss:$16 sps:$4 sm:$0xff]  }
0x272a   : > { %v5335_v37 = vpop.xlane.xlu0 %5334 }
0x272b   : > { %v5336_v16 = vmul.f32 0.015625, %v5335_v37  ;;  %v5354_v37 = vld [vmem:[%s11994_s1 + $0x28] sm:$0xff] }
0x272c   : > { %v8656_v23 = vcombine.low %v5350_v35, %v5354_v37 }
0x272d   : > { %v11449_v50 = vsub.f32 %v5329_v41, %v5336_v16  ;;  %v8672_v41 = vcombine.low %v5366_v3, %v5370_v4  ;;  %v10046_v16 = vld [vmem:[%s11995_s3 + $0xa4] ss:$16 sps:$4 sm:$0xff]   ;;  %v10101_v4 = vld [vmem:[%s11995_s3 + $0x160] ss:$16 sps:$4 sm:$0xff]  }
0x272e   : > { %v10082_v3 = vld [vmem:[%s11995_s3 + $0x244] ss:$16 sps:$4 sm:$0xff]  }
0x272f   : > { %v5338_v17 = vmul.f32 %v11449_v50, %v11449_v50 }
0x2731   : > { %v5339_v18 = vsel %vm5332_vm11, %v5338_v17, 0.0  ;;  %v8657_v17 = vcombine.high %v5350_v35, %v5354_v37  ;;  %v10098_v35 = vld [vmem:[%s11995_s3 + $0x3e0] ss:$16 sps:$4 sm:$0xff]   ;;  %v10106_v37 = vld [vmem:[%s11995_s3 + $0x3c4] ss:$16 sps:$4 sm:$0xff]  }
0x2732   : > { %5340 = vadd.xlane.f32.xlu1 %v5339_v18  ;;  %v10044_v18 = vld [vmem:[%s11995_s3 + $0xa0] ss:$16 sps:$4 sm:$0xff]  }
0x27bb   : > { %v5341_v59 = vpop.xlane.xlu1 %5340 }
0x27bc   : > { %v5342_v60 = vmul.f32 0.015625, %v5341_v59  ;;  %v10070_v59 = vld [vmem:[%s11995_s3 + $0x284] ss:$16 sps:$4 sm:$0xff]  }
0x27be   : > { %v5343_v61 = vadd.f32 1e-06, %v5342_v60  ;;  %v10089_v60 = vld [vmem:[%s11995_s3 + $0x1a0] ss:$16 sps:$4 sm:$0xff]  }
0x27c0   : > { %10502 = vrsqrt.f32 %v5343_v61  ;;  %v10097_v61 = vld [vmem:[%s11995_s3 + $0x184] ss:$16 sps:$4 sm:$0xff]  }
0x27cd   : > { %v10503_v62 = vpop.eup %10502 }
0x27ce   : > { %v5345_v0 = vmul.f32 %v10503_v62, %v11449_v50  ;;  %v8664_v50 = vcombine.low %v5358_v10, %v5362_v12  ;;  %v10068_v62 = vld [vmem:[%s11995_s3 + $0x280] ss:$16 sps:$4 sm:$0xff]   ;;  %v10115_v10 = vld [vmem:[%s11995_s3 + $0x124] ss:$16 sps:$4 sm:$0xff]  }
0x27cf   : > { %v10086_v12 = vld [vmem:[%s11995_s3 + $0x220] ss:$16 sps:$4 sm:$0xff]  }
0x27d0   : > { %v5346_v2 = vmul.f32 %v5345_v0, %v5330_v63  ;;  %v10076_v63 = vld [vmem:[%s11995_s3 + $0x264] ss:$16 sps:$4 sm:$0xff]   ;;  %v10095_v0 = vld [vmem:[%s11995_s3 + $0x180] ss:$16 sps:$4 sm:$0xff]  }
0x27d2   : > { %v5347_v5 = vadd.f32 %v5346_v2, %v5331_v1  ;;  %v10103_v1 = vld [vmem:[%s11995_s3 + $0x164] ss:$16 sps:$4 sm:$0xff]   ;;  %v10074_v2 = vld [vmem:[%s11995_s3 + $0x260] ss:$16 sps:$4 sm:$0xff]  }
0x27d4   : > { %v11479_v6 = vpack.c.bf16 %v5347_v5, %v5347_v5  ;;  %v10109_v5 = vld [vmem:[%s11995_s3 + $0x144] ss:$16 sps:$4 sm:$0xff]  }
0x27d6   : > { %8686 = vmatmul.mubr.msk.bf16.vlgmr.msra.gmra.mxu0 %vm1565_vm3, %v11479_v6  ;;  %8688 = vmatmul.mubr.msk.bf16.vlgmr.msra.gmra.mxu1 %vm1565_vm3, %v11479_v6 }
0x27d7   : > { %5636 = vmatpush1.bf16.msra.mxu0 %v8680_v28  ;;  %5659 = vmatprep.mubr.bf16.mxu0 %v10601_v53  ;;  %v10083_v28 = vld [vmem:[%s11995_s3 + $0x1c0] ss:$16 sps:$4 sm:$0xff]  }
0x27d8   : > { %5637 = vmatprep.subr.bf16.mxu0 %v8673_v7  ;;  %7317 = vmatpush1.bf16.msra.mxu1 %v10038_v8  ;;  %v10088_v7 = vld [vmem:[%s11995_s3 + $0x224] ss:$16 sps:$4 sm:$0xff]   ;;  %v10107_v8 = vld [vmem:[%s11995_s3 + $0x140] ss:$16 sps:$4 sm:$0xff]  }
0x27d9   : > { %7318 = vmatprep.subr.bf16.mxu1 %v10043_v13  ;;  %v10094_v13 = vld [vmem:[%s11995_s3 + $0x204] ss:$16 sps:$4 sm:$0xff]  }
0x27db   : > { %5638 = vmatpush1.bf16.msra.mxu0 %v8672_v41  ;;  %v10113_v41 = vld [vmem:[%s11995_s3 + $0x120] ss:$16 sps:$4 sm:$0xff]  }
0x27dc   : > { %5639 = vmatprep.subr.bf16.mxu0 %v8665_v14  ;;  %7319 = vmatpush1.bf16.msra.mxu1 %v10041_v15  ;;  %v10092_v14 = vld [vmem:[%s11995_s3 + $0x200] ss:$16 sps:$4 sm:$0xff]   ;;  %v10100_v15 = vld [vmem:[%s11995_s3 + $0x3e4] ss:$16 sps:$4 sm:$0xff]  }
0x27dd   : > { %7320 = vmatprep.subr.bf16.mxu1 %v10046_v16  ;;  %v10104_v16 = vld [vmem:[%s11995_s3 + $0x3c0] ss:$16 sps:$4 sm:$0xff]  }
0x27df   : > { %5640 = vmatpush1.bf16.msra.mxu0 %v8664_v50  ;;  %v10112_v50 = vld [vmem:[%s11995_s3 + $0x3a4] ss:$16 sps:$4 sm:$0xff]  }
0x27e0   : > { %5641 = vmatprep.subr.bf16.mxu0 %v8657_v17  ;;  %7321 = vmatpush1.bf16.msra.mxu1 %v10044_v18  ;;  %v10121_v17 = vld [vmem:[%s11995_s3 + $0x104] ss:$16 sps:$4 sm:$0xff]   ;;  %v10119_v18 = vld [vmem:[%s11995_s3 + $0x100] ss:$16 sps:$4 sm:$0xff]  }
0x27e1   : > { %7322 = vmatprep.subr.bf16.mxu1 %v10049_v9  ;;  %v10127_v9 = vld [vmem:[%s11995_s3 + $0x4e4] ss:$16 sps:$4 sm:$0xff]  }
0x27e3   : > { %5642 = vmatpush1.bf16.msra.mxu0 %v8656_v23  ;;  %v10116_v23 = vld [vmem:[%s11995_s3 + $0x380] ss:$16 sps:$4 sm:$0xff]  }
0x27e4   : > { %5717 = vmatprep.subr.bf16.mxu0 %v8685_v24  ;;  %7323 = vmatpush1.bf16.msra.mxu1 %v10047_v11  ;;  %v10124_v24 = vld [vmem:[%s11995_s3 + $0x364] ss:$16 sps:$4 sm:$0xff]   ;;  %v10122_v11 = vld [vmem:[%s11995_s3 + $0x360] ss:$16 sps:$4 sm:$0xff]  }
0x27e5   : > { %7324 = vmatprep.subr.bf16.mxu1 %v10055_v27  ;;  %v10136_v27 = vld [vmem:[%s11995_s3 + $0x324] ss:$16 sps:$4 sm:$0xff]  }
0x27e6   : > { %8687 = vmatmul.mubr.msk.bf16.vlgmr.msra.gmra.mxu0 %vm1565_vm3, %v11479_v6 }
0x27e7   : > { %5718 = vmatpush1.bf16.msra.mxu0 %v8684_v58  ;;  %5741 = vmatprep.mubr.bf16.mxu0 %v10601_v53  ;;  %v10058_v53 = vld [vmem:[%s11995_s3 + $0x2c4] ss:$16 sps:$4 sm:$0xff]   ;;  %v10134_v58 = vld [vmem:[%s11995_s3 + $0x320] ss:$16 sps:$4 sm:$0xff]  }
0x27e8   : > { %5719 = vmatprep.subr.bf16.mxu0 %v8677_v29  ;;  %7325 = vmatpush1.bf16.msra.mxu1 %v10053_v31  ;;  %v10142_v29 = vld [vmem:[%s11995_s3 + $0x304] ss:$16 sps:$4 sm:$0xff]   ;;  %v10140_v31 = vld [vmem:[%s11995_s3 + $0x300] ss:$16 sps:$4 sm:$0xff]  }
0x27e9   : > { %7326 = vmatprep.subr.bf16.mxu1 %v10061_v34  ;;  %v11568_v34 = vshrl.u32 %v5543_v33, 7 }
0x27eb   : > { %5720 = vmatpush1.bf16.msra.mxu0 %v8676_v36  ;;  %v11571_v36 = vsub.s32 0, %v11568_v34  ;;  %v5565_v40 = vsub.s32 5, %v11568_v34 }
0x27ec   : > { %5721 = vmatprep.subr.bf16.mxu0 %v8669_v38  ;;  %7327 = vmatpush1.bf16.msra.mxu1 %v10059_v39  ;;  %v11574_v38 = vld [vmem:[%s11998_s5] sm:$0xff]  ;;  %v11577_v39 = vsub.s32 1, %v11568_v34  ;;  %s12000_s5 = sld [smem:[#allocation24_spill]] }
0x27ed   : > { %7328 = vmatprep.subr.bf16.mxu1 %v10067_v44  ;;  %v5546_v42 = vrot.slane %v11574_v38, %v11571_v36 }
0x27ee   : > { %v5550_v44 = vrot.slane %v11574_v38, %v11577_v39 }
0x27ef   : > { %5722 = vmatpush1.bf16.msra.mxu0 %v8668_v46  ;;  %v5566_v46 = vrot.slane %v11574_v38, %v5565_v40 }
0x27f0   : > { %5723 = vmatprep.subr.bf16.mxu0 %v8661_v20  ;;  %7329 = vmatpush1.bf16.msra.mxu1 %v10065_v45 }
0x27f1   : > { %7330 = vmatprep.subr.bf16.mxu1 %v10073_v47 }
0x27f3   : > { %5724 = vmatpush1.bf16.msra.mxu0 %v8660_v48 }
0x27f4   : > { %7357 = vmatprep.subr.bf16.mxu0 %v10052_v49  ;;  %7331 = vmatpush1.bf16.msra.mxu1 %v10071_v51 }
0x27f5   : > { %7332 = vmatprep.subr.bf16.mxu1 %v10079_v52 }
0x27f6   : > { %8689 = vmatmul.mubr.msk.bf16.vlgmr.msra.gmra.mxu0 %vm1565_vm3, %v11479_v6  ;;  %v10080_v6 = vld [vmem:[%s11995_s3 + $0x240] ss:$16 sps:$4 sm:$0xff]  }
0x27f7   : > { %7358 = vmatpush1.bf16.msra.mxu0 %v10050_v19 }
0x27f8   : > { %7359 = vmatprep.subr.bf16.mxu0 %v10058_v53  ;;  %7333 = vmatpush2.bf16.msra.mxu1 %v10077_v54 }
0x27f9   : > { %7334 = vmatprep.subr.bf16.mxu1 %v10085_v30  ;;  %v10125_v30 = vld [vmem:[%s11995_s3 + $0x4e0] ss:$16 sps:$4 sm:$0xff]  }
0x27fb   : > { %7360 = vmatpush1.bf16.msra.mxu0 %v10056_v55 }
0x27fc   : > { %7361 = vmatprep.subr.bf16.mxu0 %v10064_v56  ;;  %7335 = vmatpush2.bf16.msra.mxu1 %v10083_v28 }
0x27fd   : > { %7336 = vmatprep.subr.bf16.mxu1 %v10091_v57  ;;  %v10133_v57 = vld [vmem:[%s11995_s3 + $0x4c4] ss:$16 sps:$4 sm:$0xff]  }
0x27ff   : > { %7362 = vmatpush1.bf16.msra.mxu0 %v10062_v43 }
0x2800   : > { %7363 = vmatprep.subr.bf16.mxu0 %v10070_v59  ;;  %7337 = vmatpush2.bf16.msra.mxu1 %v10089_v60  ;;  %v10131_v59 = vld [vmem:[%s11995_s3 + $0x4c0] ss:$16 sps:$4 sm:$0xff]   ;;  %v11600_v60 = vsub.s32 2, %v11568_v34 }
0x2801   : > { %7338 = vmatprep.subr.bf16.mxu1 %v10097_v61  ;;  %v10139_v61 = vld [vmem:[%s11995_s3 + $0x4a4] ss:$16 sps:$4 sm:$0xff]  }
0x2803   : > { %7364 = vmatpush1.bf16.msra.mxu0 %v10068_v62  ;;  %v11604_v62 = vsub.s32 3, %v11568_v34 }
0x2804   : > { %7365 = vmatprep.subr.bf16.mxu0 %v10076_v63  ;;  %7339 = vmatpush2.bf16.msra.mxu1 %v10095_v0  ;;  %v10137_v63 = vld [vmem:[%s11995_s3 + $0x4a0] ss:$16 sps:$4 sm:$0xff]   ;;  %v5554_v0 = vrot.slane %v11574_v38, %v11600_v60 }
0x2805   : > { %7340 = vmatprep.subr.bf16.mxu1 %v10103_v1  ;;  %v10145_v1 = vld [vmem:[%s11995_s3 + $0x484] ss:$16 sps:$4 sm:$0xff]  }
0x2807   : > { %7366 = vmatpush1.bf16.msra.mxu0 %v10074_v2  ;;  %v5558_v2 = vrot.slane %v11574_v38, %v11604_v62 }
0x2808   : > { %7367 = vmatprep.subr.bf16.mxu0 %v10082_v3  ;;  %7341 = vmatpush2.bf16.msra.mxu1 %v10101_v4  ;;  %v10143_v4 = vld [vmem:[%s11995_s3 + $0x480] ss:$16 sps:$4 sm:$0xff]  }
0x2809   : > { %7342 = vmatprep.subr.bf16.mxu1 %v10109_v5 }
0x280b   : > { %7368 = vmatpush1.bf16.msra.mxu0 %v10080_v6 }
0x280c   : > { %7369 = vmatprep.subr.bf16.mxu0 %v10088_v7  ;;  %7343 = vmatpush2.bf16.msra.mxu1 %v10107_v8  ;;  %v10151_v7 = vld [vmem:[%s11995_s3 + $0x464] ss:$16 sps:$4 sm:$0xff]  }
0x280d   : > { %7344 = vmatprep.subr.bf16.mxu1 %v10115_v10 }
0x280f   : > { %7370 = vmatpush1.bf16.msra.mxu0 %v10086_v12 }
0x2810   : > { %7371 = vmatprep.subr.bf16.mxu0 %v10094_v13  ;;  %7345 = vmatpush2.bf16.msra.mxu1 %v10113_v41  ;;  %v10146_v13 = vld [vmem:[%s11995_s3 + $0x6e0] ss:$16 sps:$4 sm:$0xff]  }
0x2811   : > { %7346 = vmatprep.subr.bf16.mxu1 %v10121_v17  ;;  %v10149_v41 = vld [vmem:[%s11995_s3 + $0x460] ss:$16 sps:$4 sm:$0xff]   ;;  %v10160_v17 = vld [vmem:[%s11995_s3 + $0x6a4] ss:$16 sps:$4 sm:$0xff]  }
0x2813   : > { %7372 = vmatpush1.bf16.msra.mxu0 %v10092_v14 }
0x2814   : > { %7373 = vmatprep.subr.bf16.mxu0 %v10100_v15  ;;  %7347 = vmatpush2.bf16.msra.mxu1 %v10119_v18  ;;  %v10163_v18 = vld [vmem:[%s11995_s3 + $0x424] ss:$16 sps:$4 sm:$0xff]  }
0x2815   : > { %7398 = vmatprep.subr.bf16.mxu1 %v10127_v9  ;;  %v10161_v9 = vld [vmem:[%s11995_s3 + $0x420] ss:$16 sps:$4 sm:$0xff]  }
0x2817   : > { %7374 = vmatpush2.bf16.msra.mxu0 %v10098_v35  ;;  %v10154_v35 = vld [vmem:[%s11995_s3 + $0x6c4] ss:$16 sps:$4 sm:$0xff]  }
0x2818   : > { %7375 = vmatprep.subr.bf16.mxu0 %v10106_v37  ;;  %v10157_v37 = vld [vmem:[%s11995_s3 + $0x444] ss:$16 sps:$4 sm:$0xff]  }
0x281b   : > { %7376 = vmatpush2.bf16.msra.mxu0 %v10104_v16  ;;  %v10152_v16 = vld [vmem:[%s11995_s3 + $0x6c0] ss:$16 sps:$4 sm:$0xff]  }
0x281c   : > { %7377 = vmatprep.subr.bf16.mxu0 %v10112_v50  ;;  %v10155_v50 = vld [vmem:[%s11995_s3 + $0x440] ss:$16 sps:$4 sm:$0xff]  }
0x281f   : > { %7378 = vmatpush2.bf16.msra.mxu0 %v10110_v21  ;;  %v5573_v21 = vsub.s32 7, %v11568_v34 }
0x2820   : > { %7379 = vmatprep.subr.bf16.mxu0 %v10118_v22  ;;  %v10158_v22 = vld [vmem:[%s11995_s3 + $0x6a0] ss:$16 sps:$4 sm:$0xff]  }
0x2823   : > { %7380 = vmatpush2.bf16.msra.mxu0 %v10116_v23  ;;  %v10166_v23 = vld [vmem:[%s11995_s3 + $0x684] ss:$16 sps:$4 sm:$0xff]  }
0x2824   : > { %7381 = vmatprep.subr.bf16.mxu0 %v10124_v24  ;;  %v10169_v24 = vld [vmem:[%s11995_s3 + $0x404] ss:$16 sps:$4 sm:$0xff]  }
0x2827   : > { %7382 = vmatpush2.bf16.msra.mxu0 %v10122_v11  ;;  %v5574_v11 = vrot.slane %v11574_v38, %v5573_v21  ;;  %v10221_v21 = vld [vmem:[%s11995_s3 + $0xe8] ss:$16 sps:$4 sm:$0xff]  }
0x2828   : > { %7383 = vmatprep.subr.bf16.mxu0 %v10130_v25 }
0x282b   : > { %7384 = vmatpush2.bf16.msra.mxu0 %v10128_v26  ;;  %v10164_v26 = vld [vmem:[%s11995_s3 + $0x680] ss:$16 sps:$4 sm:$0xff]  }
0x282c   : > { %7385 = vmatprep.subr.bf16.mxu0 %v10136_v27  ;;  %v10167_v27 = vld [vmem:[%s11995_s3 + $0x400] ss:$16 sps:$4 sm:$0xff]  }
0x282f   : > { %7386 = vmatpush2.bf16.msra.mxu0 %v10134_v58 }
0x2830   : > { %7387 = vmatprep.subr.bf16.mxu0 %v10142_v29  ;;  %v10172_v29 = vld [vmem:[%s11995_s3 + $0x664] ss:$16 sps:$4 sm:$0xff]  }
0x2833   : > { %7388 = vmatpush2.bf16.msra.mxu0 %v10140_v31  ;;  %v10175_v31 = vld [vmem:[%s11995_s3 + $0x5e4] ss:$16 sps:$4 sm:$0xff]  }
0x2834   : > { %7439 = vmatprep.subr.bf16.mxu0 %v10148_v32 }
0x2896   : > { %v5620_v20 = vpop.f32.mrf.mxu0  ;;  %v11585_v45 = vpop.f32.mrf.mxu1 }
0x2897   : > { %v5621_v47 = vadd.f32 %v5620_v20, %v5546_v42  ;;  %v10170_v42 = vld [vmem:[%s11995_s3 + $0x660] ss:$16 sps:$4 sm:$0xff]   ;;  %v10178_v20 = vld [vmem:[%s11995_s3 + $0x644] ss:$16 sps:$4 sm:$0xff]  }
0x2898   : > { %v5622_v48 = vpop.f32.mrf.mxu0  ;;  %v5704_v49 = vpop.f32.mrf.mxu1 }
0x2899   : > { %v5623_v51 = vadd.f32 %v5622_v48, %v5550_v44  ;;  %v5705_v52 = vadd.f32 %v5704_v49, %v5566_v46  ;;  %v11590_v55 = vpack.c.bf16 %v5621_v47, %v5621_v47  ;;  %v10173_v44 = vld [vmem:[%s11995_s3 + $0x5e0] ss:$16 sps:$4 sm:$0xff]   ;;  %v10181_v47 = vld [vmem:[%s11995_s3 + $0x5c4] ss:$16 sps:$4 sm:$0xff]  }
0x289a   : > { %v5624_v19 = vpop.f32.mrf.mxu0  ;;  %v5706_v53 = vpop.f32.mrf.mxu1  ;;  %v10176_v48 = vld [vmem:[%s11995_s3 + $0x640] ss:$16 sps:$4 sm:$0xff]  }
0x289b   : > { %v11587_v54 = vpack.c.bf16 %v5623_v51, %v5623_v51  ;;  %v11593_v43 = vpack.c.bf16 %v5705_v52, %v5705_v52  ;;  %v10179_v49 = vld [vmem:[%s11995_s3 + $0x5c0] ss:$16 sps:$4 sm:$0xff]   ;;  %v10184_v51 = vld [vmem:[%s11995_s3 + $0x624] ss:$16 sps:$4 sm:$0xff]  }
0x289c   : > { %v5625_v56 = vpop.f32.mrf.mxu0  ;;  %v5707_v28 = vpop.f32.mrf.mxu1  ;;  %v10187_v52 = vld [vmem:[%s11995_s3 + $0x5a4] ss:$16 sps:$4 sm:$0xff]   ;;  %v10182_v19 = vld [vmem:[%s11995_s3 + $0x620] ss:$16 sps:$4 sm:$0xff]  }
0x289d   : > { %7348 = vmatprep.mubr.bf16.mxu1 %v11587_v54  ;;  %v10185_v53 = vld [vmem:[%s11995_s3 + $0x5a0] ss:$16 sps:$4 sm:$0xff]   ;;  %v10193_v56 = vld [vmem:[%s11995_s3 + $0x584] ss:$16 sps:$4 sm:$0xff]  }
0x289e   : > { %7349 = vmatmul.mubr.bf16.vlgmr.msra.gmra.mxu1 %v11590_v55  ;;  %v10188_v28 = vld [vmem:[%s11995_s3 + $0x600] ss:$16 sps:$4 sm:$0xff]  }
0x289f   : > { %7399 = vmatpush1.bf16.msra.mxu1 %v10125_v30  ;;  %7430 = vmatprep.mubr.bf16.mxu1 %v11593_v43  ;;  %v10190_v30 = vld [vmem:[%s11995_s3 + $0x604] ss:$16 sps:$4 sm:$0xff]  }
0x28a0   : > { %7400 = vmatprep.subr.bf16.mxu1 %v10133_v57  ;;  %v10191_v57 = vld [vmem:[%s11995_s3 + $0x580] ss:$16 sps:$4 sm:$0xff]  }
0x28a3   : > { %7401 = vmatpush1.bf16.msra.mxu1 %v10131_v59  ;;  %v10196_v59 = vld [vmem:[%s11995_s3 + $0x7e4] ss:$16 sps:$4 sm:$0xff]  }
0x28a4   : > { %7402 = vmatprep.subr.bf16.mxu1 %v10139_v61  ;;  %v10199_v61 = vld [vmem:[%s11995_s3 + $0x564] ss:$16 sps:$4 sm:$0xff]  }
0x28a6   : > { %v5661_v3 = vpop.f32.mrf.mxu0 }
0x28a7   : > { %7403 = vmatpush1.bf16.msra.mxu1 %v10137_v63  ;;  %v5662_v5 = vadd.f32 %v5661_v3, %v5554_v0  ;;  %v10194_v63 = vld [vmem:[%s11995_s3 + $0x7e0] ss:$16 sps:$4 sm:$0xff]  }
0x28a8   : > { %v5663_v6 = vpop.f32.mrf.mxu0  ;;  %7404 = vmatprep.subr.bf16.mxu1 %v10145_v1  ;;  %v10197_v0 = vld [vmem:[%s11995_s3 + $0x560] ss:$16 sps:$4 sm:$0xff]   ;;  %v10202_v1 = vld [vmem:[%s11995_s3 + $0x7c4] ss:$16 sps:$4 sm:$0xff]  }
0x28a9   : > { %v5664_v8 = vadd.f32 %v5663_v6, %v5558_v2  ;;  %v11618_v14 = vpack.c.bf16 %v5662_v5, %v5662_v5  ;;  %v10205_v2 = vld [vmem:[%s11995_s3 + $0x544] ss:$16 sps:$4 sm:$0xff]   ;;  %v10200_v3 = vld [vmem:[%s11995_s3 + $0x7c0] ss:$16 sps:$4 sm:$0xff]   ;;  %v5561_v5 = vsub.s32 4, %v11568_v34 }
0x28aa   : > { %v5665_v10 = vpop.f32.mrf.mxu0  ;;  %v10208_v6 = vld [vmem:[%s11995_s3 + $0x7a4] ss:$16 sps:$4 sm:$0xff]  }
0x28ab   : > { %v11614_v12 = vpack.c.bf16 %v5664_v8, %v5664_v8  ;;  %7405 = vmatpush1.bf16.msra.mxu1 %v10143_v4  ;;  %v10203_v4 = vld [vmem:[%s11995_s3 + $0x540] ss:$16 sps:$4 sm:$0xff]  }
0x28ac   : > { %v5666_v15 = vpop.f32.mrf.mxu0  ;;  %7406 = vmatprep.subr.bf16.mxu1 %v10151_v7  ;;  %v10211_v7 = vld [vmem:[%s11995_s3 + $0x524] ss:$16 sps:$4 sm:$0xff]   ;;  %v10206_v8 = vld [vmem:[%s11995_s3 + $0x7a0] ss:$16 sps:$4 sm:$0xff]  }
0x28ad   : > { %7389 = vmatprep.mubr.bf16.mxu0 %v11614_v12  ;;  %v10209_v10 = vld [vmem:[%s11995_s3 + $0x520] ss:$16 sps:$4 sm:$0xff]   ;;  %v10217_v15 = vld [vmem:[%s11995_s3 + $0x504] ss:$16 sps:$4 sm:$0xff]  }
0x28ae   : > { %7390 = vmatmul.mubr.bf16.vlgmr.msra.gmra.mxu0 %v11618_v14 }
0x28af   : > { %7440 = vmatpush1.bf16.msra.mxu0 %v10146_v13  ;;  %7407 = vmatpush1.bf16.msra.mxu1 %v10149_v41  ;;  %v5562_v13 = vrot.slane %v11574_v38, %v5561_v5  ;;  %v10214_v41 = vld [vmem:[%s11995_s3 + $0x784] ss:$16 sps:$4 sm:$0xff]   ;;  %v10280_v5 = vld [vmem:[%s11995_s3 + $0x22c] ss:$16 sps:$4 sm:$0xff]  }
0x28b0   : > { %7441 = vmatprep.subr.bf16.mxu0 %v10154_v35  ;;  %7408 = vmatprep.subr.bf16.mxu1 %v10157_v37  ;;  %v10212_v35 = vld [vmem:[%s11995_s3 + $0x780] ss:$16 sps:$4 sm:$0xff]  }
0x28b1   : > { %v10215_v37 = vld [vmem:[%s11995_s3 + $0x500] ss:$16 sps:$4 sm:$0xff]  }
0x28b3   : > { %7442 = vmatpush1.bf16.msra.mxu0 %v10152_v16  ;;  %7409 = vmatpush1.bf16.msra.mxu1 %v10155_v50  ;;  %v5703_v16 = vadd.f32 %v11585_v45, %v5562_v13  ;;  %v10220_v50 = vld [vmem:[%s11995_s3 + $0x764] ss:$16 sps:$4 sm:$0xff]   ;;  %v10229_v45 = vld [vmem:[%s11995_s3 + $0xcc] ss:$16 sps:$4 sm:$0xff]  }
0x28b4   : > { %7443 = vmatprep.subr.bf16.mxu0 %v10160_v17  ;;  %7410 = vmatprep.subr.bf16.mxu1 %v10163_v18  ;;  %v10223_v17 = vld [vmem:[%s11995_s3 + $0xec] ss:$16 sps:$4 sm:$0xff]   ;;  %v10218_v18 = vld [vmem:[%s11995_s3 + $0x760] ss:$16 sps:$4 sm:$0xff]  }
0x28b5   : > { %v10289_v13 = vld [vmem:[%s11995_s3 + $0x18c] ss:$16 sps:$4 sm:$0xff]  }
0x28b6   : > { %v11634_v25 = vpop.f32.mrf.mxu0 }
0x28b7   : > { %7444 = vmatpush1.bf16.msra.mxu0 %v10158_v22  ;;  %7411 = vmatpush1.bf16.msra.mxu1 %v10161_v9  ;;  %v11680_v22 = vpack.c.bf16 %v5703_v16, %v5703_v16  ;;  %v10226_v9 = vld [vmem:[%s11995_s3 + $0x744] ss:$16 sps:$4 sm:$0xff]   ;;  %v10290_v16 = vld [vmem:[%s11995_s3 + $0x3e8] ss:$16 sps:$4 sm:$0xff]  }
0x28b8   : > { %v5745_v58 = vpop.f32.mrf.mxu0  ;;  %7445 = vmatprep.subr.bf16.mxu0 %v10166_v23  ;;  %7412 = vmatprep.subr.bf16.mxu1 %v10169_v24  ;;  %v10224_v23 = vld [vmem:[%s11995_s3 + $0x740] ss:$16 sps:$4 sm:$0xff]   ;;  %v10227_v24 = vld [vmem:[%s11995_s3 + $0xc8] ss:$16 sps:$4 sm:$0xff]  }
0x28b9   : > { %v5746_v32 = vadd.f32 %v5745_v58, %v5574_v11  ;;  %v5569_v11 = vsub.s32 6, %v11568_v34  ;;  %v10230_v58 = vld [vmem:[%s11995_s3 + $0x720] ss:$16 sps:$4 sm:$0xff]   ;;  %v10238_v34 = vld [vmem:[%s11995_s3 + $0x704] ss:$16 sps:$4 sm:$0xff]  }
0x28ba   : > { %v5747_v33 = vpop.f32.mrf.mxu0 }
0x28bb   : > { %v11640_v40 = vpack.c.bf16 %v5746_v32, %v5746_v32  ;;  %7446 = vmatpush1.bf16.msra.mxu0 %v10164_v26  ;;  %7413 = vmatpush1.bf16.msra.mxu1 %v10167_v27  ;;  %v10232_v26 = vld [vmem:[%s11995_s3 + $0x724] ss:$16 sps:$4 sm:$0xff]   ;;  %v10235_v27 = vld [vmem:[%s11995_s3 + $0xac] ss:$16 sps:$4 sm:$0xff]   ;;  %v10236_v32 = vld [vmem:[%s11995_s3 + $0x700] ss:$16 sps:$4 sm:$0xff]  }
0x28bc   : > { %v5748_v46 = vpop.f32.mrf.mxu0  ;;  %7447 = vmatprep.subr.bf16.mxu0 %v10172_v29  ;;  %7414 = vmatprep.subr.bf16.mxu1 %v10175_v31  ;;  %v10233_v29 = vld [vmem:[%s11995_s3 + $0xa8] ss:$16 sps:$4 sm:$0xff]   ;;  %v5570_v31 = vrot.slane %v11574_v38, %v5569_v11 }
0x28bd   : > { %7471 = vmatprep.mubr.bf16.mxu0 %v11640_v40  ;;  %v10239_v33 = vld [vmem:[%s11995_s3 + $0x88] ss:$16 sps:$4 sm:$0xff]   ;;  %v10247_v46 = vld [vmem:[%s11995_s3 + $0x6c] ss:$16 sps:$4 sm:$0xff]  }
0x28be   : > { %v10242_v38 = vld [vmem:[%s11995_s3 + $0x2e8] ss:$16 sps:$4 sm:$0xff]  }
0x28bf   : > { %7448 = vmatpush1.bf16.msra.mxu0 %v10170_v42  ;;  %7415 = vmatpush2.bf16.msra.mxu1 %v10173_v44  ;;  %v5744_v42 = vadd.f32 %v11634_v25, %v5570_v31  ;;  %v10244_v44 = vld [vmem:[%s11995_s3 + $0x2ec] ss:$16 sps:$4 sm:$0xff]   ;;  %v10305_v11 = vld [vmem:[%s11995_s3 + $0x128] ss:$16 sps:$4 sm:$0xff]  }
0x28c0   : > { %7449 = vmatprep.subr.bf16.mxu0 %v10178_v20  ;;  %7416 = vmatprep.subr.bf16.mxu1 %v10181_v47  ;;  %v10245_v47 = vld [vmem:[%s11995_s3 + $0x68] ss:$16 sps:$4 sm:$0xff]   ;;  %v10253_v25 = vld [vmem:[%s11995_s3 + $0x4c] ss:$16 sps:$4 sm:$0xff]  }
0x28c1   : > { %v11702_v20 = vpack.c.bf16 %v5744_v42, %v5744_v42  ;;  %v10316_v31 = vld [vmem:[%s11995_s3 + $0x36c] ss:$16 sps:$4 sm:$0xff]  }
0x28c2   : > { %v10325_v42 = vld [vmem:[%s11995_s3 + $0x4cc] ss:$16 sps:$4 sm:$0xff]  }
0x28c3   : > { %7450 = vmatpush1.bf16.msra.mxu0 %v10176_v48  ;;  %7417 = vmatpush2.bf16.msra.mxu1 %v10179_v49  ;;  %v10250_v48 = vld [vmem:[%s11995_s3 + $0x2cc] ss:$16 sps:$4 sm:$0xff]   ;;  %v10248_v49 = vld [vmem:[%s11995_s3 + $0x2c8] ss:$16 sps:$4 sm:$0xff]  }
0x28c4   : > { %7451 = vmatprep.subr.bf16.mxu0 %v10184_v51  ;;  %7418 = vmatprep.subr.bf16.mxu1 %v10187_v52  ;;  %v10251_v51 = vld [vmem:[%s11995_s3 + $0x48] ss:$16 sps:$4 sm:$0xff]   ;;  %v10256_v52 = vld [vmem:[%s11995_s3 + $0x2ac] ss:$16 sps:$4 sm:$0xff]  }
0x28c7   : > { %7452 = vmatpush1.bf16.msra.mxu0 %v10182_v19  ;;  %7419 = vmatpush2.bf16.msra.mxu1 %v10185_v53  ;;  %v10259_v19 = vld [vmem:[%s11995_s3 + $0x2c] ss:$16 sps:$4 sm:$0xff]   ;;  %v10254_v53 = vld [vmem:[%s11995_s3 + $0x2a8] ss:$16 sps:$4 sm:$0xff]  }
0x28c8   : > { %7453 = vmatprep.subr.bf16.mxu0 %v10190_v30  ;;  %7420 = vmatprep.subr.bf16.mxu1 %v10193_v56  ;;  %v10257_v30 = vld [vmem:[%s11995_s3 + $0x28] ss:$16 sps:$4 sm:$0xff]   ;;  %v10262_v56 = vld [vmem:[%s11995_s3 + $0x28c] ss:$16 sps:$4 sm:$0xff]  }
0x28cb   : > { %7454 = vmatpush1.bf16.msra.mxu0 %v10188_v28  ;;  %7421 = vmatpush2.bf16.msra.mxu1 %v10191_v57  ;;  %v10260_v28 = vld [vmem:[%s11995_s3 + $0x288] ss:$16 sps:$4 sm:$0xff]  }
0x28cc   : > { %7455 = vmatprep.subr.bf16.mxu0 %v10196_v59  ;;  %7422 = vmatprep.subr.bf16.mxu1 %v10199_v61  ;;  %v10263_v57 = vld [vmem:[%s11995_s3 + $0x8] ss:$16 sps:$4 sm:$0xff]   ;;  %v10268_v59 = vld [vmem:[%s11995_s3 + $0x26c] ss:$16 sps:$4 sm:$0xff]  }
0x28cd   : > { %v10271_v61 = vld [vmem:[%s11995_s3 + $0x1ec] ss:$16 sps:$4 sm:$0xff]  }
0x28cf   : > { %7456 = vmatpush2.bf16.msra.mxu0 %v10194_v63  ;;  %7423 = vmatpush2.bf16.msra.mxu1 %v10197_v0  ;;  %v10266_v63 = vld [vmem:[%s11995_s3 + $0x268] ss:$16 sps:$4 sm:$0xff]  }
0x28d0   : > { %7457 = vmatprep.subr.bf16.mxu0 %v10202_v1  ;;  %7424 = vmatprep.subr.bf16.mxu1 %v10205_v2  ;;  %v10269_v0 = vld [vmem:[%s11995_s3 + $0x1e8] ss:$16 sps:$4 sm:$0xff]   ;;  %v10274_v1 = vld [vmem:[%s11995_s3 + $0x24c] ss:$16 sps:$4 sm:$0xff]  }
0x28d1   : > { %v10277_v2 = vld [vmem:[%s11995_s3 + $0x1cc] ss:$16 sps:$4 sm:$0xff]  }
0x28d3   : > { %7458 = vmatpush2.bf16.msra.mxu0 %v10200_v3  ;;  %7425 = vmatpush2.bf16.msra.mxu1 %v10203_v4  ;;  %v10272_v3 = vld [vmem:[%s11995_s3 + $0x248] ss:$16 sps:$4 sm:$0xff]  }
0x28d4   : > { %7459 = vmatprep.subr.bf16.mxu0 %v10208_v6  ;;  %7426 = vmatprep.subr.bf16.mxu1 %v10211_v7  ;;  %v10275_v4 = vld [vmem:[%s11995_s3 + $0x1c8] ss:$16 sps:$4 sm:$0xff]   ;;  %v10283_v6 = vld [vmem:[%s11995_s3 + $0x1ac] ss:$16 sps:$4 sm:$0xff]  }
0x28d5   : > { %v10278_v7 = vld [vmem:[%s11995_s3 + $0x228] ss:$16 sps:$4 sm:$0xff]  }
0x28d7   : > { %7460 = vmatpush2.bf16.msra.mxu0 %v10206_v8  ;;  %7427 = vmatpush2.bf16.msra.mxu1 %v10209_v10  ;;  %v10281_v8 = vld [vmem:[%s11995_s3 + $0x1a8] ss:$16 sps:$4 sm:$0xff]   ;;  %v10286_v10 = vld [vmem:[%s11995_s3 + $0x20c] ss:$16 sps:$4 sm:$0xff]  }
0x28d8   : > { %7461 = vmatprep.subr.bf16.mxu0 %v10214_v41  ;;  %7428 = vmatprep.subr.bf16.mxu1 %v10217_v15  ;;  %v10284_v41 = vld [vmem:[%s11995_s3 + $0x208] ss:$16 sps:$4 sm:$0xff]  }
0x28d9   : > { %v10287_v15 = vld [vmem:[%s11995_s3 + $0x188] ss:$16 sps:$4 sm:$0xff]  }
0x28db   : > { %7462 = vmatpush2.bf16.msra.mxu0 %v10212_v35  ;;  %7429 = vmatpush2.bf16.msra.mxu1 %v10215_v37  ;;  %v10292_v35 = vld [vmem:[%s11995_s3 + $0x3ec] ss:$16 sps:$4 sm:$0xff]  }
0x28dc   : > { %7463 = vmatprep.subr.bf16.mxu0 %v10220_v50  ;;  %7480 = vmatprep.subr.bf16.mxu1 %v10223_v17  ;;  %v10295_v37 = vld [vmem:[%s11995_s3 + $0x16c] ss:$16 sps:$4 sm:$0xff]   ;;  %v10293_v50 = vld [vmem:[%s11995_s3 + $0x168] ss:$16 sps:$4 sm:$0xff]  }
0x28dd   : > { %v10298_v17 = vld [vmem:[%s11995_s3 + $0x3cc] ss:$16 sps:$4 sm:$0xff]  }
0x28de   : > { %7431 = vmatmul.mubr.bf16.vlgmr.msra.gmra.mxu1 %v11680_v22 }
0x28df   : > { %7464 = vmatpush2.bf16.msra.mxu0 %v10218_v18  ;;  %7481 = vmatpush1.bf16.msra.mxu1 %v10221_v21  ;;  %v10301_v18 = vld [vmem:[%s11995_s3 + $0x14c] ss:$16 sps:$4 sm:$0xff]   ;;  %v10296_v21 = vld [vmem:[%s11995_s3 + $0x3c8] ss:$16 sps:$4 sm:$0xff]  }
0x28e0   : > { %7512 = vmatprep.mubr.bf16.mxu1 %v11587_v54  ;;  %7465 = vmatprep.subr.bf16.mxu0 %v10226_v9  ;;  %v10241_v54 = vld [vmem:[%s11995_s3 + $0x8c] ss:$16 sps:$4 sm:$0xff]   ;;  %v10299_v9 = vld [vmem:[%s11995_s3 + $0x148] ss:$16 sps:$4 sm:$0xff]  }
0x28e1   : > { %7482 = vmatprep.subr.bf16.mxu1 %v10229_v45  ;;  %v10304_v45 = vld [vmem:[%s11995_s3 + $0x3ac] ss:$16 sps:$4 sm:$0xff]  }
0x28e3   : > { %7466 = vmatpush2.bf16.msra.mxu0 %v10224_v23  ;;  %7483 = vmatpush1.bf16.msra.mxu1 %v10227_v24  ;;  %v10307_v23 = vld [vmem:[%s11995_s3 + $0x12c] ss:$16 sps:$4 sm:$0xff]   ;;  %v10302_v24 = vld [vmem:[%s11995_s3 + $0x3a8] ss:$16 sps:$4 sm:$0xff]  }
0x28e4   : > { %7467 = vmatprep.subr.bf16.mxu0 %v10232_v26  ;;  %7484 = vmatprep.subr.bf16.mxu1 %v10235_v27  ;;  %v10310_v26 = vld [vmem:[%s11995_s3 + $0x38c] ss:$16 sps:$4 sm:$0xff]  }
0x28e5   : > { %v10313_v27 = vld [vmem:[%s11995_s3 + $0x10c] ss:$16 sps:$4 sm:$0xff]  }
0x28e7   : > { %7468 = vmatpush2.bf16.msra.mxu0 %v10230_v58  ;;  %7485 = vmatpush1.bf16.msra.mxu1 %v10233_v29  ;;  %v10308_v58 = vld [vmem:[%s11995_s3 + $0x388] ss:$16 sps:$4 sm:$0xff]  }
0x28e8   : > { %7469 = vmatprep.subr.bf16.mxu0 %v10238_v34  ;;  %7486 = vmatprep.subr.bf16.mxu1 %v10241_v54  ;;  %v10311_v29 = vld [vmem:[%s11995_s3 + $0x108] ss:$16 sps:$4 sm:$0xff]   ;;  %v10319_v34 = vld [vmem:[%s11995_s3 + $0x4ec] ss:$16 sps:$4 sm:$0xff]  }
0x28e9   : > { %v10314_v54 = vld [vmem:[%s11995_s3 + $0x368] ss:$16 sps:$4 sm:$0xff]  }
0x28eb   : > { %7470 = vmatpush2.bf16.msra.mxu0 %v10236_v32  ;;  %7487 = vmatpush1.bf16.msra.mxu1 %v10239_v33  ;;  %v10317_v32 = vld [vmem:[%s11995_s3 + $0x4e8] ss:$16 sps:$4 sm:$0xff]   ;;  %v10322_v33 = vld [vmem:[%s11995_s3 + $0x34c] ss:$16 sps:$4 sm:$0xff]  }
0x28ec   : > { %7521 = vmatprep.subr.bf16.mxu0 %v10244_v44  ;;  %7488 = vmatprep.subr.bf16.mxu1 %v10247_v46  ;;  %v10320_v44 = vld [vmem:[%s11995_s3 + $0x348] ss:$16 sps:$4 sm:$0xff]  }
0x28ed   : > { %v10323_v46 = vld [vmem:[%s11995_s3 + $0x4c8] ss:$16 sps:$4 sm:$0xff]  }
0x28ee   : > { %7472 = vmatmul.mubr.bf16.vlgmr.msra.gmra.mxu0 %v11702_v20 }
0x28ef   : > { %7522 = vmatpush1.bf16.msra.mxu0 %v10242_v38  ;;  %7553 = vmatprep.mubr.bf16.mxu0 %v11614_v12  ;;  %v10265_v12 = vld [vmem:[%s11995_s3 + $0xc] ss:$16 sps:$4 sm:$0xff]  }
0x28f0   : > { %7489 = vmatpush1.bf16.msra.mxu1 %v10245_v47  ;;  %7523 = vmatprep.subr.bf16.mxu0 %v10250_v48  ;;  %v10328_v38 = vld [vmem:[%s11995_s3 + $0x32c] ss:$16 sps:$4 sm:$0xff]   ;;  %v10326_v48 = vld [vmem:[%s11995_s3 + $0x328] ss:$16 sps:$4 sm:$0xff]  }
0x28f1   : > { %7490 = vmatprep.subr.bf16.mxu1 %v10253_v25  ;;  %v10331_v47 = vld [vmem:[%s11995_s3 + $0x4ac] ss:$16 sps:$4 sm:$0xff]  }
0x28f2   : > { %v10334_v25 = vld [vmem:[%s11995_s3 + $0x30c] ss:$16 sps:$4 sm:$0xff]  }
0x28f3   : > { %7524 = vmatpush1.bf16.msra.mxu0 %v10248_v49  ;;  %v10337_v49 = vld [vmem:[%s11995_s3 + $0x48c] ss:$16 sps:$4 sm:$0xff]  }
0x28f4   : > { %7491 = vmatpush1.bf16.msra.mxu1 %v10251_v51  ;;  %7525 = vmatprep.subr.bf16.mxu0 %v10256_v52  ;;  %v10335_v51 = vld [vmem:[%s11995_s3 + $0x488] ss:$16 sps:$4 sm:$0xff]   ;;  %v10340_v52 = vld [vmem:[%s11995_s3 + $0x6ec] ss:$16 sps:$4 sm:$0xff]  }
0x28f5   : > { %7492 = vmatprep.subr.bf16.mxu1 %v10259_v19  ;;  %v10343_v19 = vld [vmem:[%s11995_s3 + $0x46c] ss:$16 sps:$4 sm:$0xff]  }
0x28f7   : > { %7526 = vmatpush1.bf16.msra.mxu0 %v10254_v53  ;;  %v10338_v53 = vld [vmem:[%s11995_s3 + $0x6e8] ss:$16 sps:$4 sm:$0xff]  }
0x28f8   : > { %7493 = vmatpush1.bf16.msra.mxu1 %v10257_v30  ;;  %7527 = vmatprep.subr.bf16.mxu0 %v10262_v56  ;;  %v10341_v30 = vld [vmem:[%s11995_s3 + $0x468] ss:$16 sps:$4 sm:$0xff]   ;;  %v10346_v56 = vld [vmem:[%s11995_s3 + $0x6cc] ss:$16 sps:$4 sm:$0xff]  }
0x28f9   : > { %7494 = vmatprep.subr.bf16.mxu1 %v10265_v12  ;;  %v10349_v12 = vld [vmem:[%s11995_s3 + $0x44c] ss:$16 sps:$4 sm:$0xff]  }
0x28fb   : > { %7528 = vmatpush1.bf16.msra.mxu0 %v10260_v28  ;;  %v10344_v28 = vld [vmem:[%s11995_s3 + $0x6c8] ss:$16 sps:$4 sm:$0xff]  }
0x28fc   : > { %7495 = vmatpush1.bf16.msra.mxu1 %v10263_v57  ;;  %7529 = vmatprep.subr.bf16.mxu0 %v10268_v59  ;;  %v10347_v57 = vld [vmem:[%s11995_s3 + $0x448] ss:$16 sps:$4 sm:$0xff]   ;;  %v10352_v59 = vld [vmem:[%s11995_s3 + $0x6ac] ss:$16 sps:$4 sm:$0xff]  }
0x28fd   : > { %7496 = vmatprep.subr.bf16.mxu1 %v10271_v61  ;;  %v10355_v61 = vld [vmem:[%s11995_s3 + $0x42c] ss:$16 sps:$4 sm:$0xff]  }
0x28ff   : > { %7530 = vmatpush1.bf16.msra.mxu0 %v10266_v63  ;;  %v10350_v63 = vld [vmem:[%s11995_s3 + $0x6a8] ss:$16 sps:$4 sm:$0xff]  }
0x2900   : > { %7497 = vmatpush2.bf16.msra.mxu1 %v10269_v0  ;;  %7531 = vmatprep.subr.bf16.mxu0 %v10274_v1  ;;  %v10358_v0 = vld [vmem:[%s11995_s3 + $0x68c] ss:$16 sps:$4 sm:$0xff]   ;;  %v10356_v1 = vld [vmem:[%s11995_s3 + $0x688] ss:$16 sps:$4 sm:$0xff]  }
0x2901   : > { %7498 = vmatprep.subr.bf16.mxu1 %v10277_v2  ;;  %v10359_v2 = vld [vmem:[%s11995_s3 + $0x408] ss:$16 sps:$4 sm:$0xff]  }
0x2903   : > { %7532 = vmatpush1.bf16.msra.mxu0 %v10272_v3  ;;  %v10364_v3 = vld [vmem:[%s11995_s3 + $0x66c] ss:$16 sps:$4 sm:$0xff]  }
0x2904   : > { %7499 = vmatpush2.bf16.msra.mxu1 %v10275_v4  ;;  %7533 = vmatprep.subr.bf16.mxu0 %v10280_v5  ;;  %v10367_v4 = vld [vmem:[%s11995_s3 + $0x5ec] ss:$16 sps:$4 sm:$0xff]   ;;  %v10362_v5 = vld [vmem:[%s11995_s3 + $0x668] ss:$16 sps:$4 sm:$0xff]  }
0x2905   : > { %7500 = vmatprep.subr.bf16.mxu1 %v10283_v6  ;;  %v10365_v6 = vld [vmem:[%s11995_s3 + $0x5e8] ss:$16 sps:$4 sm:$0xff]  }
0x2907   : > { %7534 = vmatpush1.bf16.msra.mxu0 %v10278_v7  ;;  %v10370_v7 = vld [vmem:[%s11995_s3 + $0x64c] ss:$16 sps:$4 sm:$0xff]  }
0x2908   : > { %7501 = vmatpush2.bf16.msra.mxu1 %v10281_v8  ;;  %7535 = vmatprep.subr.bf16.mxu0 %v10286_v10  ;;  %v10373_v8 = vld [vmem:[%s11995_s3 + $0x5cc] ss:$16 sps:$4 sm:$0xff]   ;;  %v10368_v10 = vld [vmem:[%s11995_s3 + $0x648] ss:$16 sps:$4 sm:$0xff]  }
0x2909   : > { %7502 = vmatprep.subr.bf16.mxu1 %v10289_v13  ;;  %v10371_v13 = vld [vmem:[%s11995_s3 + $0x5c8] ss:$16 sps:$4 sm:$0xff]  }
0x290b   : > { %7536 = vmatpush1.bf16.msra.mxu0 %v10284_v41  ;;  %v10376_v41 = vld [vmem:[%s11995_s3 + $0x62c] ss:$16 sps:$4 sm:$0xff]  }
0x290c   : > { %7503 = vmatpush2.bf16.msra.mxu1 %v10287_v15  ;;  %7537 = vmatprep.subr.bf16.mxu0 %v10292_v35  ;;  %v10379_v15 = vld [vmem:[%s11995_s3 + $0x5ac] ss:$16 sps:$4 sm:$0xff]   ;;  %v10374_v35 = vld [vmem:[%s11995_s3 + $0x628] ss:$16 sps:$4 sm:$0xff]  }
0x290d   : > { %7504 = vmatprep.subr.bf16.mxu1 %v10295_v37  ;;  %v10377_v37 = vld [vmem:[%s11995_s3 + $0x5a8] ss:$16 sps:$4 sm:$0xff]  }
0x290f   : > { %7538 = vmatpush2.bf16.msra.mxu0 %v10290_v16  ;;  %v10382_v16 = vld [vmem:[%s11995_s3 + $0x60c] ss:$16 sps:$4 sm:$0xff]  }
0x2910   : > { %7505 = vmatpush2.bf16.msra.mxu1 %v10293_v50  ;;  %7539 = vmatprep.subr.bf16.mxu0 %v10298_v17  ;;  %v10385_v50 = vld [vmem:[%s11995_s3 + $0x58c] ss:$16 sps:$4 sm:$0xff]   ;;  %v10380_v17 = vld [vmem:[%s11995_s3 + $0x608] ss:$16 sps:$4 sm:$0xff]  }
0x2911   : > { %7506 = vmatprep.subr.bf16.mxu1 %v10301_v18  ;;  %v10383_v18 = vld [vmem:[%s11995_s3 + $0x588] ss:$16 sps:$4 sm:$0xff]  }
0x2913   : > { %7540 = vmatpush2.bf16.msra.mxu0 %v10296_v21  ;;  %v10388_v21 = vld [vmem:[%s11995_s3 + $0x7ec] ss:$16 sps:$4 sm:$0xff]  }
0x2914   : > { %7507 = vmatpush2.bf16.msra.mxu1 %v10299_v9  ;;  %7541 = vmatprep.subr.bf16.mxu0 %v10304_v45  ;;  %v10391_v9 = vld [vmem:[%s11995_s3 + $0x56c] ss:$16 sps:$4 sm:$0xff]   ;;  %v10386_v45 = vld [vmem:[%s11995_s3 + $0x7e8] ss:$16 sps:$4 sm:$0xff]  }
0x2915   : > { %7508 = vmatprep.subr.bf16.mxu1 %v10307_v23  ;;  %v10389_v23 = vld [vmem:[%s11995_s3 + $0x568] ss:$16 sps:$4 sm:$0xff]  }
0x2917   : > { %7542 = vmatpush2.bf16.msra.mxu0 %v10302_v24  ;;  %v10394_v24 = vld [vmem:[%s11995_s3 + $0x7cc] ss:$16 sps:$4 sm:$0xff]  }
0x2918   : > { %7509 = vmatpush2.bf16.msra.mxu1 %v10305_v11  ;;  %7543 = vmatprep.subr.bf16.mxu0 %v10310_v26  ;;  %v10397_v11 = vld [vmem:[%s11995_s3 + $0x54c] ss:$16 sps:$4 sm:$0xff]   ;;  %v10392_v26 = vld [vmem:[%s11995_s3 + $0x7c8] ss:$16 sps:$4 sm:$0xff]  }
0x2919   : > { %7510 = vmatprep.subr.bf16.mxu1 %v10313_v27  ;;  %v10395_v27 = vld [vmem:[%s11995_s3 + $0x548] ss:$16 sps:$4 sm:$0xff]  }
0x291b   : > { %7544 = vmatpush2.bf16.msra.mxu0 %v10308_v58  ;;  %v10400_v58 = vld [vmem:[%s11995_s3 + $0x7ac] ss:$16 sps:$4 sm:$0xff]  }
0x291c   : > { %7511 = vmatpush2.bf16.msra.mxu1 %v10311_v29  ;;  %7545 = vmatprep.subr.bf16.mxu0 %v10316_v31  ;;  %v10403_v29 = vld [vmem:[%s11995_s3 + $0x52c] ss:$16 sps:$4 sm:$0xff]   ;;  %v10398_v31 = vld [vmem:[%s11995_s3 + $0x7a8] ss:$16 sps:$4 sm:$0xff]  }
0x291d   : > { %7562 = vmatprep.subr.bf16.mxu1 %v10319_v34  ;;  %v10401_v34 = vld [vmem:[%s11995_s3 + $0x528] ss:$16 sps:$4 sm:$0xff]  }
0x291f   : > { %7513 = vmatmul.mubr.bf16.vlgmr.msra.gmra.mxu1 %v11590_v55  ;;  %7546 = vmatpush2.bf16.msra.mxu0 %v10314_v54  ;;  %v10329_v55 = vld [vmem:[%s11995_s3 + $0x4a8] ss:$16 sps:$4 sm:$0xff]   ;;  %v10406_v54 = vld [vmem:[%s11995_s3 + $0x78c] ss:$16 sps:$4 sm:$0xff]  }
0x2920   : > { %7563 = vmatpush1.bf16.msra.mxu1 %v10317_v32  ;;  %7594 = vmatprep.mubr.bf16.mxu1 %v11593_v43  ;;  %v10332_v43 = vld [vmem:[%s11995_s3 + $0x308] ss:$16 sps:$4 sm:$0xff]   ;;  %v10409_v32 = vld [vmem:[%s11995_s3 + $0x50c] ss:$16 sps:$4 sm:$0xff]  }
0x2921   : > { %7547 = vmatprep.subr.bf16.mxu0 %v10322_v33  ;;  %7564 = vmatprep.subr.bf16.mxu1 %v10325_v42  ;;  %v10404_v33 = vld [vmem:[%s11995_s3 + $0x788] ss:$16 sps:$4 sm:$0xff]  }
0x2922   : > { %v10407_v42 = vld [vmem:[%s11995_s3 + $0x508] ss:$16 sps:$4 sm:$0xff]  }
0x2923   : > { %7548 = vmatpush2.bf16.msra.mxu0 %v10320_v44  ;;  %v10412_v44 = vld [vmem:[%s11995_s3 + $0x76c] ss:$16 sps:$4 sm:$0xff]  }
0x2924   : > { %7565 = vmatpush1.bf16.msra.mxu1 %v10323_v46  ;;  %7549 = vmatprep.subr.bf16.mxu0 %v10328_v38  ;;  %v10422_v46 = vld [vmem:[%s11979_s4 + $0x78] sm:$0xff]  }
0x2925   : > { %7566 = vmatprep.subr.bf16.mxu1 %v10331_v47  ;;  %v10410_v38 = vld [vmem:[%s11995_s3 + $0x768] ss:$16 sps:$4 sm:$0xff]   ;;  %v10415_v47 = vld [vmem:[%s11995_s3 + $0x74c] ss:$16 sps:$4 sm:$0xff]  }
0x2927   : > { %7550 = vmatpush2.bf16.msra.mxu0 %v10326_v48  ;;  %v10423_v48 = vld [vmem:[%s11979_s4 + $0x38] sm:$0xff]  }
0x2928   : > { %7567 = vmatpush1.bf16.msra.mxu1 %v10329_v55  ;;  %7551 = vmatprep.subr.bf16.mxu0 %v10334_v25  ;;  %v10424_v55 = vld [vmem:[%s11979_s4 + $0x70] sm:$0xff]  }
0x2929   : > { %7568 = vmatprep.subr.bf16.mxu1 %v10337_v49  ;;  %v10413_v49 = vld [vmem:[%s11995_s3 + $0x748] ss:$16 sps:$4 sm:$0xff]  }
0x292b   : > { %7552 = vmatpush2.bf16.msra.mxu0 %v10332_v43 }
0x292c   : > { %7569 = vmatpush1.bf16.msra.mxu1 %v10335_v51  ;;  %7603 = vmatprep.subr.bf16.mxu0 %v10340_v52  ;;  %v10418_v51 = vld [vmem:[%s11995_s3 + $0x72c] ss:$16 sps:$4 sm:$0xff]   ;;  %v10425_v52 = vld [vmem:[%s11979_s4 + $0x30] sm:$0xff]  }
0x292d   : > { %7570 = vmatprep.subr.bf16.mxu1 %v10343_v19  ;;  %v10426_v19 = vld [vmem:[%s11979_s4 + $0x68] sm:$0xff]  }
0x292e   : > { %7554 = vmatmul.mubr.bf16.vlgmr.msra.gmra.mxu0 %v11618_v14  ;;  %v10353_v14 = vld [vmem:[%s11995_s3 + $0x428] ss:$16 sps:$4 sm:$0xff]  }
0x292f   : > { %7604 = vmatpush1.bf16.msra.mxu0 %v10338_v53  ;;  %7635 = vmatprep.mubr.bf16.mxu0 %v11640_v40  ;;  %v10361_v40 = vld [vmem:[%s11995_s3 + $0x40c] ss:$16 sps:$4 sm:$0xff]  }
0x2930   : > { %7571 = vmatpush1.bf16.msra.mxu1 %v10341_v30  ;;  %7605 = vmatprep.subr.bf16.mxu0 %v10346_v56  ;;  %v10416_v30 = vld [vmem:[%s11995_s3 + $0x728] ss:$16 sps:$4 sm:$0xff]  }
0x2931   : > { %7572 = vmatprep.subr.bf16.mxu1 %v10349_v12  ;;  %v10427_v12 = vld [vmem:[%s11979_s4 + $0x28] sm:$0xff]  }
0x2933   : > { %7606 = vmatpush1.bf16.msra.mxu0 %v10344_v28  ;;  %v10428_v28 = vld [vmem:[%s11979_s4 + $0x60] sm:$0xff]  }
0x2934   : > { %7573 = vmatpush1.bf16.msra.mxu1 %v10347_v57  ;;  %7607 = vmatprep.subr.bf16.mxu0 %v10352_v59  ;;  %v10419_v57 = vld [vmem:[%s11995_s3 + $0x708] ss:$16 sps:$4 sm:$0xff]   ;;  %v10429_v59 = vld [vmem:[%s11979_s4 + $0x20] sm:$0xff]  }
0x2935   : > { %7574 = vmatprep.subr.bf16.mxu1 %v10355_v61  ;;  %v10430_v61 = vld [vmem:[%s11979_s4 + $0x58] sm:$0xff]  }
0x2937   : > { %7608 = vmatpush1.bf16.msra.mxu0 %v10350_v63  ;;  %v10431_v63 = vld [vmem:[%s11979_s4 + $0x18] sm:$0xff]  }
0x2938   : > { %7575 = vmatpush1.bf16.msra.mxu1 %v10353_v14  ;;  %7609 = vmatprep.subr.bf16.mxu0 %v10358_v0  ;;  %v10432_v14 = vld [vmem:[%s11979_s4 + $0x50] sm:$0xff]  }
0x2939   : > { %7576 = vmatprep.subr.bf16.mxu1 %v10361_v40 }
0x293b   : > { %7610 = vmatpush1.bf16.msra.mxu0 %v10356_v1  ;;  %v10433_v1 = vld [vmem:[%s11979_s4 + $0x10] sm:$0xff]  }
0x293c   : > { %7577 = vmatpush1.bf16.msra.mxu1 %v10359_v2  ;;  %7611 = vmatprep.subr.bf16.mxu0 %v10364_v3  ;;  %v10434_v2 = vld [vmem:[%s11979_s4 + $0x48] sm:$0xff]  }
0x293d   : > { %7578 = vmatprep.subr.bf16.mxu1 %v10367_v4 }
0x293f   : > { %7612 = vmatpush1.bf16.msra.mxu0 %v10362_v5  ;;  %v10435_v5 = vld [vmem:[%s11979_s4 + $0x8] sm:$0xff]  }
0x2940   : > { %7579 = vmatpush2.bf16.msra.mxu1 %v10365_v6  ;;  %7613 = vmatprep.subr.bf16.mxu0 %v10370_v7  ;;  %v10438_v6 = vld [vmem:[%s11979_s4 + $0xf8] sm:$0xff]  }
0x2941   : > { %7580 = vmatprep.subr.bf16.mxu1 %v10373_v8  ;;  %v10439_v7 = vld [vmem:[%s11979_s4 + $0xb8] sm:$0xff]   ;;  %v10436_v8 = vld [vmem:[%s11979_s4 + $0x40] sm:$0xff]  }
0x2943   : > { %7614 = vmatpush1.bf16.msra.mxu0 %v10368_v10 }
0x2944   : > { %7581 = vmatpush2.bf16.msra.mxu1 %v10371_v13  ;;  %7615 = vmatprep.subr.bf16.mxu0 %v10376_v41  ;;  %v10440_v13 = vld [vmem:[%s11979_s4 + $0xf0] sm:$0xff]  }
0x2945   : > { %7582 = vmatprep.subr.bf16.mxu1 %v10379_v15  ;;  %v10441_v15 = vld [vmem:[%s11979_s4 + $0xb0] sm:$0xff]  }
0x2947   : > { %7616 = vmatpush1.bf16.msra.mxu0 %v10374_v35  ;;  %v11854_v35 = vld [vmem:[%s11999_s6] sm:$0xf]  ;;  %s949_s6 = sand.u32 1, %s10556_s23  }
0x2948   : > { %7583 = vmatpush2.bf16.msra.mxu1 %v10377_v37  ;;  %7617 = vmatprep.subr.bf16.mxu0 %v10382_v16  ;;  %v10442_v16 = vld [vmem:[%s11979_s4 + $0xe8] sm:$0xff]   ;;  %s950_s1 = scalar_lea.vmem [#allocation2], %s949_s6  ;;  %s8052_s7 = scalar_lea.sflag [#allocation3], %s949_s6 }
0x2949   : > { %7584 = vmatprep.subr.bf16.mxu1 %v10385_v50 }
0x294b   : > { %7618 = vmatpush1.bf16.msra.mxu0 %v10380_v17  ;;  %v10443_v17 = vld [vmem:[%s11979_s4 + $0xa8] sm:$0xff]  }
0x294c   : > { %7585 = vmatpush2.bf16.msra.mxu1 %v10383_v18  ;;  %7619 = vmatprep.subr.bf16.mxu0 %v10388_v21  ;;  %v7299_v18 = vrot.slane %v11854_v35, %v11571_v36  ;;  %v10444_v21 = vld [vmem:[%s11979_s4 + $0xe0] sm:$0xff]  }
0x294d   : > { %7586 = vmatprep.subr.bf16.mxu1 %v10391_v9  ;;  %v10445_v9 = vld [vmem:[%s11979_s4 + $0xa0] sm:$0xff]  }
0x294f   : > { %7620 = vmatpush2.bf16.msra.mxu0 %v10386_v45  ;;  %v7303_v45 = vrot.slane %v11854_v35, %v11577_v39 }
0x2950   : > { %7587 = vmatpush2.bf16.msra.mxu1 %v10389_v23  ;;  %7621 = vmatprep.subr.bf16.mxu0 %v10394_v24  ;;  %v10446_v23 = vld [vmem:[%s11979_s4 + $0xd8] sm:$0xff]  }
0x2951   : > { %7588 = vmatprep.subr.bf16.mxu1 %v10397_v11  ;;  %v11867_v11 = vld [vmem:[%s12000_s5] sm:$0xf]  ;;  %s8978_s5 = sshll.u32 %s10789_s0, 4  ;;  %s10508_s0 = sshll.u32 %s10602_s9, 4  ;;  %s10509_s0 = int_to_ptr.vmem [resolvable:$false] %s10508_s0 }
0x2952   : > { %s10510_s10 = scalar_lea.vmem %s10509_s0, 32 }
0x2953   : > { %7622 = vmatpush2.bf16.msra.mxu0 %v10392_v26 }
0x2954   : > { %7589 = vmatpush2.bf16.msra.mxu1 %v10395_v27  ;;  %7623 = vmatprep.subr.bf16.mxu0 %v10400_v58  ;;  %v11871_v58 = vld [vmem:[%s10751_s27] sm:$0xf] }
0x2955   : > { %7590 = vmatprep.subr.bf16.mxu1 %v10403_v29  ;;  %v10447_v29 = vld [vmem:[%s11979_s4 + $0x98] sm:$0xff]  }
0x2957   : > { %7624 = vmatpush2.bf16.msra.mxu0 %v10398_v31 }
0x2958   : > { %7591 = vmatpush2.bf16.msra.mxu1 %v10401_v34  ;;  %7625 = vmatprep.subr.bf16.mxu0 %v10406_v54  ;;  %v7649_v54 = vrot.slane %v11867_v11, %v11571_v36 }
0x2959   : > { %7592 = vmatprep.subr.bf16.mxu1 %v10409_v32 }
0x295b   : > { %7626 = vmatpush2.bf16.msra.mxu0 %v10404_v33 }
0x295c   : > { %7593 = vmatpush2.bf16.msra.mxu1 %v10407_v42  ;;  %7627 = vmatprep.subr.bf16.mxu0 %v10412_v44  ;;  %v7675_v44 = vrot.slane %v11871_v58, %v11571_v36 }
0x295d   : > { %9243 = vmatprep.subr.bf16.mxu1 %v10422_v46  ;;  %v7653_v46 = vrot.slane %v11867_v11, %v11577_v39 }
0x295e   : > { %v11825_v25 = vpop.f32.mrf.mxu1 }
0x295f   : > { %7595 = vmatmul.mubr.bf16.vlgmr.msra.gmra.mxu1 %v11680_v22  ;;  %7628 = vmatpush2.bf16.msra.mxu0 %v10410_v38  ;;  %v10421_v22 = vld [vmem:[%s11995_s3 + $0x70c] ss:$16 sps:$4 sm:$0xff]   ;;  %v7351_v24 = vadd.f32 %v11825_v25, %v7299_v18  ;;  %v10448_v38 = vld [vmem:[%s11979_s4 + $0xd0] sm:$0xff]   ;;  %s8064_s3 = sshll.u32 %s950_s1, 4  ;;  %s8065_s3 = int_to_ptr.vmem [resolvable:$true] %s8064_s3 }
0x2960   : > { %v11829_v43 = vpop.f32.mrf.mxu1  ;;  %7629 = vmatprep.subr.bf16.mxu0 %v10415_v47  ;;  %9244 = vmatpush3.bf16.msra.mxu1 %v10423_v48  ;;  %v10449_v48 = vld [vmem:[%s11979_s4 + $0x90] sm:$0xff]   ;;  %s10504_s8 = scalar_lea.vmem %s8065_s3, 16  ;;  %p10511_p0 = scmp.lt.s32.totalorder %s8065_s3, %s10509_s0 }
0x2961   : > { %9245 = vmatprep.subr.bf16.mxu1 %v10424_v55  ;;  %v7353_v26 = vadd.f32 %v11829_v43, %v7303_v45  ;;  %v7661_v45 = vrot.slane %v11867_v11, %v11604_v62  ;;  %p10505_p11 = scmp.ne.s32.totalorder %s8065_s3, %s10504_s8  ;;  %p10512_p1 = scmp.lt.s32.totalorder %s10510_s10, %s10504_s8 }
0x2962   : > { %v7354_v53 = vpop.f32.mrf.mxu1 }
0x2963   : > { %7630 = vmatpush2.bf16.msra.mxu0 %v10413_v49  ;;  %v7679_v49 = vrot.slane %v11871_v58, %v11577_v39  ;;  %v10451_v53 = vld [vmem:[%s11979_s4 + $0x88] sm:$0xff]   ;;  %v10453_v39 = vld [vmem:[%s11979_s4 + $0x80] sm:$0xff]   ;;  %p10506_p12 = pnand %p10505_p11, %p10806_p5  ;;  %p10513_p2 = por %p10512_p1, %p10511_p0 }
0x2964   : > { %v7355_v56 = vpop.f32.mrf.mxu1  ;;  %7631 = vmatprep.subr.bf16.mxu0 %v10418_v51  ;;  %9246 = vmatpush3.bf16.msra.mxu1 %v10425_v52 }
0x2965   : > { %9247 = vmatprep.subr.bf16.mxu1 %v10426_v19  ;;  %v10450_v19 = vld [vmem:[%s11979_s4 + $0xc8] sm:$0xff]   ;;  %p10507_p13 = pneg %p10506_p12 }
0x2967   : > { %7632 = vmatpush2.bf16.msra.mxu0 %v10416_v30  ;;  %p10514_p3 = pnand %p10513_p2, %p10507_p13 }
0x2968   : > { %7633 = vmatprep.subr.bf16.mxu0 %v10421_v22  ;;  %9248 = vmatpush3.bf16.msra.mxu1 %v10427_v12  ;;  %v10452_v12 = vld [vmem:[%s11979_s4 + $0xc0] sm:$0xff]  }
0x2969   : > { %9249 = vmatprep.subr.bf16.mxu1 %v10428_v28 }
0x296b   : > { %7634 = vmatpush2.bf16.msra.mxu0 %v10419_v57 }
0x296c   : > { %9250 = vmatpush3.bf16.msra.mxu1 %v10429_v59  ;;  %9265 = vmatprep.subr.bf16.mxu0 %v10438_v6 }
0x296d   : > { %9251 = vmatprep.subr.bf16.mxu1 %v10430_v61 }
0x296e   : > { %7636 = vmatmul.mubr.bf16.vlgmr.msra.gmra.mxu0 %v11702_v20  ;;  %v7391_v0 = vpop.f32.mrf.mxu0  ;;  %v10437_v20 = vld [vmem:[%s11979_s4] sm:$0xff]   ;;  %s11904_s4 = scalar_lea.hbm %s10766_s20, %s8978_s5 }
0x296f   : > { %9266 = vmatpush3.bf16.msra.mxu0 %v10439_v7  ;;  %v7392_v27 = vadd.f32 %v7391_v0, %v7351_v24 }
0x2970   : > { %v7393_v40 = vpop.f32.mrf.mxu0  ;;  %9252 = vmatpush3.bf16.msra.mxu1 %v10431_v63  ;;  %9267 = vmatprep.subr.bf16.mxu0 %v10440_v13 }
0x2971   : > { %9253 = vmatprep.subr.bf16.mxu1 %v10432_v14  ;;  %v7394_v31 = vadd.f32 %v7393_v40, %v7353_v26  ;;  %v7687_v26 = vrot.slane %v11871_v58, %v11604_v62 }
0x2972   : > { %v7395_v3 = vpop.f32.mrf.mxu0 }
0x2973   : > { %9268 = vmatpush3.bf16.msra.mxu0 %v10441_v15 }
0x2974   : > { %v7396_v4 = vpop.f32.mrf.mxu0  ;;  %9254 = vmatpush3.bf16.msra.mxu1 %v10433_v1  ;;  %9269 = vmatprep.subr.bf16.mxu0 %v10442_v16 }
0x2975   : > { %9255 = vmatprep.subr.bf16.mxu1 %v10434_v2 }
0x2977   : > { %9270 = vmatpush3.bf16.msra.mxu0 %v10443_v17 }
0x2978   : > { %9256 = vmatpush3.bf16.msra.mxu1 %v10435_v5  ;;  %9271 = vmatprep.subr.bf16.mxu0 %v10444_v21 }
0x2979   : > { %9257 = vmatprep.subr.bf16.mxu1 %v10436_v8  ;;  %v7307_v8 = vrot.slane %v11854_v35, %v11600_v60 }
0x297b   : > { %9272 = vmatpush3.bf16.msra.mxu0 %v10445_v9  ;;  %v7683_v9 = vrot.slane %v11871_v58, %v11600_v60 }
0x297c   : > { %9258 = vmatpush3.bf16.msra.mxu1 %v10437_v20  ;;  %9273 = vmatprep.subr.bf16.mxu0 %v10446_v23 }
0x297f   : > { %9274 = vmatpush3.bf16.msra.mxu0 %v10447_v29 }
0x2980   : > { %9275 = vmatprep.subr.bf16.mxu0 %v10448_v38 }
0x2983   : > { %9276 = vmatpush3.bf16.msra.mxu0 %v10449_v48  ;;  %v7776_v48 = vld [vmem:[%s10761_s12] sm:$0x1] }
0x2984   : > { %9277 = vmatprep.subr.bf16.mxu0 %v10450_v19 }
0x2987   : > { %9278 = vmatpush3.bf16.msra.mxu0 %v10451_v53 }
0x2988   : > { %9279 = vmatprep.subr.bf16.mxu0 %v10452_v12 }
0x298b   : > { %9280 = vmatpush3.bf16.msra.mxu0 %v10453_v39 }
0x299e   : > { %v7432_v10 = vpop.f32.mrf.mxu1 }
0x299f   : > { %v7433_v34 = vadd.f32 %v7432_v10, %v7392_v27  ;;  %v7311_v10 = vrot.slane %v11854_v35, %v11604_v62 }
0x29a0   : > { %v7434_v41 = vpop.f32.mrf.mxu1 }
0x29a1   : > { %v7435_v33 = vadd.f32 %v7434_v41, %v7394_v31 }
0x29a2   : > { %v7436_v37 = vpop.f32.mrf.mxu1 }
0x29a4   : > { %v7437_v50 = vpop.f32.mrf.mxu1 }
0x29a5   : > { %v7657_v50 = vrot.slane %v11867_v11, %v11600_v60 }
0x29ae   : > { %v7473_v32 = vpop.f32.mrf.mxu0 }
0x29af   : > { %v7474_v42 = vadd.f32 %v7473_v32, %v7433_v34 }
0x29b0   : > { %v7475_v47 = vpop.f32.mrf.mxu0 }
0x29b1   : > { %v7666_v55 = vmul.f32 %v7649_v54, %v7474_v42  ;;  %v7476_v25 = vadd.f32 %v7475_v47, %v7435_v33 }
0x29b2   : > { %v7477_v43 = vpop.f32.mrf.mxu0 }
0x29b3   : > { %v7692_v51 = vadd.f32 %v7675_v44, %v7666_v55  ;;  %v7667_v52 = vmul.f32 %v7653_v46, %v7476_v25 }
0x29b4   : > { %v7478_v36 = vpop.f32.mrf.mxu0 }
0x29b5   : > { %vm7696_vm12 = vcmp.ge.f32.partialorder %v7692_v51, 0.0  ;;  %v7700_v30 = vmul.f32 0.2, %v7692_v51  ;;  %v7693_v56 = vadd.f32 %v7679_v49, %v7667_v52 }
0x29b7   : > { %vm7697_vm13 = vcmp.ge.f32.partialorder %v7693_v56, 0.0  ;;  %v7701_v22 = vmul.f32 0.2, %v7693_v56  ;;  %v7704_v28 = vsel %vm7696_vm12, %v7692_v51, %v7700_v30 }
0x29b8   : > { %v7708_v61 = vpack.c.bf16 %v7704_v28, %v7704_v28 }
0x29b9   : > { %v7705_v57 = vsel %vm7697_vm13, %v7693_v56, %v7701_v22 }
0x29ba   : > { %v7709_v59 = vpack.c.bf16 %v7705_v57, %v7705_v57 }
0x29bc   : > { %8001 = vmatprep.mubr.bf16.mxu1 %v7709_v59 }
0x29bd   : > { %8002 = vmatmul.mubr.bf16.vlgmr.msra.gmra.mxu1 %v7708_v61 }
0x29df   : > { %v7514_v63 = vpop.f32.mrf.mxu1 }
0x29e0   : > { %v7515_v13 = vadd.f32 %v7514_v63, %v7307_v8 }
0x29e1   : > { %v7516_v14 = vpop.f32.mrf.mxu1 }
0x29e2   : > { %v7517_v41 = vadd.f32 %v7516_v14, %v7311_v10 }
0x29e3   : > { %v7518_v0 = vpop.f32.mrf.mxu1 }
0x29e5   : > { %v7519_v40 = vpop.f32.mrf.mxu1 }
0x29ee   : > { %v7555_v1 = vpop.f32.mrf.mxu0 }
0x29ef   : > { %v7556_v15 = vadd.f32 %v7555_v1, %v7515_v13 }
0x29f0   : > { %v7557_v2 = vpop.f32.mrf.mxu0 }
0x29f1   : > { %v7558_v37 = vadd.f32 %v7557_v2, %v7517_v41 }
0x29f2   : > { %v7559_v3 = vpop.f32.mrf.mxu0 }
0x29f4   : > { %v7560_v4 = vpop.f32.mrf.mxu0 }
0x2a1f   : > { %v7596_v5 = vpop.f32.mrf.mxu1 }
0x2a20   : > { %v7597_v16 = vadd.f32 %v7596_v5, %v7556_v15 }
0x2a21   : > { %v7598_v6 = vpop.f32.mrf.mxu1 }
0x2a22   : > { %v7599_v18 = vadd.f32 %v7598_v6, %v7558_v37 }
0x2a23   : > { %v7600_v7 = vpop.f32.mrf.mxu1 }
0x2a25   : > { %v7601_v20 = vpop.f32.mrf.mxu1 }
0x2a2e   : > { %v7637_v17 = vpop.f32.mrf.mxu0 }
0x2a2f   : > { %v7638_v21 = vadd.f32 %v7637_v17, %v7597_v16 }
0x2a30   : > { %v7639_v23 = vpop.f32.mrf.mxu0 }
0x2a31   : > { %v7668_v24 = vmul.f32 %v7657_v50, %v7638_v21  ;;  %v7640_v35 = vadd.f32 %v7639_v23, %v7599_v18 }
0x2a32   : > { %v7641_v27 = vpop.f32.mrf.mxu0 }
0x2a33   : > { %v7694_v29 = vadd.f32 %v7683_v9, %v7668_v24  ;;  %v7669_v31 = vmul.f32 %v7661_v45, %v7640_v35 }
0x2a34   : > { %v7642_v34 = vpop.f32.mrf.mxu0 }
0x2a35   : > { %vm7698_vm14 = vcmp.ge.f32.partialorder %v7694_v29, 0.0  ;;  %v7702_v54 = vmul.f32 0.2, %v7694_v29  ;;  %v7695_v32 = vadd.f32 %v7687_v26, %v7669_v31 }
0x2a37   : > { %vm7699_vm15 = vcmp.ge.f32.partialorder %v7695_v32, 0.0  ;;  %v7703_v60 = vmul.f32 0.2, %v7695_v32  ;;  %v7706_v33 = vsel %vm7698_vm14, %v7694_v29, %v7702_v54 }
0x2a38   : > { %v7710_v44 = vpack.c.bf16 %v7706_v33, %v7706_v33 }
0x2a39   : > { %v7707_v11 = vsel %vm7699_vm15, %v7695_v32, %v7703_v60 }
0x2a3a   : > { %v7711_v42 = vpack.c.bf16 %v7707_v11, %v7707_v11 }
0x2a3c   : > { %8041 = vmatprep.mubr.bf16.mxu0 %v7711_v42 }
0x2a3d   : > { %8042 = vmatmul.mubr.bf16.vlgmr.msra.gmra.mxu0 %v7710_v44 }
0x2a7d   : > { %v9259_v46 = vpop.f32.mrf.mxu1 }
0x2a7f   : > { %v9260_v62 = vpop.f32.mrf.mxu1 }
0x2a80   : > { %v9261_v58 = vadd.f32 %v9260_v62, %v9259_v46 }
0x2a81   : > { %v9262_v38 = vpop.f32.mrf.mxu1 }
0x2a82   : > { %v8004_v49 = vadd.f32 %v9261_v58, %v7776_v48 }
0x2a83   : > { %v9263_v47 = vpop.f32.mrf.mxu1 }
0x2afd   : > { %v9281_v55 = vpop.f32.mrf.mxu0 }
0x2aff   : > { %v9282_v25 = vpop.f32.mrf.mxu0 }
0x2b00   : > { %v9283_v43 = vadd.f32 %v9282_v25, %v9281_v55 }
0x2b01   : > { %v9284_v51 = vpop.f32.mrf.mxu0 }
0x2b02   : > { %v8044_v52 = vadd.f32 %v9283_v43, %v8004_v49 }
0x2b03   : > { %v9285_v19 = vpop.f32.mrf.mxu0 }
0x2b04   : > { %8050 = vst.msk [vmem:[%s950_s1] sm:$0x1] %vm8049_vm0, %v8044_v52 }
0x2b05   : > { %10517 = shalt.err (!%p10514_p3)
}
0x2b06   : > { %s10518_s1 = scalar_lea.hbm %s11904_s4, 16  ;;  %s10522_s6 = scalar_lea.hbm %s10766_s20, 32 }
0x2b07   : > { %p10519_p4 = scmp.ne.s32.totalorder %s11904_s4, %s10518_s1  ;;  %p10523_p9 = scmp.lt.s32.totalorder %s11904_s4, %s10766_s20 }
0x2b08   : > { %p10524_p10 = scmp.lt.s32.totalorder %s10522_s6, %s10518_s1 }
0x2b09   : > { %p10520_p7 = pnand %p10519_p4, %p10806_p5 }
0x2b0a   : > { %p10525_p11 = por %p10524_p10, %p10523_p9 }
0x2b0b   : > { %p10521_p8 = pneg %p10520_p7 }
0x2b0d   : > { %p10526_p12 = pnand %p10525_p11, %p10521_p8 }
0x2b0f   : > { %10529 = shalt.err (!%p10526_p12)
}
0x2b10   : > { %9784 = dma.vmem_to_hbm [thread:$0]  (%p10806_p5), %s8065_s3, 16, %s11904_s4, %s8052_s7  }
0x2b11 PF: > { %p9790_p13 = scmp.ge.s32.totalorder %s10564_s28, 2  ;;  %s8076_s9 = sand.u32 1, %s10552_s22  }
0x2b12   : > { %s8077_s8 = scalar_lea.sflag [#allocation3], %s8076_s9 }
0x2b13   : > { %p9787_p0 = pnand %p9790_p13, %p10810_p6 }
0x2b15   : > { %p9788_p1 = pneg %p9787_p0 }
0x2b17   : > { %10547 = dma.done.wait (%p9788_p1), %s8077_s8, 16  }
0x2b18   : > { %10549 = vsyncadd (%p9788_p1), %s8077_s8, 4294967280  ;;  %p73_p2 = scmp.ge.s32.totalorder %s10793_s2, 4   ;;  %s12001_s22 = smov %s10556_s23 }
0x2b19   : > { %s12002_s23 = smov %s10560_s26  ;;  %s12003_s26 = smov %s10804_s11 }
0x2b1a   : > { %s12004_s28 = smov %s10793_s2  ;;  %75 = sbr.rel (!%p73_p2) target bundleno = 64 (0x40), region = 268 }
0x2b1f   :  { %8081 = vsyncpa [#allocation3], 1 }
0x2b20   :  { %8083 = vsyncpa [#allocation3 + $0x1], 1 }

</bundles_post_ra>
